<compile_context>
chip_gen: v7x
topology: tpu7x:2x2x1
jax: 0.10.0
libtpu: 0.0.40
codegen_flags: <defaults>
</compile_context>

<pallas_src>
import jax
import jax.numpy as jnp
from jax.experimental import pallas as pl
from jax.experimental.pallas import tpu as pltpu


HEAD_WIDTH = 128   # lane-dense head matmul width (MXU-native); only 8 cols are stored.
OUT_CH = 8         # packed narrow output: [hm_logit, wh0, wh1, 0, 0, 0, 0, 0]


# ----------------------------- fused Pallas kernel -----------------------------

def _fused_kernel(col_ref, wc_ref, bc_ref, wh_ref, bh_ref, tgt_ref, whm_ref,
                  out_ref, loss_ref):
    """One grid step = one strip of TM pixel-rows (batch folded into rows)."""
    # ---- backbone: ONE K-dense bf16 matmul (im2col done in the wrapper) ----
    feat = jnp.dot(col_ref[...], wc_ref[...],
                   preferred_element_type=jnp.float32)          # (TM, hidden) f32
    feat = jnp.maximum(feat + bc_ref[...], 0.0)                  # bias + ReLU

    # ---- heads: lane-dense N=128 matmul; only the first 8 columns are real ----
    heads = jnp.dot(feat.astype(jnp.bfloat16), wh_ref[...],
                    preferred_element_type=jnp.float32) + bh_ref[...]
    pn = heads[:, 0:OUT_CH]                     # (TM, 8): [hm | wh0 | wh1 | 0s]
    out_ref[...] = pn.astype(out_ref.dtype)     # narrow bf16 writeback only

    # ---- fused loss on the 8-channel slabs (no 1/2-lane column slices) ----
    g = tgt_ref[...]            # (TM, 8): [hm_gt, wh_gt0, wh_gt1, 0, ...]
    w = whm_ref[...]            # (TM, 8): [0, mask, mask, 0, ...]
    ch = jax.lax.broadcasted_iota(jnp.int32, (1, OUT_CH), 1)
    hm_sel = (ch == 0).astype(jnp.float32)      # focal loss lives on channel 0

    x = pn
    # stable softplus(x); log sigmoid(x) = x - sp, log(1 - sigmoid(x)) = -sp
    sp = jnp.maximum(x, 0.0) + jnp.log(1.0 + jnp.exp(-jnp.abs(x)))
    log_p = x - sp
    log_1mp = -sp
    p = jnp.exp(log_p)                          # sigmoid(x)

    pos_ind = (g == 1.0).astype(jnp.float32) * hm_sel
    neg_ind = hm_sel - pos_ind
    neg_w = (1.0 - g) ** 4
    pos_loss = log_p * (1.0 - p) ** 2 * pos_ind
    neg_loss = log_1mp * (p * p) * neg_w * neg_ind
    l1 = jnp.abs(x - g) * w                     # mask pre-aligned to wh channels

    vals = (jnp.sum(pos_loss), jnp.sum(neg_loss), jnp.sum(pos_ind),
            jnp.sum(l1), jnp.sum(w))
    acc = jnp.zeros((1, OUT_CH), jnp.float32)
    for i, v in enumerate(vals):
        acc = acc + jnp.where(ch == i, v, 0.0)
    loss_ref[...] = acc                          # single vector store per step


def _pick_row_tile(m):
    # Prefer big row tiles (amortize per-step overhead / fill the MXU), but
    # keep >= 2 grid steps so BlockSpec double-buffering has work to pipeline.
    for tm in (1024, 512, 256, 128, 64, 32, 16, 8):
        if m % tm == 0 and m // tm >= 2:
            return tm
    return m


def _pallas_fused_forward(col, wc, bc, wh, bh, tgt8, whm8, *, tm):
    M, KP = col.shape
    hidden = wc.shape[1]
    nt = M // tm

    # vmem limit derived from the actual double-buffered block set (+ headroom).
    block_bytes = [
        tm * KP * 2,                 # im2col slab (bf16)
        KP * hidden * 2,             # conv weight (bf16)
        hidden * 4,                  # conv bias
        hidden * HEAD_WIDTH * 2,     # head weight (bf16)
        HEAD_WIDTH * 4,              # head bias
        tm * OUT_CH * 4,             # targets
        tm * OUT_CH * 4,             # wh mask slab
        tm * OUT_CH * 2,             # packed head output (bf16)
        OUT_CH * 4,                  # loss partials
    ]
    vmem_limit = int(min(max(4 * sum(block_bytes) + (2 << 20), 8 << 20),
                         48 << 20))

    return pl.pallas_call(
        _fused_kernel,
        out_shape=(jax.ShapeDtypeStruct((M, OUT_CH), jnp.bfloat16),
                   jax.ShapeDtypeStruct((nt, 1, OUT_CH), jnp.float32)),
        grid_spec=pltpu.PrefetchScalarGridSpec(
            num_scalar_prefetch=0,
            grid=(nt,),
            in_specs=[
                pl.BlockSpec((tm, KP), lambda i: (i, 0)),
                pl.BlockSpec((KP, hidden), lambda i: (0, 0)),
                pl.BlockSpec((1, hidden), lambda i: (0, 0)),
                pl.BlockSpec((hidden, HEAD_WIDTH), lambda i: (0, 0)),
                pl.BlockSpec((1, HEAD_WIDTH), lambda i: (0, 0)),
                pl.BlockSpec((tm, OUT_CH), lambda i: (i, 0)),
                pl.BlockSpec((tm, OUT_CH), lambda i: (i, 0)),
            ],
            out_specs=[
                pl.BlockSpec((tm, OUT_CH), lambda i: (i, 0)),
                pl.BlockSpec((None, 1, OUT_CH), lambda i: (i, 0, 0)),
            ],
        ),
        compiler_params=pltpu.CompilerParams(
            dimension_semantics=("parallel",),
            vmem_limit_bytes=vmem_limit),
    )(col, wc, bc, wh, bh, tgt8, whm8)


# --------------------------------- JAX glue ---------------------------------

def init_params(key, c_in, hidden):
    k1, k2, k3 = jax.random.split(key, 3)
    return {
        "w_conv": jax.random.normal(k1, (3, 3, c_in, hidden), jnp.float32) * 0.1,
        "b_conv": jnp.zeros((hidden,), jnp.float32),
        "w_hm": jax.random.normal(k2, (hidden, 1), jnp.float32) * 0.1,
        "b_hm": jnp.full((1,), -2.19, jnp.float32),   # CenterNet hm bias init
        "w_wh": jax.random.normal(k3, (hidden, 2), jnp.float32) * 0.1,
        "b_wh": jnp.zeros((2,), jnp.float32),
    }


@jax.jit
def _forward_impl(params, inp, pre_img, pre_hm, hm_gt, dense_wh, dense_wh_mask):
    x = jnp.concatenate([inp, pre_img, pre_hm], axis=1)           # NCHW
    B, C, H, W = x.shape
    hidden = params["w_conv"].shape[-1]
    HW = H * W
    M = B * HW
    K = 9 * C
    KP = 128 * ((K + 127) // 128)                                 # K zero-pad to 128

    # --- im2col in the wrapper: lane-dense (M, KP) bf16 slab, batch folded ---
    x_nhwc = jnp.transpose(x, (0, 2, 3, 1))
    xp = jnp.pad(x_nhwc, ((0, 0), (1, 1), (1, 1), (0, 0)))
    taps = [xp[:, dy:dy + H, dx:dx + W, :]
            for dy in range(3) for dx in range(3)]
    col = jnp.concatenate(taps, axis=-1).reshape(B, HW, K)
    col = jnp.pad(col, ((0, 0), (0, 0), (0, KP - K)))
    col = col.astype(jnp.bfloat16).reshape(M, KP)

    # --- weights: K-dense conv weight; lane-dense packed head weight/bias ---
    wc = params["w_conv"].reshape(K, hidden)
    wc = jnp.pad(wc, ((0, KP - K), (0, 0))).astype(jnp.bfloat16)
    bc = params["b_conv"].reshape(1, hidden).astype(jnp.float32)

    wh = jnp.zeros((hidden, HEAD_WIDTH), jnp.float32)
    wh = wh.at[:, 0:1].set(params["w_hm"]).at[:, 1:3].set(params["w_wh"])
    wh = wh.astype(jnp.bfloat16)
    bh = jnp.zeros((1, HEAD_WIDTH), jnp.float32)
    bh = bh.at[:, 0:1].set(params["b_hm"].reshape(1, 1))
    bh = bh.at[:, 1:3].set(params["b_wh"].reshape(1, 2))

    # --- targets: 8-channel slabs; wh mask pre-aligned to the wh channels ---
    rows = lambda t: jnp.transpose(t, (0, 2, 3, 1)).reshape(B, HW, -1)
    hm_r, wh_r, m_r = rows(hm_gt), rows(dense_wh), rows(dense_wh_mask)
    z5 = jnp.zeros((B, HW, 5), jnp.float32)
    z1 = jnp.zeros((B, HW, 1), jnp.float32)
    tgt8 = jnp.concatenate([hm_r, wh_r, z5], axis=-1).reshape(M, OUT_CH)
    whm8 = jnp.concatenate([z1, m_r, m_r, z5], axis=-1).reshape(M, OUT_CH)

    tm = _pick_row_tile(M)
    out8, loss_part = _pallas_fused_forward(col, wc, bc, wh, bh, tgt8, whm8,
                                            tm=tm)

    # --- reduce per-strip loss partial sums ---
    sums = jnp.sum(loss_part, axis=(0, 1))                        # (8,)
    pos_s, neg_s, num_pos, l1_s, mask_s = (sums[0], sums[1], sums[2],
                                           sums[3], sums[4])
    hm_loss = jnp.where(num_pos > 0,
                        -(pos_s + neg_s) / jnp.maximum(num_pos, 1.0),
                        -neg_s)
    wh_loss = l1_s / (mask_s + 1e-4)              # mask_s is channel-expanded sum
    loss = hm_loss + 0.1 * wh_loss
    loss_stats = {"loss": loss, "hm_loss": hm_loss, "wh_loss": wh_loss}

    # NCHW head tensors only at the module boundary.
    out_nhwc = out8.astype(jnp.float32).reshape(B, H, W, OUT_CH)
    hm_out = jnp.transpose(out_nhwc[..., 0:1], (0, 3, 1, 2))
    wh_out = jnp.transpose(out_nhwc[..., 1:3], (0, 3, 1, 2))
    return {"hm": hm_out, "wh": wh_out}, loss, loss_stats


class ModelWithLoss:
    """JAX/Pallas equivalent of the PyTorch ModelWithLoss wrapper.

    The injected model (synthetic CenterTrack-style 3x3-conv backbone with
    hm/wh heads) and loss (focal + dense masked L1) are fused into a single
    Pallas kernel; forward keeps the (output, loss, loss_stats, choice_list)
    contract of the original module.
    """

    def __init__(self, params):
        self.params = params

    def forward(self, batch, phase):
        pre_img = batch["pre_img"] if "pre_img" in batch else None
        pre_hm = batch["pre_hm"] if "pre_hm" in batch else None
        pre_hm_hp = batch["pre_hm_hp"] if "pre_hm_hp" in batch else None
        del pre_hm_hp  # TODO(synk): pose-heatmap prior unused by this synthetic backbone.
        inp = batch["input"]
        if pre_img is None:
            pre_img = jnp.zeros_like(inp)
        if pre_hm is None:
            pre_hm = jnp.zeros(inp.shape[:1] + (1,) + inp.shape[2:], inp.dtype)
        out, loss, loss_stats = _forward_impl(
            self.params, inp, pre_img, pre_hm,
            batch["hm"], batch["dense_wh"], batch["dense_wh_mask"])
        # TODO(synk): `choice_list` (head-selection bookkeeping in some forks) has no
        # tensor semantics; return an empty list.
        choice_list = []
        return out, loss, loss_stats, choice_list


# ----------------------------------- main -----------------------------------

if __name__ == "__main__":
    key = jax.random.PRNGKey(0)
    B, C, H, W = 2, 4, 16, 16
    hidden = 32
    k_in, k_pre, k_prehm, k_hm, k_wh, k_mask, k_p = jax.random.split(key, 7)

    inp = jax.random.normal(k_in, (B, C, H, W), jnp.float32)
    pre_img = jax.random.normal(k_pre, (B, C, H, W), jnp.float32)
    pre_hm = jax.random.uniform(k_prehm, (B, 1, H, W), jnp.float32)

    # Ground-truth heatmap with exact 1.0 peaks so the focal "pos" branch fires.
    hm_gt = jax.random.uniform(k_hm, (B, 1, H, W), jnp.float32) * 0.9
    hm_gt = hm_gt.at[:, 0, 4, 4].set(1.0).at[:, 0, 10, 7].set(1.0)
    dense_wh = jax.random.uniform(k_wh, (B, 2, H, W), jnp.float32) * 4.0
    dense_wh_mask = (jax.random.uniform(k_mask, (B, 1, H, W)) > 0.7).astype(jnp.float32)

    batch = {
        "input": inp,
        "pre_img": pre_img,
        "pre_hm": pre_hm,
        "hm": hm_gt,
        "dense_wh": dense_wh,
        "dense_wh_mask": dense_wh_mask,
    }

    params = init_params(k_p, C + C + 1, hidden)
    mwl = ModelWithLoss(params)

    out, loss, loss_stats, choice_list = mwl.forward(batch, phase="train")
    jax.block_until_ready((out, loss, loss_stats))
    assert out["hm"].shape == (B, 1, H, W) and out["wh"].shape == (B, 2, H, W)
    assert jnp.isfinite(loss)
    print("KERNEL_OK")
</pallas_src>

<mosaic_0001>
module attributes {stable_mosaic.version = 11 : i64} {
  func.func @_fused_kernel(%arg0: i32, %arg1: memref<256x128xbf16, #tpu.memory_space<vmem>>, %arg2: memref<128x32xbf16, #tpu.memory_space<vmem>>, %arg3: memref<1x32xf32, #tpu.memory_space<vmem>>, %arg4: memref<32x128xbf16, #tpu.memory_space<vmem>>, %arg5: memref<1x128xf32, #tpu.memory_space<vmem>>, %arg6: memref<256x8xf32, #tpu.memory_space<vmem>>, %arg7: memref<256x8xf32, #tpu.memory_space<vmem>>, %arg8: memref<256x8xbf16, #tpu.memory_space<vmem>>, %arg9: memref<1x1x8xf32, #tpu.memory_space<vmem>>) attributes {dimension_semantics = [#tpu.dimension_semantics<parallel>], iteration_bounds = array<i64: 2>, scalar_prefetch = 0 : i64, scratch_operands = 0 : i64, tpu.core_type = #tpu.core_type<tc>, window_params = [{transform_indices = @transform_0, window_bounds = array<i64: 256, 128>}, {pipeline_mode = #tpu.pipeline_mode<synchronous>, transform_indices = @transform_1, window_bounds = array<i64: 128, 32>}, {pipeline_mode = #tpu.pipeline_mode<synchronous>, transform_indices = @transform_2, window_bounds = array<i64: 1, 32>}, {pipeline_mode = #tpu.pipeline_mode<synchronous>, transform_indices = @transform_3, window_bounds = array<i64: 32, 128>}, {pipeline_mode = #tpu.pipeline_mode<synchronous>, transform_indices = @transform_4, window_bounds = array<i64: 1, 128>}, {transform_indices = @transform_5, window_bounds = array<i64: 256, 8>}, {transform_indices = @transform_6, window_bounds = array<i64: 256, 8>}, {transform_indices = @transform_7, window_bounds = array<i64: 256, 8>}, {transform_indices = @transform_8, window_bounds = array<i64: 1, 1, 8>}]} {
    %c0 = arith.constant 0 : index
    %c0_0 = arith.constant 0 : index
    %0 = vector.load %arg1[%c0, %c0_0] : memref<256x128xbf16, #tpu.memory_space<vmem>>, vector<256x128xbf16>
    %c0_1 = arith.constant 0 : index
    %c0_2 = arith.constant 0 : index
    %1 = vector.load %arg2[%c0_1, %c0_2] : memref<128x32xbf16, #tpu.memory_space<vmem>>, vector<128x32xbf16>
    %cst = arith.constant dense<0.000000e+00> : vector<256x32xf32>
    %2 = tpu.matmul %0, %1, %cst {dimension_numbers = #tpu.dot_dimension_numbers<[1], [0], [0], [1], [0, 0, 1, 1], [], []>} : vector<256x128xbf16>, vector<128x32xbf16>, vector<256x32xf32> -> vector<256x32xf32>
    %c0_3 = arith.constant 0 : index
    %c0_4 = arith.constant 0 : index
    %3 = vector.load %arg3[%c0_3, %c0_4] : memref<1x32xf32, #tpu.memory_space<vmem>>, vector<1x32xf32>
    %4 = vector.broadcast %3 : vector<1x32xf32> to vector<256x32xf32>
    %5 = arith.addf %2, %4 : vector<256x32xf32>
    %cst_5 = arith.constant 0.000000e+00 : f32
    %6 = vector.broadcast %cst_5 : f32 to vector<256x32xf32>
    %7 = arith.maximumf %5, %6 : vector<256x32xf32>
    %8 = arith.truncf %7 : vector<256x32xf32> to vector<256x32xbf16>
    %c0_6 = arith.constant 0 : index
    %c0_7 = arith.constant 0 : index
    %9 = vector.load %arg4[%c0_6, %c0_7] : memref<32x128xbf16, #tpu.memory_space<vmem>>, vector<32x128xbf16>
    %cst_8 = arith.constant dense<0.000000e+00> : vector<256x128xf32>
    %10 = tpu.matmul %8, %9, %cst_8 {dimension_numbers = #tpu.dot_dimension_numbers<[1], [0], [0], [1], [0, 0, 1, 1], [], []>} : vector<256x32xbf16>, vector<32x128xbf16>, vector<256x128xf32> -> vector<256x128xf32>
    %c0_9 = arith.constant 0 : index
    %c0_10 = arith.constant 0 : index
    %11 = vector.load %arg5[%c0_9, %c0_10] : memref<1x128xf32, #tpu.memory_space<vmem>>, vector<1x128xf32>
    %12 = vector.broadcast %11 : vector<1x128xf32> to vector<256x128xf32>
    %13 = arith.addf %10, %12 : vector<256x128xf32>
    %14 = vector.extract_strided_slice %13 {offsets = [0, 0], sizes = [256, 8], strides = [1, 1]} : vector<256x128xf32> to vector<256x8xf32>
    %15 = arith.truncf %14 : vector<256x8xf32> to vector<256x8xbf16>
    %c0_11 = arith.constant 0 : index
    %c0_12 = arith.constant 0 : index
    %16 = vector.load %arg8[%c0_11, %c0_12] : memref<256x8xbf16, #tpu.memory_space<vmem>>, vector<256x8xbf16>
    tpu.vector_store %arg8[%c0_11, %c0_12], %15 {strides = array<i32>} : memref<256x8xbf16, #tpu.memory_space<vmem>>, vector<256x8xbf16>,
    %c0_13 = arith.constant 0 : index
    %c0_14 = arith.constant 0 : index
    %17 = vector.load %arg6[%c0_13, %c0_14] : memref<256x8xf32, #tpu.memory_space<vmem>>, vector<256x8xf32>
    %c0_15 = arith.constant 0 : index
    %c0_16 = arith.constant 0 : index
    %18 = vector.load %arg7[%c0_15, %c0_16] : memref<256x8xf32, #tpu.memory_space<vmem>>, vector<256x8xf32>
    %19 = tpu.iota {dimensions = array<i32: 1>} : vector<1x8xi32>
    %c0_i32 = arith.constant 0 : i32
    %20 = vector.broadcast %c0_i32 : i32 to vector<1x8xi32>
    %21 = arith.cmpi eq, %19, %20 : vector<1x8xi32>
    %22 = arith.extui %21 : vector<1x8xi1> to vector<1x8xi32>
    %23 = arith.sitofp %22 : vector<1x8xi32> to vector<1x8xf32>
    %cst_17 = arith.constant 0.000000e+00 : f32
    %24 = vector.broadcast %cst_17 : f32 to vector<256x8xf32>
    %25 = arith.maximumf %14, %24 : vector<256x8xf32>
    %26 = math.absf %14 : vector<256x8xf32>
    %cst_18 = arith.constant 0.000000e+00 : f32
    %27 = vector.broadcast %cst_18 : f32 to vector<256x8xf32>
    %28 = arith.subf %27, %26 : vector<256x8xf32>
    %29 = math.exp %28 : vector<256x8xf32>
    %cst_19 = arith.constant 1.000000e+00 : f32
    %30 = vector.broadcast %cst_19 : f32 to vector<256x8xf32>
    %31 = arith.addf %30, %29 : vector<256x8xf32>
    %32 = math.log %31 : vector<256x8xf32>
    %33 = arith.addf %25, %32 : vector<256x8xf32>
    %34 = arith.subf %14, %33 : vector<256x8xf32>
    %cst_20 = arith.constant 0.000000e+00 : f32
    %35 = vector.broadcast %cst_20 : f32 to vector<256x8xf32>
    %36 = arith.subf %35, %33 : vector<256x8xf32>
    %37 = math.exp %34 : vector<256x8xf32>
    %cst_21 = arith.constant 1.000000e+00 : f32
    %38 = vector.broadcast %cst_21 : f32 to vector<256x8xf32>
    %39 = arith.cmpf oeq, %17, %38 : vector<256x8xf32>
    %40 = arith.extui %39 : vector<256x8xi1> to vector<256x8xi32>
    %41 = arith.sitofp %40 : vector<256x8xi32> to vector<256x8xf32>
    %42 = vector.broadcast %23 : vector<1x8xf32> to vector<256x8xf32>
    %43 = arith.mulf %41, %42 : vector<256x8xf32>
    %44 = vector.broadcast %23 : vector<1x8xf32> to vector<256x8xf32>
    %45 = arith.subf %44, %43 : vector<256x8xf32>
    %cst_22 = arith.constant 1.000000e+00 : f32
    %46 = vector.broadcast %cst_22 : f32 to vector<256x8xf32>
    %47 = arith.subf %46, %17 : vector<256x8xf32>
    %48 = arith.mulf %47, %47 : vector<256x8xf32>
    %49 = arith.mulf %48, %48 : vector<256x8xf32>
    %cst_23 = arith.constant 1.000000e+00 : f32
    %50 = vector.broadcast %cst_23 : f32 to vector<256x8xf32>
    %51 = arith.subf %50, %37 : vector<256x8xf32>
    %52 = arith.mulf %51, %51 : vector<256x8xf32>
    %53 = arith.mulf %34, %52 : vector<256x8xf32>
    %54 = arith.mulf %53, %43 : vector<256x8xf32>
    %55 = arith.mulf %37, %37 : vector<256x8xf32>
    %56 = arith.mulf %36, %55 : vector<256x8xf32>
    %57 = arith.mulf %56, %49 : vector<256x8xf32>
    %58 = arith.mulf %57, %45 : vector<256x8xf32>
    %59 = arith.subf %14, %17 : vector<256x8xf32>
    %60 = math.absf %59 : vector<256x8xf32>
    %61 = arith.mulf %60, %18 : vector<256x8xf32>
    %62 = vector.shape_cast %54 : vector<256x8xf32> to vector<1x256x8xf32>
    %cst_24 = arith.constant dense<0.000000e+00> : vector<1xf32>
    %63 = vector.multi_reduction <add>, %62, %cst_24 [1, 2] : vector<1x256x8xf32> to vector<1xf32>
    %64 = vector.shape_cast %63 : vector<1xf32> to vector<1x1x1xf32>
    %65 = vector.extract %64[0, 0, 0] : f32 from vector<1x1x1xf32>
    %66 = vector.shape_cast %58 : vector<256x8xf32> to vector<1x256x8xf32>
    %cst_25 = arith.constant dense<0.000000e+00> : vector<1xf32>
    %67 = vector.multi_reduction <add>, %66, %cst_25 [1, 2] : vector<1x256x8xf32> to vector<1xf32>
    %68 = vector.shape_cast %67 : vector<1xf32> to vector<1x1x1xf32>
    %69 = vector.extract %68[0, 0, 0] : f32 from vector<1x1x1xf32>
    %70 = vector.shape_cast %43 : vector<256x8xf32> to vector<1x256x8xf32>
    %cst_26 = arith.constant dense<0.000000e+00> : vector<1xf32>
    %71 = vector.multi_reduction <add>, %70, %cst_26 [1, 2] : vector<1x256x8xf32> to vector<1xf32>
    %72 = vector.shape_cast %71 : vector<1xf32> to vector<1x1x1xf32>
    %73 = vector.extract %72[0, 0, 0] : f32 from vector<1x1x1xf32>
    %74 = vector.shape_cast %61 : vector<256x8xf32> to vector<1x256x8xf32>
    %cst_27 = arith.constant dense<0.000000e+00> : vector<1xf32>
    %75 = vector.multi_reduction <add>, %74, %cst_27 [1, 2] : vector<1x256x8xf32> to vector<1xf32>
    %76 = vector.shape_cast %75 : vector<1xf32> to vector<1x1x1xf32>
    %77 = vector.extract %76[0, 0, 0] : f32 from vector<1x1x1xf32>
    %78 = vector.shape_cast %18 : vector<256x8xf32> to vector<1x256x8xf32>
    %cst_28 = arith.constant dense<0.000000e+00> : vector<1xf32>
    %79 = vector.multi_reduction <add>, %78, %cst_28 [1, 2] : vector<1x256x8xf32> to vector<1xf32>
    %80 = vector.shape_cast %79 : vector<1xf32> to vector<1x1x1xf32>
    %81 = vector.extract %80[0, 0, 0] : f32 from vector<1x1x1xf32>
    %cst_29 = arith.constant 0.000000e+00 : f32
    %82 = vector.broadcast %cst_29 : f32 to vector<1x8xf32>
    %c0_i32_30 = arith.constant 0 : i32
    %83 = vector.broadcast %c0_i32_30 : i32 to vector<1x8xi32>
    %84 = arith.cmpi eq, %19, %83 : vector<1x8xi32>
    %cst_31 = arith.constant 0.000000e+00 : f32
    %85 = vector.broadcast %65 : f32 to vector<1x8xf32>
    %86 = vector.broadcast %cst_31 : f32 to vector<1x8xf32>
    %87 = arith.select %84, %85, %86 : vector<1x8xi1>, vector<1x8xf32>
    %88 = arith.addf %82, %87 : vector<1x8xf32>
    %c1_i32 = arith.constant 1 : i32
    %89 = vector.broadcast %c1_i32 : i32 to vector<1x8xi32>
    %90 = arith.cmpi eq, %19, %89 : vector<1x8xi32>
    %cst_32 = arith.constant 0.000000e+00 : f32
    %91 = vector.broadcast %69 : f32 to vector<1x8xf32>
    %92 = vector.broadcast %cst_32 : f32 to vector<1x8xf32>
    %93 = arith.select %90, %91, %92 : vector<1x8xi1>, vector<1x8xf32>
    %94 = arith.addf %88, %93 : vector<1x8xf32>
    %c2_i32 = arith.constant 2 : i32
    %95 = vector.broadcast %c2_i32 : i32 to vector<1x8xi32>
    %96 = arith.cmpi eq, %19, %95 : vector<1x8xi32>
    %cst_33 = arith.constant 0.000000e+00 : f32
    %97 = vector.broadcast %73 : f32 to vector<1x8xf32>
    %98 = vector.broadcast %cst_33 : f32 to vector<1x8xf32>
    %99 = arith.select %96, %97, %98 : vector<1x8xi1>, vector<1x8xf32>
    %100 = arith.addf %94, %99 : vector<1x8xf32>
    %c3_i32 = arith.constant 3 : i32
    %101 = vector.broadcast %c3_i32 : i32 to vector<1x8xi32>
    %102 = arith.cmpi eq, %19, %101 : vector<1x8xi32>
    %cst_34 = arith.constant 0.000000e+00 : f32
    %103 = vector.broadcast %77 : f32 to vector<1x8xf32>
    %104 = vector.broadcast %cst_34 : f32 to vector<1x8xf32>
    %105 = arith.select %102, %103, %104 : vector<1x8xi1>, vector<1x8xf32>
    %106 = arith.addf %100, %105 : vector<1x8xf32>
    %c4_i32 = arith.constant 4 : i32
    %107 = vector.broadcast %c4_i32 : i32 to vector<1x8xi32>
    %108 = arith.cmpi eq, %19, %107 : vector<1x8xi32>
    %cst_35 = arith.constant 0.000000e+00 : f32
    %109 = vector.broadcast %81 : f32 to vector<1x8xf32>
    %110 = vector.broadcast %cst_35 : f32 to vector<1x8xf32>
    %111 = arith.select %108, %109, %110 : vector<1x8xi1>, vector<1x8xf32>
    %112 = arith.addf %106, %111 : vector<1x8xf32>
    %c0_36 = arith.constant 0 : index
    %c0_37 = arith.constant 0 : index
    %c0_38 = arith.constant 0 : index
    %113 = vector.load %arg9[%c0_36, %c0_37, %c0_38] : memref<1x1x8xf32, #tpu.memory_space<vmem>>, vector<1x1x8xf32>
    %114 = vector.shape_cast %113 : vector<1x1x8xf32> to vector<1x8xf32>
    %115 = vector.shape_cast %112 : vector<1x8xf32> to vector<1x1x8xf32>
    tpu.vector_store %arg9[%c0_36, %c0_37, %c0_38], %115 {strides = array<i32>} : memref<1x1x8xf32, #tpu.memory_space<vmem>>, vector<1x1x8xf32>,
    return
  }
  func.func @transform_0(%arg0: i32) -> (i32, i32) {
    %c0_i32 = arith.constant 0 : i32
    %c0_i32_0 = arith.constant 0 : i32
    return %arg0, %c0_i32 : i32, i32
  }
  func.func @transform_1(%arg0: i32) -> (i32, i32) {
    %c0_i32 = arith.constant 0 : i32
    %c0_i32_0 = arith.constant 0 : i32
    %c0_i32_1 = arith.constant 0 : i32
    return %c0_i32, %c0_i32_0 : i32, i32
  }
  func.func @transform_2(%arg0: i32) -> (i32, i32) {
    %c0_i32 = arith.constant 0 : i32
    %c0_i32_0 = arith.constant 0 : i32
    %c0_i32_1 = arith.constant 0 : i32
    return %c0_i32, %c0_i32_0 : i32, i32
  }
  func.func @transform_3(%arg0: i32) -> (i32, i32) {
    %c0_i32 = arith.constant 0 : i32
    %c0_i32_0 = arith.constant 0 : i32
    %c0_i32_1 = arith.constant 0 : i32
    return %c0_i32, %c0_i32_0 : i32, i32
  }
  func.func @transform_4(%arg0: i32) -> (i32, i32) {
    %c0_i32 = arith.constant 0 : i32
    %c0_i32_0 = arith.constant 0 : i32
    %c0_i32_1 = arith.constant 0 : i32
    return %c0_i32, %c0_i32_0 : i32, i32
  }
  func.func @transform_5(%arg0: i32) -> (i32, i32) {
    %c0_i32 = arith.constant 0 : i32
    %c0_i32_0 = arith.constant 0 : i32
    return %arg0, %c0_i32 : i32, i32
  }
  func.func @transform_6(%arg0: i32) -> (i32, i32) {
    %c0_i32 = arith.constant 0 : i32
    %c0_i32_0 = arith.constant 0 : i32
    return %arg0, %c0_i32 : i32, i32
  }
  func.func @transform_7(%arg0: i32) -> (i32, i32) {
    %c0_i32 = arith.constant 0 : i32
    %c0_i32_0 = arith.constant 0 : i32
    return %arg0, %c0_i32 : i32, i32
  }
  func.func @transform_8(%arg0: i32) -> (i32, i32, i32) {
    %c0_i32 = arith.constant 0 : i32
    %c0_i32_0 = arith.constant 0 : i32
    %c0_i32_1 = arith.constant 0 : i32
    return %arg0, %c0_i32, %c0_i32_0 : i32, i32, i32
  }
}

</mosaic_0001>

<bundles_post_ra>
// kernel: _forward_impl.1
= control target key start
LH: loop header
LB: loop body
LE: loop exit
PB: predicated region body
PF: predicated region fallthrough
CT: control target
= control target key end

     0   :  { %s3326_s27 = smov 0   ;;  %s5335_s0 = inlined_call_operand.vmem [shape: bf16[512,128], index: 0, kind: input, shape index: {}]   ;;  %s5336_s1 = inlined_call_operand.vmem [shape: bf16[128,32], index: 1, kind: input, shape index: {}]   ;;  %s5337_s2 = inlined_call_operand.vmem [shape: f32[1,32], index: 2, kind: input, shape index: {}]   ;;  %s5338_s3 = inlined_call_operand.vmem [shape: bf16[32,128], index: 3, kind: input, shape index: {}]   ;;  %s5339_s4 = inlined_call_operand.vmem [shape: f32[1,128], index: 4, kind: input, shape index: {}]   ;;  %s5340_s5 = inlined_call_operand.vmem [shape: f32[512,8], index: 5, kind: input, shape index: {}]   ;;  %s5341_s6 = inlined_call_operand.vmem [shape: f32[512,8], index: 6, kind: input, shape index: {}]   ;;  %s5342_s7 = inlined_call_operand.vmem [shape: bf16[512,8], index: 7, kind: output, shape index: {0}]   ;;  %s5343_s8 = inlined_call_operand.vmem [shape: f32[2,1,8], index: 8, kind: output, shape index: {1}]  }
   0x1 LB: > { %s3332_s28 = sadd.s32 4294967295, %s3278_s27   ;;  %p2749_p0 = scmp.ge.s32.totalorder %s3278_s27, 1  ;;  %s3278_s27 = sphi %s3326_s27, %s19_s27  }
   0x2   : > { %p288_p1 = scmp.lt.s32.totalorder %s3278_s27, 3 }
   0x4   : > { %p289_p2 = pnand %p2749_p0, %p288_p1 }
   0x6   : > { %292 = sbr.rel (%p289_p2) target bundleno = 1016 (0x3f8), region = 48 }
   0xd   : > { %v3046_v0 = vld [vmem:[%s5336_s1] sm:$0xff]   ;;  %s2750_s9 = sshll.u32 %s3332_s28, 5  ;;  %v3047_v1 = vld [vmem:[%s5336_s1 + $0x8] sm:$0xff]   ;;  %v3048_v2 = vld [vmem:[%s5336_s1 + $0x10] sm:$0xff]   ;;  %vm794_vm0 = vcmask 261120   ;;  %vm2258_vm5 = vcmask 64512  }
   0xe   : > { %p336_p3 = scmp.lt.s32.totalorder %s2750_s9, 63  ;;  %2943 = vmatprep.subr.bf16.mxu0 %v3046_v0  ;;  %v3049_v3 = vld [vmem:[%s5336_s1 + $0x18] sm:$0xff]   ;;  %v3050_v5 = vld [vmem:[%s5336_s1 + $0x20] sm:$0xff]   ;;  %v3051_v6 = vld [vmem:[%s5336_s1 + $0x28] sm:$0xff]   ;;  %p359_p4 = scmp.lt.s32.totalorder %s3332_s28, 1 }
   0xf   : > { %2944 = vmatpush3.bf16.msra.mxu0 %v3046_v0  ;;  %v3052_v7 = vld [vmem:[%s5336_s1 + $0x30] sm:$0xff]   ;;  %v3053_v8 = vld [vmem:[%s5336_s1 + $0x38] sm:$0xff]   ;;  %v3070_v24 = vld [vmem:[%s5338_s3] sm:$0xff]  }
  0x10   : > { %s5545_s9 = smov (!%p336_p3, %s2750_s9), 63  ;;  %2945 = vmatprep.subr.bf16.mxu0 %v3047_v1  ;;  %2991 = vmatprep.subr.bf16.mxu1 %v3070_v24  ;;  %v3071_v25 = vld [vmem:[%s5338_s3 + $0x8] sm:$0xff]   ;;  %v3396_v26 = vld [vmem:[%s5337_s2] ss:$0 sm:$0xff]  ;;  %s5547_s28 = smov (!%p359_p4, %s3332_s28), 1 }
  0x11   : > { %s2751_s14 = sshll.u32 %s5545_s9, 2  ;;  %2992 = vmatpush3.bf16.msra.mxu1 %v3070_v24  ;;  %s2753_s16 = sshll.u32 %s5545_s9, 3 }
  0x12   : > { %s3354_s17 = scalar_lea.vmem %s5335_s0, %s2751_s14  ;;  %2993 = vmatprep.subr.bf16.mxu1 %v3071_v25  ;;  %s3452_s19 = scalar_lea.vmem %s5340_s5, %s2753_s16 }
  0x13   : > { %2946 = vmatpush3.bf16.msra.mxu0 %v3047_v1  ;;  %v3054_v4 = vld [vmem:[%s3354_s17] sm:$0xff]   ;;  %v3055_v9 = vld [vmem:[%s3354_s17 + $0x8] sm:$0xff]   ;;  %v3056_v10 = vld [vmem:[%s3354_s17 + $0x10] sm:$0xff]   ;;  %s3553_s22 = scalar_lea.vmem %s5341_s6, %s2753_s16  ;;  %s3762_s29 = scalar_lea.vmem %s5342_s7, %s2751_s14 }
  0x14   : > { %2947 = vmatprep.subr.bf16.mxu0 %v3048_v2  ;;  %2959 = vmatprep.mubr.bf16.mxu0 %v3054_v4  ;;  %v3057_v11 = vld [vmem:[%s3354_s17 + $0x18] sm:$0xff]   ;;  %v3058_v12 = vld [vmem:[%s3354_s17 + $0x20] sm:$0xff]   ;;  %v3059_v13 = vld [vmem:[%s3354_s17 + $0x28] sm:$0xff]  }
  0x15   : > { %v3060_v14 = vld [vmem:[%s3354_s17 + $0x30] sm:$0xff]   ;;  %v3061_v15 = vld [vmem:[%s3354_s17 + $0x38] sm:$0xff]   ;;  %v3062_v16 = vld [vmem:[%s3354_s17 + $0x40] sm:$0xff]   ;;  %2994 = vmatpush3.bf16.msra.mxu1 %v3071_v25 }
  0x16   : > { %v3063_v17 = vld [vmem:[%s3354_s17 + $0x48] sm:$0xff]   ;;  %v3064_v18 = vld [vmem:[%s3354_s17 + $0x50] sm:$0xff]   ;;  %v3065_v19 = vld [vmem:[%s3354_s17 + $0x58] sm:$0xff]  }
  0x17   : > { %2948 = vmatpush3.bf16.msra.mxu0 %v3048_v2  ;;  %v3066_v20 = vld [vmem:[%s3354_s17 + $0x60] sm:$0xff]   ;;  %v3067_v21 = vld [vmem:[%s3354_s17 + $0x68] sm:$0xff]   ;;  %v3068_v22 = vld [vmem:[%s3354_s17 + $0x70] sm:$0xff]  }
  0x18   : > { %2949 = vmatprep.subr.bf16.mxu0 %v3049_v3  ;;  %v3069_v23 = vld [vmem:[%s3354_s17 + $0x78] sm:$0xff]  }
  0x1b   : > { %2950 = vmatpush3.bf16.msra.mxu0 %v3049_v3 }
  0x1c   : > { %2951 = vmatprep.subr.bf16.mxu0 %v3050_v5 }
  0x1f   : > { %2952 = vmatpush3.bf16.msra.mxu0 %v3050_v5 }
  0x20   : > { %2953 = vmatprep.subr.bf16.mxu0 %v3051_v6 }
  0x23   : > { %2954 = vmatpush3.bf16.msra.mxu0 %v3051_v6 }
  0x24   : > { %2955 = vmatprep.subr.bf16.mxu0 %v3052_v7 }
  0x27   : > { %2956 = vmatpush3.bf16.msra.mxu0 %v3052_v7 }
  0x28   : > { %2957 = vmatprep.subr.bf16.mxu0 %v3053_v8 }
  0x2b   : > { %2958 = vmatpush3.bf16.msra.mxu0 %v3053_v8 }
  0x2e   : > { %2960 = vmatmul.mubr.bf16.vlgmr.msra.gmra.mrb[0].mxu0 %v3055_v9 }
  0x2f   : > { %2963 = vmatprep.mubr.bf16.mxu0 %v3056_v10 }
  0x36   : > { %2964 = vmatmul.mubr.bf16.gmra.mrb[4].mxu0 %v3057_v11 }
  0x37   : > { %2967 = vmatprep.mubr.bf16.mxu0 %v3058_v12 }
  0x3e   : > { %2968 = vmatmul.mubr.bf16.gmra.mrb[8].mxu0 %v3059_v13 }
  0x3f   : > { %2971 = vmatprep.mubr.bf16.mxu0 %v3060_v14 }
  0x46   : > { %2972 = vmatmul.mubr.bf16.gmra.mrb[12].mxu0 %v3061_v15 }
  0x47   : > { %2975 = vmatprep.mubr.bf16.mxu0 %v3062_v16 }
  0x4e   : > { %2976 = vmatmul.mubr.bf16.gmra.mrb[16].mxu0 %v3063_v17 }
  0x4f   : > { %2979 = vmatprep.mubr.bf16.mxu0 %v3064_v18 }
  0x56   : > { %2980 = vmatmul.mubr.bf16.gmra.mrb[20].mxu0 %v3065_v19 }
  0x57   : > { %2983 = vmatprep.mubr.bf16.mxu0 %v3066_v20 }
  0x5e   : > { %2984 = vmatmul.mubr.bf16.gmra.mrb[24].mxu0 %v3067_v21 }
  0x5f   : > { %2987 = vmatprep.mubr.bf16.mxu0 %v3068_v22 }
  0x66   : > { %2988 = vmatmul.mubr.bf16.gmra.mrb[28].mxu0 %v3069_v23 }
 0x101   : > { %v2961_v27 = vpop.f32.mrb[0].mxu0 }
 0x102   : > { %v605_v28 = vadd.f32 %v2961_v27, %v3396_v26  ;;  %v596_v29 = vpop.f32.mrb[1].mxu0 }
 0x103   : > { %v597_v30 = vadd.f32 %v3396_v26, %v596_v29  ;;  %v2962_v31 = vpop.f32.mrb[2].mxu0 }
 0x104   : > { %v608_v32 = vadd.f32 %v2962_v31, %v3396_v26  ;;  %v599_v33 = vpop.f32.mrb[3].mxu0  ;;  %v725_v35 = vmax.f32 %v605_v28, 0.0 }
 0x105   : > { %v600_v34 = vadd.f32 %v3396_v26, %v599_v33  ;;  %v723_v37 = vmax.f32 %v597_v30, 0.0 }
 0x106   : > { %v726_v36 = vmax.f32 %v608_v32, 0.0 }
 0x107   : > { %v724_v38 = vmax.f32 %v600_v34, 0.0 }
 0x108   : > { %v756_v39 = vpack.c.bf16 %v726_v36, %v725_v35 }
 0x109   : > { %v2965_v40 = vpop.f32.mrb[4].mxu0  ;;  %v755_v41 = vpack.c.bf16 %v724_v38, %v723_v37 }
 0x10a   : > { %v621_v42 = vadd.f32 %v2965_v40, %v3396_v26  ;;  %v612_v43 = vpop.f32.mrb[5].mxu0 }
 0x10b   : > { %v613_v44 = vadd.f32 %v3396_v26, %v612_v43  ;;  %v2966_v45 = vpop.f32.mrb[6].mxu0  ;;  %2995 = vmatprep.mubr.msk.bf16.mxu1 %vm794_vm0, %v755_v41 }
 0x10c   : > { %v624_v46 = vadd.f32 %v2966_v45, %v3396_v26  ;;  %v615_v47 = vpop.f32.mrb[7].mxu0  ;;  %2996 = vmatmul.mubr.msk.bf16.vlgmr.msra.gmra.mrb[0].mxu1 %vm794_vm0, %v756_v39  ;;  %v729_v49 = vmax.f32 %v621_v42, 0.0 }
 0x10d   : > { %v616_v48 = vadd.f32 %v3396_v26, %v615_v47  ;;  %v727_v51 = vmax.f32 %v613_v44, 0.0 }
 0x10e   : > { %v730_v50 = vmax.f32 %v624_v46, 0.0 }
 0x10f   : > { %v728_v52 = vmax.f32 %v616_v48, 0.0 }
 0x110   : > { %v758_v53 = vpack.c.bf16 %v730_v50, %v729_v49 }
 0x111   : > { %v757_v54 = vpack.c.bf16 %v728_v52, %v727_v51  ;;  %v2969_v55 = vpop.f32.mrb[8].mxu0 }
 0x112   : > { %v637_v56 = vadd.f32 %v2969_v55, %v3396_v26  ;;  %v628_v57 = vpop.f32.mrb[9].mxu0 }
 0x113   : > { %v629_v58 = vadd.f32 %v3396_v26, %v628_v57  ;;  %v2970_v59 = vpop.f32.mrb[10].mxu0  ;;  %2999 = vmatprep.mubr.msk.bf16.mxu1 %vm794_vm0, %v757_v54 }
 0x114   : > { %v640_v60 = vadd.f32 %v2970_v59, %v3396_v26  ;;  %v631_v61 = vpop.f32.mrb[11].mxu0  ;;  %3000 = vmatmul.mubr.msk.bf16.gmra.mrb[4].mxu1 %vm794_vm0, %v758_v53  ;;  %v733_v63 = vmax.f32 %v637_v56, 0.0 }
 0x115   : > { %v632_v62 = vadd.f32 %v3396_v26, %v631_v61  ;;  %v731_v1 = vmax.f32 %v629_v58, 0.0 }
 0x116   : > { %v734_v0 = vmax.f32 %v640_v60, 0.0 }
 0x117   : > { %v732_v2 = vmax.f32 %v632_v62, 0.0 }
 0x118   : > { %v760_v3 = vpack.c.bf16 %v734_v0, %v733_v63 }
 0x119   : > { %v759_v4 = vpack.c.bf16 %v732_v2, %v731_v1  ;;  %v2973_v5 = vpop.f32.mrb[12].mxu0 }
 0x11a   : > { %v653_v6 = vadd.f32 %v2973_v5, %v3396_v26  ;;  %v644_v7 = vpop.f32.mrb[13].mxu0 }
 0x11b   : > { %v645_v8 = vadd.f32 %v3396_v26, %v644_v7  ;;  %v2974_v9 = vpop.f32.mrb[14].mxu0  ;;  %3003 = vmatprep.mubr.msk.bf16.mxu1 %vm794_vm0, %v759_v4 }
 0x11c   : > { %v656_v10 = vadd.f32 %v2974_v9, %v3396_v26  ;;  %v647_v11 = vpop.f32.mrb[15].mxu0  ;;  %3004 = vmatmul.mubr.msk.bf16.gmra.mrb[8].mxu1 %vm794_vm0, %v760_v3  ;;  %v737_v13 = vmax.f32 %v653_v6, 0.0 }
 0x11d   : > { %v648_v12 = vadd.f32 %v3396_v26, %v647_v11  ;;  %v735_v15 = vmax.f32 %v645_v8, 0.0 }
 0x11e   : > { %v738_v14 = vmax.f32 %v656_v10, 0.0 }
 0x11f   : > { %v736_v16 = vmax.f32 %v648_v12, 0.0  ;;  %v1229_v12 = vlaneseq }
 0x120   : > { %v762_v17 = vpack.c.bf16 %v738_v14, %v737_v13  ;;  %v3457_v13 = vld [vmem:[%s3452_s19] sm:$0xff]  ;;  %v3460_v14 = vld [vmem:[%s3452_s19 + $0x8] sm:$0xff] }
 0x121   : > { %v761_v18 = vpack.c.bf16 %v736_v16, %v735_v15  ;;  %v2977_v19 = vpop.f32.mrb[16].mxu0  ;;  %vm1650_vm2 = vcmp.eq.f32.partialorder %v3457_v13, 1.0  ;;  %vm1651_vm3 = vcmp.eq.f32.partialorder %v3460_v14, 1.0  ;;  %v3466_v15 = vld [vmem:[%s3452_s19 + $0x10] sm:$0xff]  ;;  %v5348_v16 = vmov 0.0  }
 0x122   : > { %v669_v20 = vadd.f32 %v2977_v19, %v3396_v26  ;;  %v660_v21 = vpop.f32.mrb[17].mxu0  ;;  %v2836_v19 = vsel %vm1651_vm3, 1.0, %v5348_v16  ;;  %vm1652_vm4 = vcmp.eq.f32.partialorder %v3466_v15, 1.0 }
 0x123   : > { %v661_v22 = vadd.f32 %v3396_v26, %v660_v21  ;;  %v2978_v23 = vpop.f32.mrb[18].mxu0  ;;  %3007 = vmatprep.mubr.msk.bf16.mxu1 %vm794_vm0, %v761_v18  ;;  %v2835_v18 = vsel %vm1650_vm2, 1.0, %v5348_v16 }
 0x124   : > { %v672_v24 = vadd.f32 %v2978_v23, %v3396_v26  ;;  %v663_v25 = vpop.f32.mrb[19].mxu0  ;;  %3008 = vmatmul.mubr.msk.bf16.gmra.mrb[12].mxu1 %vm794_vm0, %v762_v17  ;;  %v741_v28 = vmax.f32 %v669_v20, 0.0  ;;  %v3484_v23 = vld [vmem:[%s3452_s19 + $0x18] sm:$0xff] }
 0x125   : > { %v664_v27 = vadd.f32 %v3396_v26, %v663_v25  ;;  %v739_v30 = vmax.f32 %v661_v22, 0.0  ;;  %v2837_v22 = vsel %vm1652_vm4, 1.0, %v5348_v16  ;;  %vm1653_vm6 = vcmp.eq.f32.partialorder %v3484_v23, 1.0 }
 0x126   : > { %v742_v29 = vmax.f32 %v672_v24, 0.0  ;;  %v3488_v24 = vld [vmem:[%s3452_s19 + $0x20] sm:$0xff] }
 0x127   : > { %v740_v31 = vmax.f32 %v664_v27, 0.0  ;;  %vm1654_vm7 = vcmp.eq.f32.partialorder %v3488_v24, 1.0 }
 0x128   : > { %v764_v32 = vpack.c.bf16 %v742_v29, %v741_v28  ;;  %v2838_v29 = vsel %vm1653_vm6, 1.0, %v5348_v16  ;;  %vm1132_vm6 = vcmask 60416  }
 0x129   : > { %v763_v33 = vpack.c.bf16 %v740_v31, %v739_v30  ;;  %v2981_v34 = vpop.f32.mrb[20].mxu0  ;;  %v3500_v31 = vld [vmem:[%s3452_s19 + $0x28] sm:$0xff] }
 0x12a   : > { %v685_v35 = vadd.f32 %v2981_v34, %v3396_v26  ;;  %v676_v36 = vpop.f32.mrb[21].mxu0  ;;  %v2839_v34 = vsel %vm1654_vm7, 1.0, %v5348_v16  ;;  %vm1655_vm8 = vcmp.eq.f32.partialorder %v3500_v31, 1.0 }
 0x12b   : > { %v677_v37 = vadd.f32 %v3396_v26, %v676_v36  ;;  %v2982_v38 = vpop.f32.mrb[22].mxu0  ;;  %3011 = vmatprep.mubr.msk.bf16.mxu1 %vm794_vm0, %v763_v33 }
 0x12c   : > { %v688_v39 = vadd.f32 %v2982_v38, %v3396_v26  ;;  %v679_v40 = vpop.f32.mrb[23].mxu0  ;;  %3012 = vmatmul.mubr.msk.bf16.gmra.mrb[16].mxu1 %vm794_vm0, %v764_v32  ;;  %v745_v42 = vmax.f32 %v685_v35, 0.0  ;;  %v3515_v38 = vld [vmem:[%s3452_s19 + $0x30] sm:$0xff] }
 0x12d   : > { %v680_v41 = vadd.f32 %v3396_v26, %v679_v40  ;;  %v743_v44 = vmax.f32 %v677_v37, 0.0  ;;  %vm1656_vm9 = vcmp.eq.f32.partialorder %v3515_v38, 1.0 }
 0x12e   : > { %v746_v43 = vmax.f32 %v688_v39, 0.0  ;;  %v2840_v39 = vsel %vm1655_vm8, 1.0, %v5348_v16 }
 0x12f   : > { %v744_v45 = vmax.f32 %v680_v41, 0.0 }
 0x130   : > { %v766_v46 = vpack.c.bf16 %v746_v43, %v745_v42  ;;  %v2841_v43 = vsel %vm1656_vm9, 1.0, %v5348_v16 }
 0x131   : > { %v765_v47 = vpack.c.bf16 %v744_v45, %v743_v44  ;;  %v2985_v48 = vpop.f32.mrb[24].mxu0  ;;  %v3526_v44 = vld [vmem:[%s3452_s19 + $0x38] sm:$0xff] }
 0x132   : > { %v701_v49 = vadd.f32 %v2985_v48, %v3396_v26  ;;  %v692_v50 = vpop.f32.mrb[25].mxu0  ;;  %vm1657_vm10 = vcmp.eq.f32.partialorder %v3526_v44, 1.0 }
 0x133   : > { %v693_v51 = vadd.f32 %v3396_v26, %v692_v50  ;;  %v2986_v52 = vpop.f32.mrb[26].mxu0  ;;  %3015 = vmatprep.mubr.msk.bf16.mxu1 %vm794_vm0, %v765_v47 }
 0x134   : > { %v704_v53 = vadd.f32 %v2986_v52, %v3396_v26  ;;  %v695_v54 = vpop.f32.mrb[27].mxu0  ;;  %3016 = vmatmul.mubr.msk.bf16.gmra.mrb[20].mxu1 %vm794_vm0, %v766_v46  ;;  %v749_v56 = vmax.f32 %v701_v49, 0.0  ;;  %v3530_v46 = vld [vmem:[%s3452_s19 + $0x40] sm:$0xff]  ;;  %v2842_v49 = vsel %vm1657_vm10, 1.0, %v5348_v16 }
 0x135   : > { %v696_v55 = vadd.f32 %v3396_v26, %v695_v54  ;;  %v747_v58 = vmax.f32 %v693_v51, 0.0  ;;  %vm1658_vm11 = vcmp.eq.f32.partialorder %v3530_v46, 1.0  ;;  %v3540_v51 = vld [vmem:[%s3452_s19 + $0x48] sm:$0xff] }
 0x136   : > { %v750_v57 = vmax.f32 %v704_v53, 0.0  ;;  %v2843_v54 = vsel %vm1658_vm11, 1.0, %v5348_v16  ;;  %vm1659_vm12 = vcmp.eq.f32.partialorder %v3540_v51, 1.0 }
 0x137   : > { %v748_v59 = vmax.f32 %v696_v55, 0.0 }
 0x138   : > { %v768_v60 = vpack.c.bf16 %v750_v57, %v749_v56 }
 0x139   : > { %v767_v61 = vpack.c.bf16 %v748_v59, %v747_v58  ;;  %v2989_v62 = vpop.f32.mrb[28].mxu0  ;;  %v3562_v58 = vld [vmem:[%s3553_s22] sm:$0xff]  ;;  %v3565_v59 = vld [vmem:[%s3553_s22 + $0x8] sm:$0xff] }
 0x13a   : > { %v717_v63 = vadd.f32 %v2989_v62, %v3396_v26  ;;  %v708_v0 = vpop.f32.mrb[29].mxu0  ;;  %v2547_v62 = vsel %vm2258_vm5, %v3562_v58, 0.0 }
 0x13b   : > { %v709_v1 = vadd.f32 %v3396_v26, %v708_v0  ;;  %v2990_v2 = vpop.f32.mrb[30].mxu0  ;;  %3019 = vmatprep.mubr.msk.bf16.mxu1 %vm794_vm0, %v767_v61  ;;  %v2844_v61 = vsel %vm1659_vm12, 1.0, %v5348_v16 }
 0x13c   : > { %v720_v3 = vadd.f32 %v2990_v2, %v3396_v26  ;;  %v711_v4 = vpop.f32.mrb[31].mxu0  ;;  %3020 = vmatmul.mubr.msk.bf16.gmra.mrb[24].mxu1 %vm794_vm0, %v768_v60  ;;  %v753_v6 = vmax.f32 %v717_v63, 0.0  ;;  %v3568_v60 = vld [vmem:[%s3452_s19 + $0x50] sm:$0xff]  ;;  %v2548_v63 = vsel %vm2258_vm5, %v3565_v59, 0.0 }
 0x13d   : > { %v712_v5 = vadd.f32 %v3396_v26, %v711_v4  ;;  %v751_v8 = vmax.f32 %v709_v1, 0.0  ;;  %v3454_v26 = vand.u32 127, %v1229_v12  ;;  %vm1660_vm13 = vcmp.eq.f32.partialorder %v3568_v60, 1.0  ;;  %v3598_v12 = vld [vmem:[%s3553_s22 + $0x18] sm:$0xff] }
 0x13e   : > { %v754_v7 = vmax.f32 %v720_v3, 0.0  ;;  %v3582_v3 = vld [vmem:[%s3553_s22 + $0x10] sm:$0xff]  ;;  %v2549_v4 = vadd.f32 %v2548_v63, %v2547_v62  ;;  %v3628_v63 = vld [vmem:[%s3553_s22 + $0x28] sm:$0xff] }
 0x13f   : > { %v752_v9 = vmax.f32 %v712_v5, 0.0  ;;  %5387 = vst [vmem:[#allocation2_spill] sm:$0xff] %v3454_v26  ;;  %vm1231_vm1 = vcmp.eq.s32.totalorder %v3454_v26, 0  ;;  %v2845_v5 = vsel %vm1660_vm13, 1.0, %v5348_v16 }
 0x140   : > { %v770_v10 = vpack.c.bf16 %v754_v7, %v753_v6  ;;  %v3471_v17 = vsel %vm1231_vm1, 1.0, %v5348_v16  ;;  %v3586_v6 = vld [vmem:[%s3452_s19 + $0x58] sm:$0xff]  ;;  %v2550_v7 = vsel %vm2258_vm5, %v3582_v3, 0.0 }
 0x141   : > { %v769_v11 = vpack.c.bf16 %v752_v9, %v751_v8  ;;  %v3477_v20 = vmul.f32 %v2835_v18, %v3471_v17  ;;  %v3480_v21 = vmul.f32 %v2836_v19, %v3471_v17  ;;  %v3491_v25 = vmul.f32 %v2837_v22, %v3471_v17  ;;  %v1177_v9 = vld [vmem:[%s3452_s19 + $0x60] sm:$0xff] }
 0x142   : > { %v3505_v33 = vmul.f32 %v2838_v29, %v3471_v17  ;;  %v3512_v37 = vmul.f32 %v2839_v34, %v3471_v17  ;;  %v3522_v42 = vmul.f32 %v2840_v39, %v3471_v17  ;;  %v3533_v47 = vmul.f32 %v2841_v43, %v3471_v17  ;;  %v3614_v39 = vld [vmem:[%s3553_s22 + $0x20] sm:$0xff] }
 0x143   : > { %3023 = vmatprep.mubr.msk.bf16.mxu1 %vm794_vm0, %v769_v11  ;;  %v2403_v27 = vsel %vm2258_vm5, %v3477_v20, 0.0  ;;  %v2404_v28 = vsel %vm2258_vm5, %v3480_v21, 0.0  ;;  %v2406_v32 = vsel %vm2258_vm5, %v3491_v25, 0.0  ;;  %v3545_v53 = vmul.f32 %v2842_v49, %v3471_v17 }
 0x144   : > { %3024 = vmatmul.mubr.msk.bf16.gmra.mrb[28].mxu1 %vm794_vm0, %v770_v10  ;;  %v2405_v30 = vadd.f32 %v2404_v28, %v2403_v27  ;;  %v2408_v36 = vsel %vm2258_vm5, %v3505_v33, 0.0  ;;  %v2410_v41 = vsel %vm2258_vm5, %v3512_v37, 0.0  ;;  %5388 = vst [vmem:[#allocation3_spill] sm:$0xff] %v3522_v42  ;;  %v2412_v48 = vsel %vm2258_vm5, %v3522_v42, 0.0 }
 0x145   : > { %v2414_v52 = vsel %vm2258_vm5, %v3533_v47, 0.0  ;;  %5389 = vst [vmem:[#allocation4_spill] sm:$0xff] %v3545_v53  ;;  %v2416_v56 = vsel %vm2258_vm5, %v3545_v53, 0.0  ;;  %v3559_v57 = vmul.f32 %v2843_v54, %v3471_v17  ;;  %v3579_v2 = vmul.f32 %v2844_v61, %v3471_v17 }
 0x146   : > { %v2407_v35 = vadd.f32 %v2406_v32, %v2405_v30  ;;  %vm1661_vm14 = vcmp.eq.f32.partialorder %v3586_v6, 1.0  ;;  %v3593_v10 = vmul.f32 %v2845_v5, %v3471_v17  ;;  %v2551_v18 = vadd.f32 %v2550_v7, %v2549_v4  ;;  %v1178_v30 = vld [vmem:[%s3452_s19 + $0x68] sm:$0xff] }
 0x147   : > { %5390 = vst [vmem:[#allocation5_spill] sm:$0xff] %v3559_v57  ;;  %v2418_v1 = vsel %vm2258_vm5, %v3559_v57, 0.0  ;;  %5391 = vst [vmem:[#allocation6_spill] sm:$0xff] %v3579_v2  ;;  %v2420_v11 = vsel %vm2258_vm5, %v3579_v2, 0.0  ;;  %v2846_v19 = vsel %vm1661_vm14, 1.0, %v5348_v16  ;;  %v1812_v22 = vsub.f32 1.0, %v3466_v15 }
 0x148   : > { %v2409_v40 = vadd.f32 %v2408_v36, %v2407_v35  ;;  %5392 = vst [vmem:[#allocation7_spill] sm:$0xff] %v3593_v10  ;;  %v2552_v27 = vsel %vm2258_vm5, %v3598_v12, 0.0  ;;  %vm1662_vm15 = vcmp.eq.f32.partialorder %v1177_v9, 1.0  ;;  %v1810_v28 = vsub.f32 1.0, %v3457_v13 }
 0x149   : > { %v1813_v32 = vsub.f32 1.0, %v3484_v23  ;;  %v2422_v34 = vsel %vm2258_vm5, %v3593_v10, 0.0  ;;  %v3610_v35 = vmul.f32 %v2846_v19, %v3471_v17  ;;  %v1811_v36 = vsub.f32 1.0, %v3460_v14 }
 0x14a   : > { %v2411_v45 = vadd.f32 %v2410_v41, %v2409_v40  ;;  %v2553_v40 = vadd.f32 %v2552_v27, %v2551_v18  ;;  %v2847_v41 = vsel %vm1662_vm15, 1.0, %v5348_v16  ;;  %v1844_v43 = vmul.f32 %v1812_v22, %v1812_v22 }
 0x14b   : > { %5393 = vst [vmem:[#allocation8_spill] sm:$0xff] %v3610_v35  ;;  %vm1663_vm0 = vcmp.eq.f32.partialorder %v1178_v30, 1.0  ;;  %v1816_v49 = vsub.f32 1.0, %v3515_v38  ;;  %v2424_v54 = vsel %vm2258_vm5, %v3610_v35, 0.0  ;;  %v1843_v61 = vmul.f32 %v1811_v36, %v1811_v36 }
 0x14c   : > { %v2413_v50 = vadd.f32 %v2412_v48, %v2411_v45  ;;  %v2554_v45 = vsel %vm2258_vm5, %v3614_v39, 0.0  ;;  %v1842_v48 = vmul.f32 %v1810_v28, %v1810_v28  ;;  %v3634_v4 = vmul.f32 %v1844_v43, %v1844_v43 }
 0x14d   : > { %v2555_v62 = vadd.f32 %v2554_v45, %v2553_v40  ;;  %v1814_v5 = vsub.f32 1.0, %v3488_v24  ;;  %v2556_v7 = vsel %vm2258_vm5, %v3628_v63, 0.0  ;;  %v1848_v9 = vmul.f32 %v1816_v49, %v1816_v49  ;;  %v1180_v40 = vld [vmem:[%s3452_s19 + $0x78] sm:$0xff] }
 0x14e   : > { %v2415_v55 = vadd.f32 %v2414_v52, %v2413_v50  ;;  %v1845_v52 = vmul.f32 %v1813_v32, %v1813_v32  ;;  %v3654_v30 = vmul.f32 %v1843_v61, %v1843_v61  ;;  %v3657_v32 = vld [vmem:[%s3553_s22 + $0x30] sm:$0xff]  ;;  %v1815_v45 = vsub.f32 1.0, %v3500_v31 }
 0x14f   : > { %v1846_v43 = vmul.f32 %v1814_v5, %v1814_v5  ;;  %vm1665_vm3 = vcmp.eq.f32.partialorder %v1180_v40, 1.0  ;;  %v1183_v61 = vld [vmem:[%s3452_s19 + $0x90] sm:$0xff] }
 0x150   : > { %v2417_v0 = vadd.f32 %v2416_v56, %v2415_v55  ;;  %v3623_v55 = vmul.f32 %v2847_v41, %v3471_v17  ;;  %v3645_v22 = vmul.f32 %v1845_v52, %v1845_v52  ;;  %v2558_v41 = vsel %vm2258_vm5, %v3657_v32, 0.0  ;;  %v3713_v56 = vld [vmem:[%s5339_s4] ss:$0 sm:$0xff] }
 0x151   : > { %v2850_v49 = vsel %vm1665_vm3, 1.0, %v5348_v16  ;;  %vm1668_vm7 = vcmp.eq.f32.partialorder %v1183_v61, 1.0 }
 0x152   : > { %v2419_v8 = vadd.f32 %v2418_v1, %v2417_v0  ;;  %5394 = vst [vmem:[#allocation9_spill] sm:$0xff] %v3623_v55  ;;  %v3631_v0 = vld [vmem:[%s3452_s19 + $0x70] sm:$0xff]  ;;  %v2848_v1 = vsel %vm1663_vm0, 1.0, %v5348_v16  ;;  %v2426_v27 = vsel %vm2258_vm5, %v3623_v55, 0.0  ;;  %v3695_v19 = vmul.f32 %v2850_v49, %v3471_v17 }
 0x153   : > { %5395 = vst [vmem:[#allocation10_spill] sm:$0xff] %v3631_v0  ;;  %vm1664_vm2 = vcmp.eq.f32.partialorder %v3631_v0, 1.0  ;;  %v3650_v28 = vmul.f32 %v2848_v1, %v3471_v17  ;;  %v2853_v26 = vsel %vm1668_vm7, 1.0, %v5348_v16 }
 0x154   : > { %v2421_v29 = vadd.f32 %v2420_v11, %v2419_v8  ;;  %v3640_v8 = vmul.f32 %v1842_v48, %v1842_v48  ;;  %v1817_v11 = vsub.f32 1.0, %v3526_v44  ;;  %v2849_v36 = vsel %vm1664_vm2, 1.0, %v5348_v16  ;;  %v1181_v48 = vld [vmem:[%s3452_s19 + $0x80] sm:$0xff]  ;;  %5399 = vst [vmem:[#allocation14_spill] sm:$0xff] %v3695_v19 }
 0x155   : > { %5396 = vst [vmem:[#allocation11_spill] sm:$0xff] %v3650_v28  ;;  %v3673_v1 = vmul.f32 %v2849_v36, %v3471_v17  ;;  %v2428_v5 = vsel %vm2258_vm5, %v3650_v28, 0.0  ;;  %vm1666_vm4 = vcmp.eq.f32.partialorder %v1181_v48, 1.0  ;;  %v1821_v36 = vsub.f32 1.0, %v3586_v6  ;;  %v3716_v28 = vld [vmem:[%s3553_s22 + $0x50] sm:$0xff] }
 0x156   : > { %v2423_v50 = vadd.f32 %v2422_v34, %v2421_v29  ;;  %v2557_v34 = vadd.f32 %v2556_v7, %v2555_v62  ;;  %v1849_v52 = vmul.f32 %v1817_v11, %v1817_v11  ;;  %v1820_v62 = vsub.f32 1.0, %v3568_v60  ;;  %v3678_v7 = vld [vmem:[%s3553_s22 + $0x38] sm:$0xff] }
 0x157   : > { %5397 = vst [vmem:[#allocation12_spill] sm:$0xff] %v3673_v1  ;;  %v3682_v11 = vmul.f32 %v1846_v43, %v1846_v43  ;;  %v2430_v43 = vsel %vm2258_vm5, %v3673_v1, 0.0  ;;  %v1853_v49 = vmul.f32 %v1821_v36, %v1821_v36  ;;  %v2432_v55 = vsel %vm2258_vm5, %v3695_v19, 0.0 }
 0x158   : > { %v2425_v18 = vadd.f32 %v2424_v54, %v2423_v50  ;;  %v3667_v50 = vmul.f32 %v1848_v9, %v1848_v9  ;;  %v2559_v40 = vadd.f32 %v2558_v41, %v2557_v34  ;;  %v1818_v9 = vsub.f32 1.0, %v3530_v46 }
 0x159   : > { %v3690_v34 = vmul.f32 %v1849_v52, %v1849_v52  ;;  %v1852_v48 = vmul.f32 %v1820_v62, %v1820_v62  ;;  %v3703_v52 = vld [vmem:[%s3553_s22 + $0x40] sm:$0xff]  ;;  %v3749_v57 = vmul.f32 %v1853_v49, %v1853_v49  ;;  %v1824_v19 = vsub.f32 1.0, %v3631_v0 }
 0x15a   : > { %v2427_v54 = vadd.f32 %v2426_v27, %v2425_v18  ;;  %v2560_v18 = vsel %vm2258_vm5, %v3678_v7, 0.0  ;;  %v1847_v27 = vmul.f32 %v1815_v45, %v1815_v45  ;;  %v2851_v45 = vsel %vm1666_vm4, 1.0, %v5348_v16 }
 0x15b   : > { %5398 = vst [vmem:[#allocation13_spill] sm:$0xff] %v3690_v34  ;;  %v2562_v62 = vsel %vm2258_vm5, %v3703_v52, 0.0  ;;  %v3724_v36 = vmul.f32 %v1852_v48, %v1852_v48  ;;  %v3728_v16 = vsel %vm2258_vm5, %v3716_v28, 0.0  ;;  %5405 = vst [vmem:[#allocation20_spill] sm:$0xff] %v3749_v57 }
 0x15c   : > { %v2429_v41 = vadd.f32 %v2428_v5, %v2427_v54  ;;  %v1850_v54 = vmul.f32 %v1818_v9, %v1818_v9  ;;  %v2561_v5 = vadd.f32 %v2560_v18, %v2559_v40  ;;  %v3705_v61 = vmul.f32 %v1847_v27, %v1847_v27 }
 0x15d   : > { %v1819_v40 = vsub.f32 1.0, %v3540_v51  ;;  %v3722_v27 = vmul.f32 %v2851_v45, %v3471_v17  ;;  %5402 = vst [vmem:[#allocation17_spill] sm:$0xff] %v3724_v36  ;;  %v3744_v45 = vmul.f32 %v2853_v26, %v3471_v17 }
 0x15e   : > { %5400 = vst [vmem:[#allocation15_spill] sm:$0xff] %v3705_v61  ;;  %v2431_v18 = vadd.f32 %v2430_v43, %v2429_v41  ;;  %v3734_v10 = vmul.f32 %v1850_v54, %v1850_v54  ;;  %v3736_v41 = vadd.f32 %v2562_v62, %v2561_v5  ;;  %v3739_v43 = vld [vmem:[%s3553_s22 + $0x58] sm:$0xff] }
 0x15f   : > { %5401 = vst [vmem:[#allocation16_spill] sm:$0xff] %v3722_v27  ;;  %5404 = vst [vmem:[#allocation19_spill] sm:$0xff] %v3744_v45  ;;  %v3753_v54 = vsel %vm2258_vm5, %v3739_v43, 0.0  ;;  %v1851_v49 = vmul.f32 %v1819_v40, %v1819_v40  ;;  %v2434_v48 = vsel %vm2258_vm5, %v3722_v27, 0.0 }
 0x160   : > { %5403 = vst [vmem:[#allocation18_spill] sm:$0xff] %v3734_v10  ;;  %5406 = vst [vmem:[#allocation21_spill] sm:$0xff] %v3753_v54 }
 0x1df   : > { %v2997_v9 = vpop.f32.mrb[0].mxu1 }
 0x1e0   : > { %v3747_v36 = vadd.f32 %v2997_v9, %v3713_v56  ;;  %v877_v29 = vpop.f32.mrb[1].mxu1  ;;  %v2433_v9 = vadd.f32 %v2432_v55, %v2431_v18  ;;  %v3782_v18 = vsel %vm2258_vm5, %v3744_v45, 0.0 }
 0x1e1   : > { %v3765_v26 = vadd.f32 %v3713_v56, %v877_v29  ;;  %v2998_v62 = vpop.f32.mrb[2].mxu1  ;;  %5407 = vst [vmem:[#allocation22_spill] sm:$0xff] %v3782_v18 }
 0x1e2   : > { %v2871_v5 = vpack.c.bf16 %v3747_v36, %v3747_v36  ;;  %v1268_v2 = vand.u32 2147483647, %v3747_v36  ;;  %v2164_v35 = vsub.f32 %v3747_v36, %v3466_v15  ;;  %v880_v57 = vpop.f32.mrb[3].mxu1  ;;  %v3787_v15 = vadd.f32 %v2998_v62, %v3713_v56 }
 0x1e3   : > { %v2869_v29 = vpack.c.bf16 %v3765_v26, %v3765_v26  ;;  %v1266_v55 = vand.u32 2147483647, %v3765_v26  ;;  %v2162_v40 = vsub.f32 %v3765_v26, %v3457_v13  ;;  %v3790_v54 = vadd.f32 %v3713_v56, %v880_v57 }
 0x1e4   : > { %1135 = vst.msk [vmem:[%s3762_s29 + $0x8] sm:$0xf] %vm1132_vm6, %v2871_v5  ;;  %v1300_v27 = vsub.f32 0.0, %v1268_v2  ;;  %v2196_v10 = vand.u32 2147483647, %v2164_v35  ;;  %v3794_v13 = vmul.f32 %v1851_v49, %v1851_v49  ;;  %v3796_v61 = vadd.f32 %v2434_v48, %v2433_v9 }
 0x1e5   : > { %1133 = vst.msk [vmem:[%s3762_s29] sm:$0xf] %vm1132_vm6, %v2869_v29  ;;  %v1298_v42 = vsub.f32 0.0, %v1266_v55  ;;  %v2194_v0 = vand.u32 2147483647, %v2162_v40  ;;  %v2872_v35 = vpack.c.bf16 %v3787_v15, %v3787_v15  ;;  %v3801_v5 = vmul.f32 %v1824_v19, %v1824_v19  ;;  %v3814_v19 = vld [vmem:[%s3553_s22 + $0x48] sm:$0xff] }
 0x1e6   : > { %5408 = vst [vmem:[#allocation23_spill] sm:$0xff] %v3794_v13  ;;  %5409 = vst [vmem:[#allocation24_spill] sm:$0xff] %v3796_v61  ;;  %v1334_v18 = vmul.f32 1.442695, %v1300_v27  ;;  %v2228_v2 = vmul.f32 %v2196_v10, %v3582_v3  ;;  %v1269_v29 = vand.u32 2147483647, %v3787_v15  ;;  %v2165_v49 = vsub.f32 %v3787_v15, %v3484_v23 }
 0x1e7   : > { %5410 = vst [vmem:[#allocation25_spill] sm:$0xff] %v3801_v5  ;;  %v1330_v57 = vmul.f32 1.442695, %v1298_v42  ;;  %v2226_v62 = vmul.f32 %v2194_v0, %v3562_v58  ;;  %v3001_v48 = vpop.f32.mrb[4].mxu1  ;;  %1136 = vst.msk [vmem:[%s3762_s29 + $0xc] sm:$0xf] %vm1132_vm6, %v2872_v35  ;;  %v2870_v10 = vpack.c.bf16 %v3790_v54, %v3790_v54  ;;  %v2163_v40 = vsub.f32 %v3790_v54, %v3460_v14 }
 0x1e8   : > { %3072 = vpow2.f32 %v1334_v18  ;;  %v893_v42 = vpop.f32.mrb[5].mxu1  ;;  %v1301_v58 = vsub.f32 0.0, %v1269_v29  ;;  %v2197_v0 = vand.u32 2147483647, %v2165_v49  ;;  %v3818_v23 = vsel %vm2258_vm5, %v3814_v19, 0.0 }
 0x1e9   : > { %3074 = vpow2.f32 %v1330_v57  ;;  %v3002_v27 = vpop.f32.mrb[6].mxu1  ;;  %1134 = vst.msk [vmem:[%s3762_s29 + $0x4] sm:$0xf] %vm1132_vm6, %v2870_v10  ;;  %v1267_v55 = vand.u32 2147483647, %v3790_v54  ;;  %v3826_v18 = vadd.f32 %v3001_v48, %v3713_v56  ;;  %v3829_v35 = vadd.f32 %v3713_v56, %v893_v42 }
 0x1ea   : > { %v896_v57 = vpop.f32.mrb[7].mxu1  ;;  %v1336_v49 = vmul.f32 1.442695, %v1301_v58  ;;  %v2229_v3 = vmul.f32 %v2197_v0, %v3598_v12  ;;  %v2195_v61 = vand.u32 2147483647, %v2163_v40  ;;  %v3838_v48 = vadd.f32 %v3002_v27, %v3713_v56 }
 0x1eb   : > { %v1299_v9 = vsub.f32 0.0, %v1267_v55  ;;  %v2875_v14 = vpack.c.bf16 %v3826_v18, %v3826_v18  ;;  %v2478_v42 = vsel %vm2258_vm5, %v2228_v2, 0.0  ;;  %v1272_v29 = vand.u32 2147483647, %v3826_v18 }
 0x1ec   : > { %3076 = vpow2.f32 %v1336_v49  ;;  %v2168_v12 = vsub.f32 %v3826_v18, %v3515_v38  ;;  %v2227_v0 = vmul.f32 %v2195_v61, %v3565_v59  ;;  %v2873_v55 = vpack.c.bf16 %v3829_v35, %v3829_v35 }
 0x1ed   : > { %v1332_v58 = vmul.f32 1.442695, %v1299_v9  ;;  %1139 = vst.msk [vmem:[%s3762_s29 + $0x18] sm:$0xf] %vm1132_vm6, %v2875_v14  ;;  %v3850_v27 = vadd.f32 %v3713_v56, %v896_v57  ;;  %v1304_v40 = vsub.f32 0.0, %v1272_v29  ;;  %v2166_v10 = vsub.f32 %v3829_v35, %v3488_v24 }
 0x1ee   : > { %v2200_v2 = vand.u32 2147483647, %v2168_v12  ;;  %v1270_v49 = vand.u32 2147483647, %v3829_v35  ;;  %v2475_v9 = vsel %vm2258_vm5, %v2226_v62, 0.0  ;;  %v2476_v59 = vsel %vm2258_vm5, %v2227_v0, 0.0 }
 0x1ef   : > { %v3005_v38 = vpop.f32.mrb[8].mxu1  ;;  %3078 = vpow2.f32 %v1332_v58  ;;  %1137 = vst.msk [vmem:[%s3762_s29 + $0x10] sm:$0xf] %vm1132_vm6, %v2873_v55  ;;  %v2876_v61 = vpack.c.bf16 %v3838_v48, %v3838_v48  ;;  %v2477_v29 = vadd.f32 %v2476_v59, %v2475_v9  ;;  %v1342_v14 = vmul.f32 1.442695, %v1304_v40 }
 0x1f0   : > { %v909_v57 = vpop.f32.mrb[9].mxu1  ;;  %v3862_v12 = vmul.f32 %v2200_v2, %v3657_v32  ;;  %v1302_v1 = vsub.f32 0.0, %v1270_v49  ;;  %v2198_v45 = vand.u32 2147483647, %v2166_v10  ;;  %v1273_v62 = vand.u32 2147483647, %v3838_v48 }
 0x1f1   : > { %v3006_v13 = vpop.f32.mrb[10].mxu1  ;;  %1140 = vst.msk [vmem:[%s3762_s29 + $0x1c] sm:$0xf] %vm1132_vm6, %v2876_v61  ;;  %v2169_v58 = vsub.f32 %v3838_v48, %v3526_v44  ;;  %v2874_v0 = vpack.c.bf16 %v3850_v27, %v3850_v27  ;;  %v2480_v2 = vsel %vm2258_vm5, %v2229_v3, 0.0  ;;  %v2479_v49 = vadd.f32 %v2478_v42, %v2477_v29 }
 0x1f2   : > { %v3073_v24 = vpop.eup %3072  ;;  %v3871_v55 = vpop.f32.mrb[11].mxu1  ;;  %3080 = vpow2.f32 %v1342_v14  ;;  %v1338_v10 = vmul.f32 1.442695, %v1302_v1  ;;  %v2230_v59 = vmul.f32 %v2198_v45, %v3614_v39  ;;  %v1305_v61 = vsub.f32 0.0, %v1273_v62 }
 0x1f3   : > { %v3075_v40 = vpop.eup %3074  ;;  %v1396_v32 = vadd.f32 1.0, %v3073_v24  ;;  %1138 = vst.msk [vmem:[%s3762_s29 + $0x14] sm:$0xf] %vm1132_vm6, %v2874_v0  ;;  %v1235_v44 = vmax.f32 %v3790_v54, 0.0  ;;  %v2481_v5 = vadd.f32 %v2480_v2, %v2479_v49  ;;  %v2201_v53 = vand.u32 2147483647, %v2169_v58 }
 0x1f4   : > { %v1394_v9 = vadd.f32 1.0, %v3075_v40  ;;  %v2482_v34 = vsel %vm2258_vm5, %v2230_v59, 0.0  ;;  %v1344_v24 = vmul.f32 1.442695, %v1305_v61  ;;  %v1271_v3 = vand.u32 2147483647, %v3850_v27 }
 0x1f5   : > { %3082 = vlog2.f32 %v1396_v32  ;;  %v2483_v29 = vadd.f32 %v2482_v34, %v2481_v5  ;;  %v2233_v1 = vmul.f32 %v2201_v53, %v3678_v7  ;;  %v2167_v39 = vsub.f32 %v3850_v27, %v3500_v31 }
 0x1f6   : > { %3084 = vlog2.f32 %v1394_v9  ;;  %v3077_v42 = vpop.eup %3076  ;;  %v1303_v62 = vsub.f32 0.0, %v1271_v3  ;;  %v3886_v58 = vadd.f32 %v3005_v38, %v3713_v56  ;;  %v1240_v40 = vmax.f32 %v3826_v18, 0.0 }
 0x1f7   : > { %3086 = vpow2.f32 %v1338_v10  ;;  %v3883_v45 = vpop.f32.mrb[12].mxu1  ;;  %v1397_v14 = vadd.f32 1.0, %v3077_v42  ;;  %v2199_v34 = vand.u32 2147483647, %v2167_v39  ;;  %v3893_v53 = vadd.f32 %v3713_v56, %v909_v57 }
 0x1f8   : > { %3088 = vpow2.f32 %v1344_v24  ;;  %v3888_v0 = vpop.f32.mrb[13].mxu1  ;;  %v1340_v5 = vmul.f32 1.442695, %v1303_v62  ;;  %v2879_v38 = vpack.c.bf16 %v3886_v58, %v3886_v58  ;;  %v3900_v2 = vadd.f32 %v3006_v13, %v3713_v56 }
 0x1f9   : > { %v3895_v31 = vpop.f32.mrb[14].mxu1  ;;  %v3079_v7 = vpop.eup %3078  ;;  %3090 = vlog2.f32 %v1397_v14  ;;  %v2231_v10 = vmul.f32 %v2199_v34, %v3628_v63  ;;  %v1276_v57 = vand.u32 2147483647, %v3886_v58  ;;  %v2172_v59 = vsub.f32 %v3886_v58, %v3568_v60 }
 0x1fa   : > { %v3902_v49 = vpop.f32.mrb[15].mxu1  ;;  %v1395_v9 = vadd.f32 1.0, %v3079_v7  ;;  %3092 = vpow2.f32 %v1340_v5  ;;  %1143 = vst.msk [vmem:[%s3762_s29 + $0x28] sm:$0xf] %vm1132_vm6, %v2879_v38  ;;  %v2877_v13 = vpack.c.bf16 %v3893_v53, %v3893_v53  ;;  %v1274_v24 = vand.u32 2147483647, %v3893_v53 }
 0x1fb   : > { %v2484_v42 = vsel %vm2258_vm5, %v2231_v10, 0.0  ;;  %v1308_v63 = vsub.f32 0.0, %v1276_v57  ;;  %v2204_v39 = vand.u32 2147483647, %v2172_v59  ;;  %v2170_v34 = vsub.f32 %v3893_v53, %v3530_v46 }
 0x1fc   : > { %v3081_v3 = vpop.eup %3080  ;;  %3094 = vlog2.f32 %v1395_v9  ;;  %v2485_v62 = vadd.f32 %v2484_v42, %v2483_v29  ;;  %1141 = vst.msk [vmem:[%s3762_s29 + $0x20] sm:$0xf] %vm1132_vm6, %v2877_v13  ;;  %v1306_v60 = vsub.f32 0.0, %v1274_v24  ;;  %v2486_v5 = vsel %vm2258_vm5, %v3862_v12, 0.0 }
 0x1fd   : > { %v1400_v14 = vadd.f32 1.0, %v3081_v3  ;;  %v1350_v38 = vmul.f32 1.442695, %v1308_v63  ;;  %v2236_v9 = vmul.f32 %v2204_v39, %v3716_v28  ;;  %v2880_v10 = vpack.c.bf16 %v3900_v2, %v3900_v2 }
 0x1fe   : > { %v2487_v13 = vadd.f32 %v2486_v5, %v2485_v62  ;;  %v1346_v24 = vmul.f32 1.442695, %v1306_v60  ;;  %v2488_v12 = vsel %vm2258_vm5, %v2233_v1, 0.0  ;;  %v2202_v63 = vand.u32 2147483647, %v2170_v34 }
 0x1ff   : > { %v3083_v7 = vpop.eup %3082  ;;  %v3924_v57 = vpop.f32.mrb[16].mxu1  ;;  %3096 = vlog2.f32 %v1400_v14  ;;  %1144 = vst.msk [vmem:[%s3762_s29 + $0x2c] sm:$0xf] %vm1132_vm6, %v2880_v10  ;;  %v5411_v61 = vmax.f32 %v3747_v36, 0.0 }
 0x200   : > { %v3085_v29 = vpop.eup %3084  ;;  %v1431_v59 = vmul.f32 0.6931472, %v3083_v7  ;;  %v3926_v3 = vpop.f32.mrb[17].mxu1  ;;  %3098 = vpow2.f32 %v1350_v38  ;;  %v2489_v62 = vadd.f32 %v2488_v12, %v2487_v13  ;;  %v5413_v7 = vmax.f32 %v3765_v26, 0.0 }
 0x201   : > { %v3087_v46 = vpop.eup %3086  ;;  %v1427_v42 = vmul.f32 0.6931472, %v3085_v29  ;;  %v3931_v28 = vpop.f32.mrb[18].mxu1  ;;  %3100 = vpow2.f32 %v1346_v24  ;;  %v2234_v34 = vmul.f32 %v2202_v63, %v3703_v52  ;;  %v1277_v38 = vand.u32 2147483647, %v3900_v2 }
 0x202   : > { %v3089_v39 = vpop.eup %3088  ;;  %v3935_v32 = vadd.f32 %v1431_v59, %v5411_v61  ;;  %v1398_v14 = vadd.f32 1.0, %v3087_v46  ;;  %v3937_v60 = vpop.f32.mrb[19].mxu1  ;;  %v2173_v59 = vsub.f32 %v3900_v2, %v3586_v6  ;;  %v5414_v6 = vmax.f32 %v3787_v15, 0.0 }
 0x203   : > { %5412 = vst [vmem:[#allocation26_spill] sm:$0xff] %v3937_v60  ;;  %v3941_v5 = vadd.f32 %v1427_v42, %v5413_v7  ;;  %v1401_v1 = vadd.f32 1.0, %v3089_v39  ;;  %v3091_v10 = vpop.eup %3090  ;;  %v1309_v12 = vsub.f32 0.0, %v1277_v38 }
 0x204   : > { %v3947_v29 = vsub.f32 %v3747_v36, %v3935_v32  ;;  %3102 = vlog2.f32 %v1398_v14  ;;  %v1433_v24 = vmul.f32 0.6931472, %v3091_v10  ;;  %v3093_v46 = vpop.eup %3092  ;;  %v2490_v36 = vsel %vm2258_vm5, %v2234_v34, 0.0 }
 0x205   : > { %v3954_v13 = vsub.f32 %v3765_v26, %v3941_v5  ;;  %3104 = vlog2.f32 %v1401_v1  ;;  %v2205_v63 = vand.u32 2147483647, %v2173_v59  ;;  %v1399_v26 = vadd.f32 1.0, %v3093_v46 }
 0x206   : > { %v1590_v42 = vmul.f32 1.442695, %v3947_v29  ;;  %v3095_v39 = vpop.eup %3094  ;;  %v3962_v7 = vadd.f32 %v1433_v24, %v5414_v6  ;;  %v3964_v61 = vadd.f32 %v2490_v36, %v2489_v62  ;;  %v3979_v62 = vadd.f32 %v3713_v56, %v3871_v55 }
 0x207   : > { %v1586_v14 = vmul.f32 1.442695, %v3954_v13  ;;  %v3966_v1 = vpop.f32.mrb[20].mxu1  ;;  %v1429_v10 = vmul.f32 0.6931472, %v3095_v39  ;;  %v2237_v34 = vmul.f32 %v2205_v63, %v3739_v43  ;;  %v3986_v43 = vsel %vm2258_vm5, %v2236_v9, 0.0 }
 0x208   : > { %5415 = vst [vmem:[#allocation27_spill] sm:$0xff] %v3966_v1  ;;  %3106 = vpow2.f32 %v1590_v42  ;;  %v3970_v38 = vpop.f32.mrb[21].mxu1  ;;  %v3974_v59 = vsub.f32 %v3787_v15, %v3962_v7  ;;  %v1352_v36 = vmul.f32 1.442695, %v1309_v12  ;;  %v1556_v39 = vsub.f32 0.0, %v3935_v32 }
 0x209   : > { %5416 = vst [vmem:[#allocation28_spill] sm:$0xff] %v3970_v38  ;;  %3108 = vpow2.f32 %v1586_v14  ;;  %v3097_v46 = vpop.eup %3096  ;;  %v3983_v42 = vadd.f32 %v1429_v10, %v1235_v44  ;;  %v3988_v63 = vpop.f32.mrb[22].mxu1  ;;  %v2878_v6 = vpack.c.bf16 %v3979_v62, %v3979_v62  ;;  %v1554_v44 = vsub.f32 0.0, %v3941_v5 }
 0x20a   : > { %3110 = vlog2.f32 %v1399_v26  ;;  %5417 = vst [vmem:[#allocation29_spill] sm:$0xff] %v3988_v63  ;;  %v3099_v15 = vpop.eup %3098  ;;  %v1592_v14 = vmul.f32 1.442695, %v3974_v59  ;;  %v1439_v55 = vmul.f32 0.6931472, %v3097_v46  ;;  %v4001_v12 = vsel %vm2258_vm5, %v2237_v34, 0.0 }
 0x20b   : > { %v3101_v24 = vpop.eup %3100  ;;  %v3998_v9 = vsub.f32 %v3790_v54, %v3983_v42  ;;  %v1404_v10 = vadd.f32 1.0, %v3099_v15  ;;  %1142 = vst.msk [vmem:[%s3762_s29 + $0x24] sm:$0xf] %vm1132_vm6, %v2878_v6  ;;  %v2565_v5 = vadd.f32 %v3818_v23, %v3736_v41  ;;  %v1275_v54 = vand.u32 2147483647, %v3979_v62 }
 0x20c   : > { %3112 = vpow2.f32 %v1592_v14  ;;  %v4005_v32 = vadd.f32 %v1439_v55, %v1240_v40  ;;  %v2171_v34 = vsub.f32 %v3979_v62, %v3540_v51  ;;  %v1402_v23 = vadd.f32 1.0, %v3101_v24 }
 0x20d   : > { %v1588_v52 = vmul.f32 1.442695, %v3998_v9  ;;  %3114 = vpow2.f32 %v1352_v36  ;;  %v5418_v63 = vmax.f32 %v3829_v35, 0.0  ;;  %v4027_v51 = vadd.f32 %v3728_v16, %v2565_v5  ;;  %v4041_v16 = vpop.f32.mrb[23].mxu1 }
 0x20e   : > { %v3103_v46 = vpop.eup %3102  ;;  %v4018_v40 = vsub.f32 %v3826_v18, %v4005_v32  ;;  %v2203_v6 = vand.u32 2147483647, %v2171_v34  ;;  %5420 = vst [vmem:[#allocation30_spill] sm:$0xff] %v4041_v16 }
 0x20f   : > { %v3105_v14 = vpop.eup %3104  ;;  %v1435_v15 = vmul.f32 0.6931472, %v3103_v46  ;;  %3116 = vpow2.f32 %v1588_v52  ;;  %v5419_v46 = vmax.f32 %v3838_v48, 0.0  ;;  %v1307_v52 = vsub.f32 0.0, %v1275_v54 }
 0x210   : > { %v1441_v41 = vmul.f32 0.6931472, %v3105_v14  ;;  %v1598_v36 = vmul.f32 1.442695, %v4018_v40  ;;  %3118 = vlog2.f32 %v1404_v10  ;;  %v4035_v24 = vmul.f32 %v2203_v6, %v3814_v19 }
 0x211   : > { %v4024_v38 = vadd.f32 %v1435_v15, %v5418_v63 }
 0x212   : > { %v3107_v26 = vpop.eup %3106  ;;  %v4032_v55 = vadd.f32 %v1441_v41, %v5419_v46  ;;  %3120 = vpow2.f32 %v1598_v36 }
 0x213   : > { %v3109_v34 = vpop.eup %3108  ;;  %v1908_v14 = vsub.f32 1.0, %v3107_v26  ;;  %v2036_v1 = vmul.f32 %v3107_v26, %v3107_v26  ;;  %v4039_v63 = vsub.f32 %v3829_v35, %v4024_v38  ;;  %3122 = vlog2.f32 %v1402_v23 }
 0x214   : > { %v3111_v10 = vpop.eup %3110  ;;  %v1906_v5 = vsub.f32 1.0, %v3109_v34  ;;  %v2034_v15 = vmul.f32 %v3109_v34, %v3109_v34  ;;  %v4045_v41 = vsub.f32 %v3838_v48, %v4032_v55  ;;  %v4050_v26 = vadd.f32 %v3883_v45, %v3713_v56 }
 0x215   : > { %v1940_v19 = vmul.f32 %v1908_v14, %v1908_v14  ;;  %v2068_v54 = vmul.f32 %v2036_v1, %v1556_v39  ;;  %v1594_v6 = vmul.f32 1.442695, %v4039_v63  ;;  %v1437_v18 = vmul.f32 0.6931472, %v3111_v10 }
 0x216   : > { %v1938_v35 = vmul.f32 %v1906_v5, %v1906_v5  ;;  %v2066_v36 = vmul.f32 %v2034_v15, %v1554_v44  ;;  %v1600_v46 = vmul.f32 1.442695, %v4045_v41  ;;  %v3113_v16 = vpop.eup %3112  ;;  %v4055_v23 = vmul.f32 1.442695, %v1307_v52 }
 0x217   : > { %v1972_v34 = vmul.f32 %v1940_v19, %v3947_v29  ;;  %v2100_v48 = vmul.f32 %v2068_v54, %v3634_v4  ;;  %3124 = vpow2.f32 %v1594_v6  ;;  %v3115_v1 = vpop.eup %3114  ;;  %v1909_v45 = vsub.f32 1.0, %v3113_v16 }
 0x218   : > { %v1970_v39 = vmul.f32 %v1938_v35, %v3954_v13  ;;  %v2098_v14 = vmul.f32 %v2066_v36, %v3640_v8  ;;  %v2037_v60 = vmul.f32 %v3113_v16, %v3113_v16  ;;  %v5421_v10 = vsub.f32 %v3471_v17, %v3491_v25 }
 0x219   : > { %v2004_v44 = vmul.f32 %v1972_v34, %v3491_v25  ;;  %3126 = vpow2.f32 %v1600_v46  ;;  %v5422_v29 = vmax.f32 %v3850_v27, 0.0  ;;  %v3117_v52 = vpop.eup %3116  ;;  %v5423_v13 = vsub.f32 %v3471_v17, %v3477_v20 }
 0x21a   : > { %v2132_v5 = vmul.f32 %v2100_v48, %v5421_v10  ;;  %v2002_v15 = vmul.f32 %v1970_v39, %v3477_v20  ;;  %v1941_v19 = vmul.f32 %v1909_v45, %v1909_v45  ;;  %v5424_v16 = vsub.f32 0.0, %v3962_v7  ;;  %v3119_v6 = vpop.eup %3118 }
 0x21b   : > { %v4065_v4 = vadd.f32 %v1437_v18, %v5422_v29  ;;  %v2130_v8 = vmul.f32 %v2098_v14, %v5423_v13  ;;  %v1907_v35 = vsub.f32 1.0, %v3117_v52  ;;  %v2035_v25 = vmul.f32 %v3117_v52, %v3117_v52 }
 0x21c   : > { %v2069_v54 = vmul.f32 %v2037_v60, %v5424_v16  ;;  %v1558_v36 = vsub.f32 0.0, %v4024_v38  ;;  %v1561_v46 = vsub.f32 0.0, %v4032_v55  ;;  %v2262_v18 = vsel %vm2258_vm5, %v2004_v44, 0.0  ;;  %v3121_v20 = vpop.eup %3120 }
 0x21d   : > { %v1973_v34 = vmul.f32 %v1941_v19, %v3974_v59  ;;  %v4078_v39 = vadd.f32 1.0, %v3115_v1  ;;  %v2334_v14 = vsel %vm2258_vm5, %v2132_v5, 0.0  ;;  %v1939_v7 = vmul.f32 %v1907_v35, %v1907_v35  ;;  %v3123_v55 = vpop.eup %3122  ;;  %v4098_v35 = vpop.f32.mrb[24].mxu1 }
 0x21e   : > { %v2101_v48 = vmul.f32 %v2069_v54, %v3645_v22  ;;  %v5425_v60 = vsub.f32 0.0, %v3983_v42  ;;  %v4085_v38 = vsub.f32 %v3850_v27, %v4065_v4  ;;  %v5426_v59 = vsub.f32 %v3471_v17, %v3505_v33 }
 0x21f   : > { %v2005_v44 = vmul.f32 %v1973_v34, %v3505_v33  ;;  %v1912_v1 = vsub.f32 1.0, %v3121_v20  ;;  %v2040_v10 = vmul.f32 %v3121_v20, %v3121_v20  ;;  %v1971_v29 = vmul.f32 %v1939_v7, %v3998_v9 }
 0x220   : > { %v2067_v45 = vmul.f32 %v2035_v25, %v5425_v60  ;;  %v2133_v22 = vmul.f32 %v2101_v48, %v5426_v59  ;;  %v1596_v42 = vmul.f32 1.442695, %v4085_v38  ;;  %v1447_v52 = vmul.f32 0.6931472, %v3119_v6 }
 0x221   : > { %v2259_v13 = vsel %vm2258_vm5, %v2002_v15, 0.0  ;;  %v2331_v27 = vsel %vm2258_vm5, %v2130_v8, 0.0  ;;  %v1944_v19 = vmul.f32 %v1912_v1, %v1912_v1  ;;  %v5427_v16 = vsub.f32 0.0, %v4005_v32  ;;  %v3125_v33 = vpop.eup %3124  ;;  %v4108_v15 = vpop.f32.mrb[25].mxu1 }
 0x222   : > { %v2099_v5 = vmul.f32 %v2067_v45, %v3654_v30  ;;  %v2003_v25 = vmul.f32 %v1971_v29, %v3480_v21  ;;  %v5428_v9 = vsub.f32 %v3471_v17, %v3480_v21  ;;  %3128 = vpow2.f32 %v1596_v42 }
 0x223   : > { %v2072_v54 = vmul.f32 %v2040_v10, %v5427_v16  ;;  %v5429_v6 = vmax.f32 %v3886_v58, 0.0  ;;  %v1976_v8 = vmul.f32 %v1944_v19, %v4018_v40  ;;  %v1910_v48 = vsub.f32 1.0, %v3125_v33  ;;  %v3127_v7 = vpop.eup %3126 }
 0x224   : > { %v2131_v30 = vmul.f32 %v2099_v5, %v5428_v9  ;;  %v2038_v20 = vmul.f32 %v3125_v33, %v3125_v33  ;;  %v2260_v60 = vsel %vm2258_vm5, %v2003_v25, 0.0  ;;  %v1559_v21 = vsub.f32 0.0, %v4065_v4  ;;  %v4127_v9 = vpop.f32.mrb[26].mxu1 }
 0x225   : > { %v4106_v34 = vadd.f32 %v1447_v52, %v5429_v6  ;;  %v2104_v32 = vmul.f32 %v2072_v54, %v3667_v50  ;;  %v2261_v1 = vadd.f32 %v2260_v60, %v2259_v13  ;;  %v2008_v29 = vmul.f32 %v1976_v8, %v3533_v47 }
 0x226   : > { %v2332_v45 = vsel %vm2258_vm5, %v2131_v30, 0.0  ;;  %v5430_v50 = vsub.f32 %v3471_v17, %v3533_v47  ;;  %v1942_v5 = vmul.f32 %v1910_v48, %v1910_v48  ;;  %v2070_v42 = vmul.f32 %v2038_v20, %v1558_v36 }
 0x227   : > { %v4117_v59 = vsub.f32 %v3886_v58, %v4106_v34  ;;  %v2333_v10 = vadd.f32 %v2332_v45, %v2331_v27  ;;  %v1913_v52 = vsub.f32 1.0, %v3127_v7  ;;  %v2041_v19 = vmul.f32 %v3127_v7, %v3127_v7 }
 0x228   : > { %v2136_v40 = vmul.f32 %v2104_v32, %v5430_v50  ;;  %v2264_v16 = vsel %vm2258_vm5, %v2005_v44, 0.0  ;;  %v2336_v4 = vsel %vm2258_vm5, %v2133_v22, 0.0  ;;  %v2263_v54 = vadd.f32 %v2262_v18, %v2261_v1 }
 0x229   : > { %v2335_v33 = vadd.f32 %v2334_v14, %v2333_v10  ;;  %v1974_v58 = vmul.f32 %v1942_v5, %v4039_v63  ;;  %v2102_v13 = vmul.f32 %v2070_v42, %v3682_v11  ;;  %v1945_v27 = vmul.f32 %v1913_v52, %v1913_v52  ;;  %v5432_v14 = vld [vmem:[#allocation13_spill] sm:$0xff] }
 0x22a   : > { %v2073_v25 = vmul.f32 %v2041_v19, %v1561_v46  ;;  %v2265_v47 = vadd.f32 %v2264_v16, %v2263_v54  ;;  %v1606_v36 = vmul.f32 1.442695, %v4117_v59  ;;  %v1443_v6 = vmul.f32 0.6931472, %v3123_v55  ;;  %v5436_v19 = vld [vmem:[#allocation25_spill] sm:$0xff]  ;;  %v4165_v54 = vpop.f32.mrb[27].mxu1 }
 0x22b   : > { %v2337_v30 = vadd.f32 %v2336_v4, %v2335_v33  ;;  %v2006_v8 = vmul.f32 %v1974_v58, %v3512_v37  ;;  %v5431_v44 = vsub.f32 %v3471_v17, %v3512_v37  ;;  %v1977_v63 = vmul.f32 %v1945_v27, %v4045_v41  ;;  %v5434_v41 = vld [vmem:[#allocation4_spill] sm:$0xff] }
 0x22c   : > { %v2105_v11 = vmul.f32 %v2073_v25, %v5432_v14  ;;  %3130 = vpow2.f32 %v1606_v36  ;;  %v5433_v46 = vmax.f32 %v3893_v53, 0.0  ;;  %v2492_v55 = vsel %vm2258_vm5, %v4035_v24, 0.0  ;;  %v3129_v48 = vpop.eup %3128  ;;  %v1211_v24 = vld [vmem:[%s3553_s22 + $0x70] sm:$0xff] }
 0x22d   : > { %v2134_v18 = vmul.f32 %v2102_v13, %v5431_v44  ;;  %v2883_v32 = vpack.c.bf16 %v4050_v26, %v4050_v26  ;;  %v2266_v37 = vsel %vm2258_vm5, %v2006_v8, 0.0  ;;  %v2009_v7 = vmul.f32 %v1977_v63, %v5434_v41  ;;  %v5439_v8 = vld [vmem:[#allocation3_spill] sm:$0xff] }
 0x22e   : > { %v4138_v22 = vadd.f32 %v1443_v6, %v5433_v46  ;;  %v5435_v60 = vsub.f32 %v3471_v17, %v5434_v41  ;;  %v2267_v1 = vadd.f32 %v2266_v37, %v2265_v47  ;;  %v1911_v50 = vsub.f32 1.0, %v3129_v48  ;;  %v5437_v47 = vld [vmem:[#allocation15_spill] sm:$0xff]  ;;  %v5438_v6 = vld [vmem:[#allocation10_spill] sm:$0xff] }
 0x22f   : > { %v2338_v20 = vsel %vm2258_vm5, %v2134_v18, 0.0  ;;  %v2039_v5 = vmul.f32 %v3129_v48, %v3129_v48  ;;  %1147 = vst.msk [vmem:[%s3762_s29 + $0x38] sm:$0xf] %vm1132_vm6, %v2883_v32  ;;  %v1564_v42 = vsub.f32 0.0, %v4106_v34  ;;  %v4160_v16 = vmul.f32 %v5436_v19, %v5436_v19  ;;  %v3264_v48 = vld [vmem:[%s3452_s19 + $0x60] sm:$0xff] }
 0x230   : > { %v2137_v45 = vmul.f32 %v2105_v11, %v5435_v60  ;;  %v2339_v10 = vadd.f32 %v2338_v20, %v2337_v30  ;;  %v4156_v52 = vsub.f32 %v3893_v53, %v4138_v22  ;;  %v4163_v4 = vsel %vm2258_vm5, %v1211_v24, 0.0 }
 0x231   : > { %v1943_v33 = vmul.f32 %v1911_v50, %v1911_v50  ;;  %v2071_v58 = vmul.f32 %v2039_v5, %v1559_v21  ;;  %3132 = vlog2.f32 %v4078_v39  ;;  %v2493_v13 = vadd.f32 %v2492_v55, %v3964_v61 }
 0x232   : > { %v2270_v34 = vsel %vm2258_vm5, %v2008_v29, 0.0  ;;  %v1602_v53 = vmul.f32 1.442695, %v4156_v52  ;;  %3134 = vpow2.f32 %v4055_v23  ;;  %v1280_v27 = vand.u32 2147483647, %v4050_v26 }
 0x233   : > { %v1975_v25 = vmul.f32 %v1943_v33, %v4085_v38  ;;  %v2103_v30 = vmul.f32 %v2071_v58, %v5437_v47  ;;  %v2495_v36 = vadd.f32 %v3986_v43, %v2493_v13  ;;  %v2176_v21 = vsub.f32 %v4050_v26, %v5438_v6  ;;  %v5441_v6 = vld [vmem:[#allocation17_spill] sm:$0xff] }
 0x234   : > { %v2342_v39 = vsel %vm2258_vm5, %v2136_v40, 0.0  ;;  %3136 = vpow2.f32 %v1602_v53  ;;  %v1312_v61 = vsub.f32 0.0, %v1280_v27  ;;  %v4181_v29 = vadd.f32 %v3713_v56, %v3888_v0 }
 0x235   : > { %v2272_v23 = vsel %vm2258_vm5, %v2009_v7, 0.0  ;;  %v2007_v38 = vmul.f32 %v1975_v25, %v5439_v8  ;;  %v5440_v44 = vsub.f32 %v3471_v17, %v5439_v8  ;;  %v2208_v18 = vand.u32 2147483647, %v2176_v21 }
 0x236   : > { %v2344_v63 = vsel %vm2258_vm5, %v2137_v45, 0.0  ;;  %v1358_v40 = vmul.f32 1.442695, %v1312_v61  ;;  %v2881_v14 = vpack.c.bf16 %v4181_v29, %v4181_v29  ;;  %v1278_v11 = vand.u32 2147483647, %v4181_v29  ;;  %v3131_v0 = vpop.eup %3130 }
 0x237   : > { %v2135_v43 = vmul.f32 %v2103_v30, %v5440_v44  ;;  %v2268_v46 = vsel %vm2258_vm5, %v2007_v38, 0.0  ;;  %v2240_v32 = vmul.f32 %v2208_v18, %v1211_v24  ;;  %v1822_v37 = vsub.f32 1.0, %v3264_v48  ;;  %v4199_v24 = vpop.f32.mrb[28].mxu1  ;;  %v1209_v38 = vld [vmem:[%s3553_s22 + $0x60] sm:$0xff]  ;;  %v5442_v18 = vld [vmem:[#allocation7_spill] sm:$0xff] }
 0x238   : > { %v2269_v20 = vadd.f32 %v2268_v46, %v2267_v1  ;;  %v1916_v7 = vsub.f32 1.0, %v3131_v0  ;;  %v2044_v60 = vmul.f32 %v3131_v0, %v3131_v0  ;;  %1145 = vst.msk [vmem:[%s3762_s29 + $0x30] sm:$0xf] %vm1132_vm6, %v2881_v14  ;;  %v1562_v45 = vsub.f32 0.0, %v4138_v22  ;;  %v4203_v47 = vpop.f32.mrb[29].mxu1  ;;  %v5444_v14 = vld [vmem:[#allocation9_spill] sm:$0xff] }
 0x239   : > { %v2340_v55 = vsel %vm2258_vm5, %v2135_v43, 0.0  ;;  %v1248_v50 = vmax.f32 %v4050_v26, 0.0  ;;  %3138 = vpow2.f32 %v1358_v40  ;;  %v1310_v5 = vsub.f32 0.0, %v1278_v11 }
 0x23a   : > { %v2341_v41 = vadd.f32 %v2340_v55, %v2339_v10  ;;  %v2271_v19 = vadd.f32 %v2270_v34, %v2269_v20  ;;  %v1948_v58 = vmul.f32 %v1916_v7, %v1916_v7  ;;  %v2076_v13 = vmul.f32 %v2044_v60, %v1564_v42  ;;  %v4207_v42 = vpop.f32.mrb[30].mxu1 }
 0x23b   : > { %v3133_v53 = vpop.eup %3132  ;;  %v1354_v1 = vmul.f32 1.442695, %v1310_v5  ;;  %v1854_v10 = vmul.f32 %v1822_v37, %v1822_v37  ;;  %v2174_v27 = vsub.f32 %v4181_v29, %v3264_v48  ;;  %v2497_v25 = vadd.f32 %v4001_v12, %v2495_v36  ;;  %v5446_v5 = vld [vmem:[#allocation21_spill] sm:$0xff] }
 0x23c   : > { %v2343_v33 = vadd.f32 %v2342_v39, %v2341_v41  ;;  %v3135_v22 = vpop.eup %3134  ;;  %v1980_v30 = vmul.f32 %v1948_v58, %v4117_v59  ;;  %v2108_v34 = vmul.f32 %v2076_v13, %v5441_v6  ;;  %v2273_v21 = vadd.f32 %v2272_v23, %v2271_v19  ;;  %v3265_v6 = vld [vmem:[%s3452_s19 + $0x78] sm:$0xff] }
 0x23d   : > { %v1449_v61 = vmul.f32 0.6931472, %v3133_v53  ;;  %v1403_v8 = vadd.f32 1.0, %v3135_v22  ;;  %3140 = vpow2.f32 %v1354_v1  ;;  %v2206_v44 = vand.u32 2147483647, %v2174_v27  ;;  %v5447_v1 = vld [vmem:[#allocation18_spill] sm:$0xff] }
 0x23e   : > { %v2345_v39 = vadd.f32 %v2344_v63, %v2343_v33  ;;  %v3137_v43 = vpop.eup %3136  ;;  %v2012_v40 = vmul.f32 %v1980_v30, %v5442_v18  ;;  %v5443_v12 = vsub.f32 %v3471_v17, %v5442_v18  ;;  %v4218_v23 = vadd.f32 %v3895_v31, %v3713_v56  ;;  %v4220_v63 = vpop.f32.mrb[31].mxu1  ;;  %v1212_v18 = vld [vmem:[%s3553_s22 + $0x78] sm:$0xff] }
 0x23f   : > { %v1914_v11 = vsub.f32 1.0, %v3137_v43  ;;  %v2042_v0 = vmul.f32 %v3137_v43, %v3137_v43  ;;  %v5445_v46 = vmax.f32 %v3900_v2, 0.0  ;;  %3142 = vlog2.f32 %v1403_v8 }
 0x240   : > { %v2140_v36 = vmul.f32 %v2108_v34, %v5443_v12  ;;  %v4227_v48 = vsel %vm2258_vm5, %v2240_v32, 0.0  ;;  %v1246_v37 = vmax.f32 %v4181_v29, 0.0  ;;  %v4230_v20 = vmul.f32 %v1854_v10, %v1854_v10 }
 0x241   : > { %v4224_v55 = vadd.f32 %v1449_v61, %v5445_v46  ;;  %v2238_v41 = vmul.f32 %v2206_v44, %v1209_v38  ;;  %v1946_v31 = vmul.f32 %v1914_v11, %v1914_v11  ;;  %v2074_v7 = vmul.f32 %v2042_v0, %v1562_v45  ;;  %v5448_v61 = vld [vmem:[#allocation5_spill] sm:$0xff] }
 0x242   : > { %v2569_v19 = vadd.f32 %v5446_v5, %v4027_v51  ;;  %v2570_v32 = vsel %vm2258_vm5, %v1209_v38, 0.0  ;;  %v2884_v58 = vpack.c.bf16 %v4218_v23, %v4218_v23  ;;  %v1281_v13 = vand.u32 2147483647, %v4218_v23 }
 0x243   : > { %v4234_v60 = vsub.f32 %v3900_v2, %v4224_v55  ;;  %v2498_v33 = vsel %vm2258_vm5, %v2238_v41, 0.0  ;;  %v3139_v53 = vpop.eup %3138  ;;  %v1978_v45 = vmul.f32 %v1946_v31, %v4156_v52  ;;  %v2106_v10 = vmul.f32 %v2074_v7, %v5447_v1 }
 0x244   : > { %v4246_v27 = vadd.f32 %v2498_v33, %v2497_v25  ;;  %v4249_v51 = vsel %vm2258_vm5, %v2012_v40, 0.0  ;;  %v1408_v22 = vadd.f32 1.0, %v3139_v53  ;;  %1148 = vst.msk [vmem:[%s3762_s29 + $0x3c] sm:$0xf] %vm1132_vm6, %v2884_v58  ;;  %v1313_v30 = vsub.f32 0.0, %v1281_v13  ;;  %v5450_v53 = vld [vmem:[#allocation14_spill] sm:$0xff] }
 0x245   : > { %v1608_v2 = vmul.f32 1.442695, %v4234_v60  ;;  %v1825_v34 = vsub.f32 1.0, %v3265_v6  ;;  %v2010_v8 = vmul.f32 %v1978_v45, %v5448_v61  ;;  %v5449_v52 = vsub.f32 %v3471_v17, %v5448_v61  ;;  %v3266_v45 = vld [vmem:[%s3452_s19 + $0x68] sm:$0xff] }
 0x246   : > { %v2177_v44 = vsub.f32 %v4218_v23, %v3265_v6  ;;  %v4260_v25 = vsel %vm2258_vm5, %v2140_v36, 0.0  ;;  %v2571_v43 = vadd.f32 %v2570_v32, %v2569_v19  ;;  %v1360_v40 = vmul.f32 1.442695, %v1313_v30 }
 0x247   : > { %v2138_v38 = vmul.f32 %v2106_v10, %v5449_v52  ;;  %3144 = vpow2.f32 %v1608_v2  ;;  %v3141_v12 = vpop.eup %3140  ;;  %v2274_v11 = vsel %vm2258_vm5, %v2010_v8, 0.0  ;;  %v4267_v41 = vadd.f32 %v3713_v56, %v3902_v49  ;;  %v1210_v49 = vld [vmem:[%s3553_s22 + $0x68] sm:$0xff]  ;;  %v5457_v52 = vld [vmem:[#allocation16_spill] sm:$0xff] }
 0x248   : > { %3146 = vlog2.f32 %v1408_v22  ;;  %v2209_v46 = vand.u32 2147483647, %v2177_v44  ;;  %v4269_v31 = vadd.f32 %v2274_v11, %v2273_v21  ;;  %v1406_v7 = vadd.f32 1.0, %v3141_v12  ;;  %v5454_v44 = vld [vmem:[#allocation20_spill] sm:$0xff] }
 0x249   : > { %v2346_v0 = vsel %vm2258_vm5, %v2138_v38, 0.0  ;;  %3148 = vpow2.f32 %v1360_v40  ;;  %v3143_v5 = vpop.eup %3142  ;;  %v1565_v19 = vsub.f32 0.0, %v4224_v55  ;;  %v1857_v33 = vmul.f32 %v1825_v34, %v1825_v34  ;;  %v4296_v34 = vld [vmem:[%s5339_s4] ss:$0 sm:$0xff]  ;;  %v5452_v38 = vld [vmem:[#allocation11_spill] sm:$0xff] }
 0x24a   : > { %v4271_v36 = vadd.f32 %v2346_v0, %v2345_v39  ;;  %v2241_v32 = vmul.f32 %v2209_v46, %v1212_v18  ;;  %v2882_v58 = vpack.c.bf16 %v4267_v41, %v4267_v41  ;;  %v1445_v13 = vmul.f32 0.6931472, %v3143_v5 }
 0x24b   : > { %3150 = vlog2.f32 %v1406_v7  ;;  %v1249_v56 = vmax.f32 %v4218_v23, 0.0  ;;  %v1279_v21 = vand.u32 2147483647, %v4267_v41  ;;  %v1823_v1 = vsub.f32 1.0, %v3266_v45 }
 0x24c   : > { %1146 = vst.msk [vmem:[%s3762_s29 + $0x34] sm:$0xf] %vm1132_vm6, %v2882_v58  ;;  %v2175_v55 = vsub.f32 %v4267_v41, %v3266_v45  ;;  %v2572_v10 = vsel %vm2258_vm5, %v1210_v49, 0.0  ;;  %v5451_v2 = vmax.f32 %v3979_v62, 0.0  ;;  %v4291_v30 = vsel %vm2258_vm5, %v1212_v18, 0.0 }
 0x24d   : > { %v1311_v6 = vsub.f32 0.0, %v1279_v21  ;;  %v4300_v61 = vadd.f32 %v4296_v34, %v3924_v57  ;;  %v4302_v8 = vmul.f32 %v1857_v33, %v1857_v33  ;;  %v4312_v12 = vsel %vm2258_vm5, %v2241_v32, 0.0  ;;  %v5453_v33 = vld [vmem:[#allocation19_spill] sm:$0xff] }
 0x24e   : > { %v4288_v22 = vadd.f32 %v1445_v13, %v5451_v2  ;;  %v2207_v40 = vand.u32 2147483647, %v2175_v55  ;;  %v2573_v57 = vadd.f32 %v2572_v10, %v2571_v43  ;;  %v1855_v46 = vmul.f32 %v1823_v1, %v1823_v1 }
 0x24f   : > { %v1356_v11 = vmul.f32 1.442695, %v1311_v6  ;;  %v2887_v5 = vpack.c.bf16 %v4300_v61, %v4300_v61  ;;  %v1284_v43 = vand.u32 2147483647, %v4300_v61 }
 0x250   : > { %v4309_v18 = vsub.f32 %v3979_v62, %v4288_v22  ;;  %v2239_v7 = vmul.f32 %v2207_v40, %v1210_v49  ;;  %v3268_v49 = vld [vmem:[%s3452_s19 + $0x90] sm:$0xff] }
 0x251   : > { %v3145_v0 = vpop.eup %3144  ;;  %3152 = vpow2.f32 %v1356_v11  ;;  %1151 = vst.msk [vmem:[%s3762_s29 + $0x48] sm:$0xf] %vm1132_vm6, %v2887_v5  ;;  %v1828_v1 = vsub.f32 1.0, %v3268_v49 }
 0x252   : > { %v3147_v13 = vpop.eup %3146  ;;  %v1917_v21 = vsub.f32 1.0, %v3145_v0  ;;  %v2045_v62 = vmul.f32 %v3145_v0, %v3145_v0  ;;  %v1604_v45 = vmul.f32 1.442695, %v4309_v18  ;;  %v2500_v55 = vsel %vm2258_vm5, %v2239_v7, 0.0 }
 0x253   : > { %v1455_v32 = vmul.f32 0.6931472, %v3147_v13  ;;  %v3149_v10 = vpop.eup %3148  ;;  %v2501_v40 = vadd.f32 %v2500_v55, %v4246_v27  ;;  %v1563_v0 = vsub.f32 0.0, %v4288_v22  ;;  %v1316_v13 = vsub.f32 0.0, %v1284_v43 }
 0x254   : > { %v1949_v2 = vmul.f32 %v1917_v21, %v1917_v21  ;;  %v2077_v6 = vmul.f32 %v2045_v62, %v1565_v19  ;;  %3154 = vpow2.f32 %v1604_v45  ;;  %v1409_v7 = vadd.f32 1.0, %v3149_v10  ;;  %v1215_v62 = vld [vmem:[%s3553_s22 + $0x90] sm:$0xff] }
 0x255   : > { %v4328_v11 = vadd.f32 %v1455_v32, %v1248_v50  ;;  %v3151_v5 = vpop.eup %3150  ;;  %v2503_v21 = vadd.f32 %v4227_v48, %v2501_v40  ;;  %v2180_v19 = vsub.f32 %v4300_v61, %v3268_v49  ;;  %v1860_v50 = vmul.f32 %v1828_v1, %v1828_v1  ;;  %v5455_v45 = vld [vmem:[#allocation8_spill] sm:$0xff] }
 0x256   : > { %v1981_v58 = vmul.f32 %v1949_v2, %v4234_v60  ;;  %v2109_v39 = vmul.f32 %v2077_v6, %v5454_v44  ;;  %v1451_v22 = vmul.f32 0.6931472, %v3151_v5  ;;  %3156 = vlog2.f32 %v1409_v7  ;;  %v3269_v5 = vld [vmem:[%s3452_s19 + $0x80] sm:$0xff] }
 0x257   : > { %v4336_v27 = vsub.f32 %v4050_v26, %v4328_v11  ;;  %v5456_v55 = vsub.f32 %v3471_v17, %v5455_v45  ;;  %v1366_v43 = vmul.f32 1.442695, %v1316_v13  ;;  %v2212_v44 = vand.u32 2147483647, %v2180_v19 }
 0x258   : > { %v2013_v32 = vmul.f32 %v1981_v58, %v5455_v45  ;;  %v4346_v49 = vadd.f32 %v1451_v22, %v1246_v37  ;;  %v2575_v26 = vadd.f32 %v4163_v4, %v2573_v57  ;;  %v4351_v10 = vadd.f32 %v4296_v34, %v3926_v3 }
 0x259   : > { %v2141_v60 = vmul.f32 %v2109_v39, %v5456_v55  ;;  %v1614_v48 = vmul.f32 1.442695, %v4336_v27  ;;  %v4353_v1 = vmul.f32 %v1855_v46, %v1855_v46  ;;  %3158 = vpow2.f32 %v1366_v43 }
 0x25a   : > { %v2244_v39 = vmul.f32 %v2212_v44, %v1215_v62  ;;  %v4358_v2 = vsub.f32 %v4181_v29, %v4346_v49  ;;  %v4360_v37 = vmul.f32 %v1860_v50, %v1860_v50  ;;  %v2885_v4 = vpack.c.bf16 %v4351_v10, %v4351_v10 }
 0x25b   : > { %3160 = vpow2.f32 %v1614_v48  ;;  %v3153_v3 = vpop.eup %3152  ;;  %v4365_v57 = vsel %vm2258_vm5, %v2013_v32, 0.0  ;;  %v1568_v46 = vsub.f32 0.0, %v4328_v11  ;;  %v4369_v6 = vsel %vm2258_vm5, %v1215_v62, 0.0 }
 0x25c   : > { %v1282_v40 = vand.u32 2147483647, %v4351_v10  ;;  %v4373_v29 = vsel %vm2258_vm5, %v2141_v60, 0.0  ;;  %v1610_v7 = vmul.f32 1.442695, %v4358_v2  ;;  %v1407_v13 = vadd.f32 1.0, %v3153_v3 }
 0x25d   : > { %1149 = vst.msk [vmem:[%s3762_s29 + $0x40] sm:$0xf] %vm1132_vm6, %v2885_v4  ;;  %v2178_v19 = vsub.f32 %v4351_v10, %v3269_v5  ;;  %v1566_v11 = vsub.f32 0.0, %v4346_v49  ;;  %v4382_v62 = vsel %vm2258_vm5, %v2244_v39, 0.0  ;;  %v2505_v45 = vadd.f32 %v4312_v12, %v2503_v21  ;;  %v1213_v60 = vld [vmem:[%s3553_s22 + $0x80] sm:$0xff] }
 0x25e   : > { %v3155_v22 = vpop.eup %3154  ;;  %v1314_v50 = vsub.f32 0.0, %v1282_v40  ;;  %3162 = vpow2.f32 %v1610_v7  ;;  %v1826_v48 = vsub.f32 1.0, %v3269_v5  ;;  %v4391_v40 = vadd.f32 %v4296_v34, %v3931_v28  ;;  %v5458_v5 = vld [vmem:[#allocation23_spill] sm:$0xff] }
 0x25f   : > { %v1915_v32 = vsub.f32 1.0, %v3155_v22  ;;  %v2043_v55 = vmul.f32 %v3155_v22, %v3155_v22  ;;  %3164 = vlog2.f32 %v1407_v13  ;;  %v2210_v4 = vand.u32 2147483647, %v2178_v19 }
 0x260   : > { %v1362_v44 = vmul.f32 1.442695, %v1314_v50  ;;  %v3157_v3 = vpop.eup %3156  ;;  %v2577_v7 = vadd.f32 %v4291_v30, %v2575_v26  ;;  %v2888_v22 = vpack.c.bf16 %v4391_v40, %v4391_v40  ;;  %v1285_v30 = vand.u32 2147483647, %v4391_v40 }
 0x261   : > { %v1947_v58 = vmul.f32 %v1915_v32, %v1915_v32  ;;  %v2075_v59 = vmul.f32 %v2043_v55, %v1563_v0  ;;  %v1457_v12 = vmul.f32 0.6931472, %v3157_v3  ;;  %v2242_v21 = vmul.f32 %v2210_v4, %v1213_v60  ;;  %v4414_v3 = vld [vmem:[%s3452_s19 + $0x98] sm:$0xff] }
 0x262   : > { %3166 = vpow2.f32 %v1362_v44  ;;  %v2578_v0 = vsel %vm2258_vm5, %v1213_v60, 0.0  ;;  %v1858_v32 = vmul.f32 %v1826_v48, %v1826_v48  ;;  %v5459_v44 = vld [vmem:[#allocation6_spill] sm:$0xff]  ;;  %1152 = vst.msk [vmem:[%s3762_s29 + $0x4c] sm:$0xf] %vm1132_vm6, %v2888_v22  ;;  %vm1669_vm8 = vcmp.eq.f32.partialorder %v4414_v3, 1.0 }
 0x263   : > { %v1979_v13 = vmul.f32 %v1947_v58, %v4309_v18  ;;  %v2107_v19 = vmul.f32 %v2075_v59, %v5458_v5  ;;  %v3159_v50 = vpop.eup %3158  ;;  %v4401_v28 = vadd.f32 %v1457_v12, %v1249_v56  ;;  %v2506_v55 = vsel %vm2258_vm5, %v2242_v21, 0.0 }
 0x264   : > { %v5460_v59 = vsub.f32 %v3471_v17, %v5459_v44  ;;  %v1412_v60 = vadd.f32 1.0, %v3159_v50  ;;  %v4409_v4 = vadd.f32 %v2506_v55, %v2505_v45  ;;  %v1317_v5 = vsub.f32 0.0, %v1285_v30 }
 0x265   : > { %v3161_v26 = vpop.eup %3160  ;;  %v2011_v18 = vmul.f32 %v1979_v13, %v5459_v44  ;;  %v4418_v12 = vsub.f32 %v4218_v23, %v4401_v28  ;;  %v4426_v44 = vadd.f32 %v2578_v0, %v2577_v7 }
 0x266   : > { %v2139_v58 = vmul.f32 %v2107_v19, %v5460_v59  ;;  %v1920_v56 = vsub.f32 1.0, %v3161_v26  ;;  %v2048_v48 = vmul.f32 %v3161_v26, %v3161_v26  ;;  %3168 = vlog2.f32 %v1412_v60 }
 0x267   : > { %v2276_v21 = vsel %vm2258_vm5, %v2011_v18, 0.0  ;;  %v1616_v26 = vmul.f32 1.442695, %v4418_v12  ;;  %v1368_v23 = vmul.f32 1.442695, %v1317_v5  ;;  %v5461_v59 = vmov 0.0  }
 0x268   : > { %v2348_v13 = vsel %vm2258_vm5, %v2139_v58, 0.0  ;;  %v2277_v45 = vadd.f32 %v2276_v21, %v4269_v31  ;;  %v1952_v22 = vmul.f32 %v1920_v56, %v1920_v56  ;;  %v2080_v50 = vmul.f32 %v2048_v48, %v1568_v46  ;;  %v3163_v55 = vpop.eup %3162  ;;  %v5462_v48 = vld [vmem:[#allocation12_spill] sm:$0xff] }
 0x269   : > { %v2349_v19 = vadd.f32 %v2348_v13, %v4271_v36  ;;  %v2854_v39 = vsel %vm1669_vm8, 1.0, %v5461_v59  ;;  %v3165_v43 = vpop.eup %3164  ;;  %v1918_v36 = vsub.f32 1.0, %v3163_v55  ;;  %v2046_v60 = vmul.f32 %v3163_v55, %v3163_v55  ;;  %v1182_v55 = vld [vmem:[%s3452_s19 + $0x88] sm:$0xff] }
 0x26a   : > { %v2279_v18 = vadd.f32 %v4249_v51, %v2277_v45  ;;  %v1984_v30 = vmul.f32 %v1952_v22, %v4336_v27  ;;  %v2112_v31 = vmul.f32 %v2080_v50, %v4160_v16  ;;  %3170 = vpow2.f32 %v1616_v26 }
 0x26b   : > { %v2351_v58 = vadd.f32 %v4260_v25, %v2349_v19  ;;  %v1453_v46 = vmul.f32 0.6931472, %v3165_v43  ;;  %v5463_v0 = vsub.f32 %v3471_v17, %v5462_v48  ;;  %v1950_v25 = vmul.f32 %v1918_v36, %v1918_v36 }
 0x26c   : > { %v3167_v56 = vpop.eup %3166  ;;  %v2016_v7 = vmul.f32 %v1984_v30, %v5462_v48  ;;  %v2281_v13 = vadd.f32 %v4365_v57, %v2279_v18  ;;  %v2078_v16 = vmul.f32 %v2046_v60, %v1566_v11  ;;  %v5464_v27 = vmax.f32 %v4267_v41, 0.0  ;;  %v1216_v18 = vld [vmem:[%s3553_s22 + $0x98] sm:$0xff] }
 0x26d   : > { %v2144_v21 = vmul.f32 %v2112_v31, %v5463_v0  ;;  %v2353_v51 = vadd.f32 %v4373_v29, %v2351_v58  ;;  %v1410_v43 = vadd.f32 1.0, %v3167_v56  ;;  %v1569_v45 = vsub.f32 0.0, %v4401_v28 }
 0x26e   : > { %v4443_v5 = vadd.f32 %v1453_v46, %v5464_v27  ;;  %v4446_v19 = vmul.f32 %v1858_v32, %v1858_v32  ;;  %v1253_v22 = vmax.f32 %v4391_v40, 0.0  ;;  %3172 = vpow2.f32 %v1368_v23 }
 0x26f   : > { %v1982_v57 = vmul.f32 %v1950_v25, %v4358_v2  ;;  %v2110_v29 = vmul.f32 %v2078_v16, %v4230_v20  ;;  %v4456_v11 = vmul.f32 %v2854_v39, %v3471_v17  ;;  %v4459_v50 = vsel %vm2258_vm5, %v2016_v7, 0.0 }
 0x270   : > { %v4453_v49 = vsub.f32 %v4267_v41, %v4443_v5  ;;  %3174 = vlog2.f32 %v1410_v43  ;;  %v1829_v28 = vsub.f32 1.0, %v4414_v3  ;;  %v2181_v32 = vsub.f32 %v4391_v40, %v4414_v3  ;;  %v3169_v2 = vpop.eup %3168  ;;  %v5466_v3 = vld [vmem:[#allocation26_spill] sm:$0xff] }
 0x271   : > { %v4466_v20 = vsel %vm2258_vm5, %v2144_v21, 0.0  ;;  %v2014_v41 = vmul.f32 %v1982_v57, %v5444_v14  ;;  %v5465_v39 = vsub.f32 %v3471_v17, %v5444_v14  ;;  %v1463_v58 = vmul.f32 0.6931472, %v3169_v2 }
 0x272   : > { %v1612_v23 = vmul.f32 1.442695, %v4453_v49  ;;  %v1797_v30 = vsub.f32 %v3471_v17, %v4456_v11  ;;  %v2213_v31 = vand.u32 2147483647, %v2181_v32  ;;  %v4478_v36 = vadd.f32 %v4296_v34, %v5466_v3 }
 0x273   : > { %v2142_v26 = vmul.f32 %v2110_v29, %v5465_v39  ;;  %v2282_v60 = vsel %vm2258_vm5, %v2014_v41, 0.0  ;;  %vm1667_vm9 = vcmp.eq.f32.partialorder %v1182_v55, 1.0  ;;  %v5467_v48 = vmax.f32 %v4300_v61, 0.0 }
 0x274   : > { %3176 = vpow2.f32 %v1612_v23  ;;  %v4482_v14 = vadd.f32 %v2282_v60, %v2281_v13  ;;  %v2245_v0 = vmul.f32 %v2213_v31, %v1216_v18  ;;  %v3171_v21 = vpop.eup %3170  ;;  %v1861_v25 = vmul.f32 %v1829_v28, %v1829_v28  ;;  %v1214_v60 = vld [vmem:[%s3553_s22 + $0x88] sm:$0xff] }
 0x275   : > { %v2354_v46 = vsel %vm2258_vm5, %v2142_v26, 0.0  ;;  %v4488_v7 = vadd.f32 %v1463_v58, %v5467_v48  ;;  %v2886_v16 = vpack.c.bf16 %v4478_v36, %v4478_v36  ;;  %v1283_v27 = vand.u32 2147483647, %v4478_v36 }
 0x276   : > { %v4484_v56 = vadd.f32 %v2354_v46, %v2353_v51  ;;  %v2852_v43 = vsel %vm1667_vm9, 1.0, %v5461_v59  ;;  %v1921_v57 = vsub.f32 1.0, %v3171_v21  ;;  %v2049_v29 = vmul.f32 %v3171_v21, %v3171_v21 }
 0x277   : > { %v1567_v13 = vsub.f32 0.0, %v4443_v5  ;;  %v4497_v51 = vsub.f32 %v4300_v61, %v4488_v7  ;;  %v4501_v32 = vsel %vm2258_vm5, %v4456_v11, 0.0  ;;  %1150 = vst.msk [vmem:[%s3762_s29 + $0x44] sm:$0xf] %vm1132_vm6, %v2886_v16  ;;  %v1315_v28 = vsub.f32 0.0, %v1283_v27 }
 0x278   : > { %v4506_v2 = vmul.f32 %v2852_v43, %v3471_v17  ;;  %v1827_v41 = vsub.f32 1.0, %v1182_v55  ;;  %v3173_v39 = vpop.eup %3172  ;;  %v1953_v26 = vmul.f32 %v1921_v57, %v1921_v57  ;;  %v2081_v23 = vmul.f32 %v2049_v29, %v1569_v45 }
 0x279   : > { %v1622_v5 = vmul.f32 1.442695, %v4497_v51  ;;  %v2179_v58 = vsub.f32 %v4478_v36, %v1182_v55  ;;  %v1413_v61 = vadd.f32 1.0, %v3173_v39  ;;  %v4510_v31 = vmul.f32 %v1861_v25, %v1861_v25 }
 0x27a   : > { %v4513_v3 = vsel %vm2258_vm5, %v1216_v18, 0.0  ;;  %v1364_v46 = vmul.f32 1.442695, %v1315_v28  ;;  %v3175_v48 = vpop.eup %3174  ;;  %v1985_v21 = vmul.f32 %v1953_v26, %v4418_v12  ;;  %v2113_v16 = vmul.f32 %v2081_v23, %v4302_v8  ;;  %v5470_v26 = vld [vmem:[#allocation27_spill] sm:$0xff] }
 0x27b   : > { %3178 = vpow2.f32 %v1622_v5  ;;  %v2211_v27 = vand.u32 2147483647, %v2179_v58  ;;  %v1459_v45 = vmul.f32 0.6931472, %v3175_v48  ;;  %v1859_v43 = vmul.f32 %v1827_v41, %v1827_v41  ;;  %v5471_v48 = vld [vmem:[#allocation24_spill] sm:$0xff] }
 0x27c   : > { %3180 = vlog2.f32 %v1413_v61  ;;  %v2436_v55 = vsel %vm2258_vm5, %v4506_v2, 0.0  ;;  %v2017_v25 = vmul.f32 %v1985_v21, %v5450_v53  ;;  %v5468_v18 = vsub.f32 %v3471_v17, %v5450_v53 }
 0x27d   : > { %3182 = vpow2.f32 %v1364_v46  ;;  %v2243_v29 = vmul.f32 %v2211_v27, %v1214_v60  ;;  %v1572_v12 = vsub.f32 0.0, %v4488_v7  ;;  %v5469_v8 = vmax.f32 %v4351_v10, 0.0 }
 0x27e   : > { %v2145_v57 = vmul.f32 %v2113_v16, %v5468_v18  ;;  %v3177_v28 = vpop.eup %3176  ;;  %v1251_v41 = vmax.f32 %v4478_v36, 0.0  ;;  %v4532_v23 = vadd.f32 %v4296_v34, %v5470_v26  ;;  %v4535_v53 = vsel %vm2258_vm5, %v2245_v0, 0.0 }
 0x27f   : > { %v4527_v39 = vadd.f32 %v1459_v45, %v5469_v8  ;;  %v1919_v5 = vsub.f32 1.0, %v3177_v28  ;;  %v2047_v58 = vmul.f32 %v3177_v28, %v3177_v28  ;;  %v1795_v61 = vsub.f32 %v3471_v17, %v4506_v2  ;;  %v1187_v28 = vld [vmem:[%s3452_s19 + $0xb0] sm:$0xff] }
 0x280   : > { %v4543_v46 = vmul.f32 %v1859_v43, %v1859_v43  ;;  %v4546_v21 = vadd.f32 %v2436_v55, %v5471_v48  ;;  %v2508_v16 = vsel %vm2258_vm5, %v2243_v29, 0.0  ;;  %v2891_v18 = vpack.c.bf16 %v4532_v23, %v4532_v23 }
 0x281   : > { %v4541_v7 = vsub.f32 %v4351_v10, %v4527_v39  ;;  %v1951_v27 = vmul.f32 %v1919_v5, %v1919_v5  ;;  %v2079_v45 = vmul.f32 %v2047_v58, %v1567_v13  ;;  %v2509_v0 = vadd.f32 %v2508_v16, %v4409_v4 }
 0x282   : > { %v2288_v8 = vsel %vm2258_vm5, %v2017_v25, 0.0  ;;  %v2580_v43 = vsel %vm2258_vm5, %v1214_v60, 0.0  ;;  %v1288_v26 = vand.u32 2147483647, %v4532_v23  ;;  %v2360_v55 = vsel %vm2258_vm5, %v2145_v57, 0.0 }
 0x283   : > { %v1618_v10 = vmul.f32 1.442695, %v4541_v7  ;;  %v1983_v29 = vmul.f32 %v1951_v27, %v4453_v49  ;;  %v2111_v13 = vmul.f32 %v2079_v45, %v4353_v1  ;;  %v4561_v4 = vadd.f32 %v4382_v62, %v2509_v0  ;;  %1155 = vst.msk [vmem:[%s3762_s29 + $0x58] sm:$0xf] %vm1132_vm6, %v2891_v18 }
 0x284   : > { %v1570_v5 = vsub.f32 0.0, %v4527_v39  ;;  %v1320_v25 = vsub.f32 0.0, %v1288_v26  ;;  %vm1672_vm10 = vcmp.eq.f32.partialorder %v1187_v28, 1.0  ;;  %v5472_v57 = vsub.f32 %v3471_v17, %v5452_v38 }
 0x285   : > { %3184 = vpow2.f32 %v1618_v10  ;;  %v3179_v58 = vpop.eup %3178  ;;  %v2015_v60 = vmul.f32 %v1983_v29, %v5452_v38  ;;  %v1832_v49 = vsub.f32 1.0, %v1187_v28  ;;  %v2184_v1 = vsub.f32 %v4532_v23, %v1187_v28 }
 0x286   : > { %v2143_v48 = vmul.f32 %v2111_v13, %v5472_v57  ;;  %v3181_v16 = vpop.eup %3180  ;;  %v1924_v62 = vsub.f32 1.0, %v3179_v58  ;;  %v2052_v27 = vmul.f32 %v3179_v58, %v3179_v58  ;;  %v2581_v45 = vadd.f32 %v2580_v43, %v4426_v44 }
 0x287   : > { %v1374_v0 = vmul.f32 1.442695, %v1320_v25  ;;  %v3183_v39 = vpop.eup %3182  ;;  %v2284_v18 = vsel %vm2258_vm5, %v2015_v60, 0.0  ;;  %v1465_v26 = vmul.f32 0.6931472, %v3181_v16  ;;  %v2857_v29 = vsel %vm1672_vm10, 1.0, %v5461_v59 }
 0x288   : > { %v2356_v10 = vsel %vm2258_vm5, %v2143_v48, 0.0  ;;  %v2285_v38 = vadd.f32 %v2284_v18, %v4482_v14  ;;  %v1956_v28 = vmul.f32 %v1924_v62, %v1924_v62  ;;  %v2084_v57 = vmul.f32 %v2052_v27, %v1572_v12  ;;  %v1219_v16 = vld [vmem:[%s3553_s22 + $0xb0] sm:$0xff]  ;;  %v1185_v62 = vld [vmem:[%s3452_s19 + $0xa0] sm:$0xff] }
 0x289   : > { %v2357_v13 = vadd.f32 %v2356_v10, %v4484_v56  ;;  %v4579_v44 = vadd.f32 %v1465_v26, %v1253_v22  ;;  %v1411_v43 = vadd.f32 1.0, %v3183_v39  ;;  %3186 = vpow2.f32 %v1374_v0  ;;  %v5475_v39 = vld [vmem:[#allocation28_spill] sm:$0xff] }
 0x28a   : > { %v1864_v25 = vmul.f32 %v1832_v49, %v1832_v49  ;;  %v2287_v58 = vadd.f32 %v4459_v50, %v2285_v38  ;;  %v1988_v48 = vmul.f32 %v1956_v28, %v4497_v51  ;;  %v2116_v14 = vmul.f32 %v2084_v57, %v4360_v37 }
 0x28b   : > { %v2359_v60 = vadd.f32 %v4466_v20, %v2357_v13  ;;  %v4588_v56 = vsub.f32 %v4391_v40, %v4579_v44  ;;  %3188 = vlog2.f32 %v1411_v43  ;;  %v4591_v22 = vmul.f32 %v2857_v29, %v3471_v17 }
 0x28c   : > { %v2216_v12 = vand.u32 2147483647, %v2184_v1  ;;  %v2020_v49 = vmul.f32 %v1988_v48, %v5453_v33  ;;  %v5474_v50 = vsub.f32 %v3471_v17, %v5453_v33  ;;  %v2289_v51 = vadd.f32 %v2288_v8, %v2287_v58 }
 0x28d   : > { %5473 = vst [vmem:[#allocation13_spill] sm:$0xff] %v4591_v22  ;;  %v2361_v27 = vadd.f32 %v2360_v55, %v2359_v60  ;;  %v1624_v37 = vmul.f32 1.442695, %v4588_v56  ;;  %v2583_v0 = vadd.f32 %v4369_v6, %v2581_v45  ;;  %v4602_v18 = vadd.f32 %v4296_v34, %v5475_v39 }
 0x28e   : > { %v2148_v20 = vmul.f32 %v2116_v14, %v5474_v50  ;;  %v2248_v40 = vmul.f32 %v2216_v12, %v1219_v16  ;;  %v1256_v1 = vmax.f32 %v4532_v23, 0.0  ;;  %v4607_v33 = vmul.f32 %v1864_v25, %v1864_v25 }
 0x28f   : > { %v3185_v10 = vpop.eup %3184  ;;  %vm1670_vm11 = vcmp.eq.f32.partialorder %v1185_v62, 1.0  ;;  %v1573_v29 = vsub.f32 0.0, %v4579_v44  ;;  %3190 = vpow2.f32 %v1624_v37  ;;  %v4611_v6 = vsel %vm2258_vm5, %v2020_v49, 0.0  ;;  %v1217_v49 = vld [vmem:[%s3553_s22 + $0xa0] sm:$0xff] }
 0x290   : > { %v1922_v8 = vsub.f32 1.0, %v3185_v10  ;;  %v2050_v55 = vmul.f32 %v3185_v10, %v3185_v10  ;;  %v4614_v45 = vsel %vm2258_vm5, %v1219_v16, 0.0  ;;  %v2889_v38 = vpack.c.bf16 %v4602_v18, %v4602_v18 }
 0x291   : > { %5476 = vst [vmem:[#allocation4_spill] sm:$0xff] %v4614_v45  ;;  %v1286_v13 = vand.u32 2147483647, %v4602_v18  ;;  %v2855_v43 = vsel %vm1670_vm11, 1.0, %v5461_v59  ;;  %v1830_v25 = vsub.f32 1.0, %v1185_v62  ;;  %v4621_v44 = vsel %vm2258_vm5, %v2148_v20, 0.0 }
 0x292   : > { %v1954_v28 = vmul.f32 %v1922_v8, %v1922_v8  ;;  %v2082_v57 = vmul.f32 %v2050_v55, %v1570_v5  ;;  %5477 = vst [vmem:[#allocation25_spill] sm:$0xff] %v4621_v44  ;;  %1153 = vst.msk [vmem:[%s3762_s29 + $0x50] sm:$0xf] %vm1132_vm6, %v2889_v38  ;;  %v2182_v60 = vsub.f32 %v4602_v18, %v1185_v62  ;;  %v4631_v5 = vsel %vm2258_vm5, %v2248_v40, 0.0  ;;  %v5479_v40 = vld [vmem:[#allocation29_spill] sm:$0xff]  ;;  %v4959_v45 = vld [vmem:[%s3452_s19 + $0xf0] sm:$0xff] }
 0x293   : > { %v1318_v58 = vsub.f32 0.0, %v1286_v13  ;;  %v2513_v48 = vadd.f32 %v4535_v53, %v4561_v4  ;;  %v3187_v14 = vpop.eup %3186  ;;  %v1254_v50 = vmax.f32 %v4602_v18, 0.0  ;;  %v4636_v39 = vmul.f32 %v2855_v43, %v3471_v17  ;;  %5500 = vst [vmem:[#allocation16_spill] sm:$0xff] %v4959_v45 }
 0x294   : > { %v1986_v16 = vmul.f32 %v1954_v28, %v4541_v7  ;;  %v2114_v12 = vmul.f32 %v2082_v57, %v4446_v19  ;;  %v1416_v20 = vadd.f32 1.0, %v3187_v14  ;;  %v2214_v62 = vand.u32 2147483647, %v2182_v60  ;;  %v1188_v14 = vld [vmem:[%s3452_s19 + $0xb8] sm:$0xff] }
 0x295   : > { %v1370_v37 = vmul.f32 1.442695, %v1318_v58  ;;  %v3189_v10 = vpop.eup %3188  ;;  %v5478_v7 = vsub.f32 %v3471_v17, %v5457_v52  ;;  %v1862_v4 = vmul.f32 %v1830_v25, %v1830_v25  ;;  %v4644_v8 = vadd.f32 %v4296_v34, %v5479_v40  ;;  %v1220_v40 = vld [vmem:[%s3553_s22 + $0xb8] sm:$0xff] }
 0x296   : > { %v2018_v53 = vmul.f32 %v1986_v16, %v5457_v52  ;;  %v1461_v55 = vmul.f32 0.6931472, %v3189_v10  ;;  %3192 = vlog2.f32 %v1416_v20  ;;  %v2246_v38 = vmul.f32 %v2214_v62, %v1217_v49 }
 0x297   : > { %v2146_v19 = vmul.f32 %v2114_v12, %v5478_v7  ;;  %v2585_v13 = vadd.f32 %v4513_v3, %v2583_v0  ;;  %3194 = vpow2.f32 %v1370_v37  ;;  %v2892_v52 = vpack.c.bf16 %v4644_v8, %v4644_v8 }
 0x298   : > { %v2290_v28 = vsel %vm2258_vm5, %v2018_v53, 0.0  ;;  %v4657_v58 = vadd.f32 %v1461_v55, %v1251_v41  ;;  %v2514_v60 = vsel %vm2258_vm5, %v2246_v38, 0.0  ;;  %v2586_v12 = vsel %vm2258_vm5, %v1217_v49, 0.0  ;;  %v1186_v55 = vld [vmem:[%s3452_s19 + $0xa8] sm:$0xff] }
 0x299   : > { %v2362_v57 = vsel %vm2258_vm5, %v2146_v19, 0.0  ;;  %v4651_v43 = vadd.f32 %v2290_v28, %v2289_v51  ;;  %v3191_v3 = vpop.eup %3190  ;;  %v4663_v16 = vadd.f32 %v2514_v60, %v2513_v48  ;;  %1156 = vst.msk [vmem:[%s3762_s29 + $0x5c] sm:$0xf] %vm1132_vm6, %v2892_v52  ;;  %v1289_v51 = vand.u32 2147483647, %v4644_v8 }
 0x29a   : > { %v4653_v25 = vadd.f32 %v2362_v57, %v2361_v27  ;;  %v1925_v27 = vsub.f32 1.0, %v3191_v3  ;;  %v2053_v41 = vmul.f32 %v3191_v3, %v3191_v3  ;;  %v4671_v20 = vsub.f32 %v4478_v36, %v4657_v58  ;;  %v5480_v57 = vld [vmem:[#allocation30_spill] sm:$0xff] }
 0x29b   : > { %vm1673_vm12 = vcmp.eq.f32.partialorder %v1188_v14, 1.0  ;;  %v4673_v37 = vmul.f32 %v1862_v4, %v1862_v4  ;;  %v1321_v62 = vsub.f32 0.0, %v1289_v51  ;;  %v1833_v48 = vsub.f32 1.0, %v1188_v14 }
 0x29c   : > { %v2185_v10 = vsub.f32 %v4644_v8, %v1188_v14  ;;  %v1957_v53 = vmul.f32 %v1925_v27, %v1925_v27  ;;  %v2085_v49 = vmul.f32 %v2053_v41, %v1573_v29  ;;  %v1620_v7 = vmul.f32 1.442695, %v4671_v20 }
 0x29d   : > { %v4677_v19 = vadd.f32 %v2586_v12, %v2585_v13  ;;  %v1376_v38 = vmul.f32 1.442695, %v1321_v62  ;;  %v2858_v28 = vsel %vm1673_vm12, 1.0, %v5461_v59  ;;  %v4684_v4 = vadd.f32 %v4296_v34, %v5480_v57 }
 0x29e   : > { %v2217_v36 = vand.u32 2147483647, %v2185_v10  ;;  %v1989_v52 = vmul.f32 %v1957_v53, %v4588_v56  ;;  %v2117_v60 = vmul.f32 %v2085_v49, %v4510_v31  ;;  %3196 = vpow2.f32 %v1620_v7 }
 0x29f   : > { %v1865_v29 = vmul.f32 %v1833_v48, %v1833_v48  ;;  %3198 = vpow2.f32 %v1376_v38  ;;  %v2890_v14 = vpack.c.bf16 %v4684_v4, %v4684_v4  ;;  %vm1671_vm13 = vcmp.eq.f32.partialorder %v1186_v55, 1.0 }
 0x2a0   : > { %v2249_v13 = vmul.f32 %v2217_v36, %v1220_v40  ;;  %v3193_v3 = vpop.eup %3192  ;;  %v2021_v12 = vmul.f32 %v1989_v52, %v4456_v11  ;;  %v2149_v51 = vmul.f32 %v2117_v60, %v1797_v30  ;;  %v1287_v31 = vand.u32 2147483647, %v4684_v4 }
 0x2a1   : > { %v3195_v27 = vpop.eup %3194  ;;  %v1571_v41 = vsub.f32 0.0, %v4657_v58  ;;  %v1471_v62 = vmul.f32 0.6931472, %v3193_v3  ;;  %v4698_v48 = vmul.f32 %v2858_v28, %v3471_v17  ;;  %1154 = vst.msk [vmem:[%s3762_s29 + $0x54] sm:$0xf] %vm1132_vm6, %v2890_v14  ;;  %v1831_v10 = vsub.f32 1.0, %v1186_v55 }
 0x2a2   : > { %v1414_v53 = vadd.f32 1.0, %v3195_v27  ;;  %v4702_v49 = vmul.f32 %v1865_v29, %v1865_v29  ;;  %v1319_v11 = vsub.f32 0.0, %v1287_v31  ;;  %v2856_v30 = vsel %vm1671_vm13, 1.0, %v5461_v59  ;;  %v1218_v29 = vld [vmem:[%s3553_s22 + $0xa8] sm:$0xff] }
 0x2a3   : > { %v4707_v7 = vadd.f32 %v1471_v62, %v1256_v1  ;;  %v4710_v58 = vsel %vm2258_vm5, %v2249_v13, 0.0  ;;  %v2183_v38 = vsub.f32 %v4684_v4, %v1186_v55  ;;  %v1863_v36 = vmul.f32 %v1831_v10, %v1831_v10  ;;  %v4733_v13 = vld [vmem:[%s3452_s19 + $0xd0] sm:$0xff] }
 0x2a4   : > { %3200 = vlog2.f32 %v1414_v53  ;;  %v1372_v28 = vmul.f32 1.442695, %v1319_v11  ;;  %v4716_v57 = vadd.f32 %v4296_v34, %v4098_v35  ;;  %v4719_v52 = vsel %vm2258_vm5, %v2021_v12, 0.0 }
 0x2a5   : > { %v4722_v1 = vsel %vm2258_vm5, %v2149_v51, 0.0  ;;  %v4726_v60 = vsub.f32 %v4532_v23, %v4707_v7  ;;  %v4730_v55 = vmul.f32 %v2856_v30, %v3471_v17  ;;  %v2215_v35 = vand.u32 2147483647, %v2183_v38 }
 0x2a6   : > { %5481 = vst [vmem:[#allocation15_spill] sm:$0xff] %v4722_v1  ;;  %3202 = vpow2.f32 %v1372_v28  ;;  %v2588_v14 = vsel %vm2258_vm5, %v1218_v29, 0.0  ;;  %v2895_v3 = vpack.c.bf16 %v4716_v57, %v4716_v57  ;;  %v1576_v12 = vsub.f32 0.0, %v4707_v7 }
 0x2a7   : > { %v1630_v51 = vmul.f32 1.442695, %v4726_v60  ;;  %v1292_v31 = vand.u32 2147483647, %v4716_v57  ;;  %v4743_v62 = vmul.f32 %v1863_v36, %v1863_v36  ;;  %v2247_v10 = vmul.f32 %v2215_v35, %v1218_v29  ;;  %v1189_v35 = vld [vmem:[%s3452_s19 + $0xc0] sm:$0xff] }
 0x2a8   : > { %v3197_v27 = vpop.eup %3196  ;;  %1159 = vst.msk [vmem:[%s3762_s29 + $0x68] sm:$0xf] %vm1132_vm6, %v2895_v3  ;;  %v2188_v53 = vsub.f32 %v4716_v57, %v4733_v13  ;;  %v4751_v11 = vadd.f32 %v4296_v34, %v4108_v15  ;;  %v4755_v36 = vadd.f32 %v2588_v14, %v4677_v19  ;;  %v1836_v29 = vsub.f32 1.0, %v4733_v13 }
 0x2a9   : > { %v3199_v30 = vpop.eup %3198  ;;  %v1923_v38 = vsub.f32 1.0, %v3197_v27  ;;  %v2051_v28 = vmul.f32 %v3197_v27, %v3197_v27  ;;  %3204 = vpow2.f32 %v1630_v51  ;;  %v1324_v26 = vsub.f32 0.0, %v1292_v31 }
 0x2aa   : > { %v1417_v23 = vadd.f32 1.0, %v3199_v30  ;;  %v2516_v0 = vsel %vm2258_vm5, %v2247_v10, 0.0  ;;  %5482 = vst [vmem:[#allocation10_spill] sm:$0xff] %v4755_v36  ;;  %v2893_v31 = vpack.c.bf16 %v4751_v11, %v4751_v11  ;;  %v1290_v27 = vand.u32 2147483647, %v4751_v11  ;;  %v4782_v30 = vld [vmem:[%s3553_s22 + $0xc0] sm:$0xff] }
 0x2ab   : > { %v1955_v3 = vmul.f32 %v1923_v38, %v1923_v38  ;;  %v2083_v40 = vmul.f32 %v2051_v28, %v1571_v41  ;;  %v4760_v15 = vadd.f32 %v2516_v0, %v4663_v16  ;;  %v1382_v56 = vmul.f32 1.442695, %v1324_v26  ;;  %5484 = vst [vmem:[#allocation17_spill] sm:$0xff] %v4782_v30 }
 0x2ac   : > { %3206 = vlog2.f32 %v1417_v23  ;;  %vm1674_vm14 = vcmp.eq.f32.partialorder %v1189_v35, 1.0  ;;  %v4768_v10 = vmul.f32 %v1836_v29, %v1836_v29  ;;  %1157 = vst.msk [vmem:[%s3762_s29 + $0x60] sm:$0xf] %vm1132_vm6, %v2893_v31  ;;  %v1322_v26 = vsub.f32 0.0, %v1290_v27 }
 0x2ad   : > { %v1987_v19 = vmul.f32 %v1955_v3, %v4671_v20  ;;  %v2115_v14 = vmul.f32 %v2083_v40, %v4543_v46  ;;  %3208 = vpow2.f32 %v1382_v56  ;;  %v2186_v0 = vsub.f32 %v4751_v11, %v1189_v35 }
 0x2ae   : > { %v3201_v41 = vpop.eup %3200  ;;  %5483 = vst [vmem:[#allocation3_spill] sm:$0xff] %v4768_v10  ;;  %v4775_v16 = vadd.f32 %v4296_v34, %v4127_v9  ;;  %v1834_v56 = vsub.f32 1.0, %v1189_v35  ;;  %v1378_v38 = vmul.f32 1.442695, %v1322_v26  ;;  %v4788_v9 = vadd.f32 %v4296_v34, %v4165_v54  ;;  %v4805_v54 = vld [vmem:[%s3452_s19 + $0xd8] sm:$0xff] }
 0x2af   : > { %v2019_v23 = vmul.f32 %v1987_v19, %v4506_v2  ;;  %v2147_v46 = vmul.f32 %v2115_v14, %v1795_v61  ;;  %v1467_v20 = vmul.f32 0.6931472, %v3201_v41  ;;  %v2218_v28 = vand.u32 2147483647, %v2186_v0  ;;  %5486 = vst [vmem:[#allocation9_spill] sm:$0xff] %v4805_v54 }
 0x2b0   : > { %v3203_v40 = vpop.eup %3202  ;;  %v2896_v29 = vpack.c.bf16 %v4775_v16, %v4775_v16  ;;  %v4800_v14 = vand.u32 2147483647, %v2188_v53  ;;  %3210 = vpow2.f32 %v1378_v38  ;;  %v1291_v35 = vand.u32 2147483647, %v4788_v9 }
 0x2b1   : > { %v2292_v3 = vsel %vm2258_vm5, %v2019_v23, 0.0  ;;  %v2364_v2 = vsel %vm2258_vm5, %v2147_v46, 0.0  ;;  %v4794_v61 = vadd.f32 %v1467_v20, %v1254_v50  ;;  %v1415_v31 = vadd.f32 1.0, %v3203_v40 }
 0x2b2   : > { %v2293_v27 = vadd.f32 %v2292_v3, %v4651_v43  ;;  %v4798_v19 = vadd.f32 %v2364_v2, %v4653_v25  ;;  %1160 = vst.msk [vmem:[%s3762_s29 + $0x6c] sm:$0xf] %vm1132_vm6, %v2896_v29  ;;  %v1866_v50 = vmul.f32 %v1834_v56, %v1834_v56  ;;  %v4812_v0 = vmul.f32 %v2218_v28, %v4782_v30 }
 0x2b3   : > { %v3205_v41 = vpop.eup %3204  ;;  %v4809_v26 = vsub.f32 %v4602_v18, %v4794_v61  ;;  %3212 = vlog2.f32 %v1415_v31  ;;  %v1293_v20 = vand.u32 2147483647, %v4775_v16  ;;  %v2189_v18 = vsub.f32 %v4775_v16, %v4805_v54 }
 0x2b4   : > { %5485 = vst [vmem:[#allocation7_spill] sm:$0xff] %v4798_v19  ;;  %v2295_v43 = vadd.f32 %v4611_v6, %v2293_v27  ;;  %v1928_v25 = vsub.f32 1.0, %v3205_v41  ;;  %v2056_v53 = vmul.f32 %v3205_v41, %v3205_v41  ;;  %v2894_v56 = vpack.c.bf16 %v4788_v9, %v4788_v9 }
 0x2b5   : > { %v1626_v46 = vmul.f32 1.442695, %v4809_v26  ;;  %v4829_v29 = vsel %vm1674_vm14, 1.0, %v5461_v59  ;;  %v4831_v31 = vmul.f32 %v1866_v50, %v1866_v50  ;;  %v1325_v27 = vsub.f32 0.0, %v1293_v20 }
 0x2b6   : > { %v3207_v40 = vpop.eup %3206  ;;  %v1960_v38 = vmul.f32 %v1928_v25, %v1928_v25  ;;  %v2088_v6 = vmul.f32 %v2056_v53, %v1576_v12  ;;  %v4825_v28 = vadd.f32 %v4719_v52, %v2295_v43  ;;  %1158 = vst.msk [vmem:[%s3762_s29 + $0x64] sm:$0xf] %vm1132_vm6, %v2894_v56  ;;  %v4840_v12 = vld [vmem:[%s3452_s19 + $0xc8] sm:$0xff]  ;;  %v1574_v43 = vsub.f32 0.0, %v4794_v61 }
 0x2b7   : > { %v3209_v3 = vpop.eup %3208  ;;  %3214 = vpow2.f32 %v1626_v46  ;;  %v1473_v2 = vmul.f32 0.6931472, %v3207_v40  ;;  %5487 = vst [vmem:[#allocation21_spill] sm:$0xff] %v4831_v31  ;;  %v5489_v25 = vmax.f32 %v4644_v8, 0.0  ;;  %v1384_v53 = vmul.f32 1.442695, %v1325_v27 }
 0x2b8   : > { %v1992_v41 = vmul.f32 %v1960_v38, %v4726_v60  ;;  %v4837_v7 = vmul.f32 %v2088_v6, %v4607_v33  ;;  %v1420_v52 = vadd.f32 1.0, %v3209_v3  ;;  %v1835_v46 = vsub.f32 1.0, %v4840_v12  ;;  %v4860_v40 = vld [vmem:[%s3553_s22 + $0xc8] sm:$0xff] }
 0x2b9   : > { %v4846_v50 = vadd.f32 %v1473_v2, %v5489_v25  ;;  %v1323_v33 = vsub.f32 0.0, %v1291_v35  ;;  %v2187_v20 = vsub.f32 %v4788_v9, %v4840_v12  ;;  %5490 = vst [vmem:[#allocation5_spill] sm:$0xff] %v4860_v40  ;;  %v4865_v27 = vadd.f32 %v4296_v34, %v4199_v24 }
 0x2ba   : > { %5488 = vst [vmem:[#allocation18_spill] sm:$0xff] %v4837_v7  ;;  %v4850_v60 = vmul.f32 %v1992_v41, %v4591_v22  ;;  %3216 = vlog2.f32 %v1420_v52  ;;  %v3211_v6 = vpop.eup %3210  ;;  %v4869_v41 = vadd.f32 %v4296_v34, %v4203_v47  ;;  %v1867_v25 = vmul.f32 %v1835_v46, %v1835_v46  ;;  %v5099_v7 = vld [vmem:[%s3553_s22 + $0xe0] sm:$0xff] }
 0x2bb   : > { %v4856_v56 = vsub.f32 %v4644_v8, %v4846_v50  ;;  %3218 = vpow2.f32 %v1384_v53  ;;  %v1380_v3 = vmul.f32 1.442695, %v1323_v33  ;;  %v2219_v2 = vand.u32 2147483647, %v2187_v20 }
 0x2bc   : > { %v1418_v35 = vadd.f32 1.0, %v3211_v6  ;;  %v4874_v53 = vadd.f32 %v4296_v34, %v4207_v42  ;;  %v2899_v47 = vpack.c.bf16 %v4865_v27, %v4865_v27  ;;  %v4881_v20 = vand.u32 2147483647, %v2189_v18 }
 0x2bd   : > { %v3213_v8 = vpop.eup %3212  ;;  %v1632_v52 = vmul.f32 1.442695, %v4856_v56  ;;  %3220 = vpow2.f32 %v1380_v3  ;;  %v4877_v24 = vmul.f32 %v2219_v2, %v4860_v40  ;;  %v1296_v38 = vand.u32 2147483647, %v4865_v27 }
 0x2be   : > { %v1469_v33 = vmul.f32 0.6931472, %v3213_v8  ;;  %v2897_v46 = vpack.c.bf16 %v4869_v41, %v4869_v41  ;;  %v5491_v42 = vmax.f32 %v4684_v4, 0.0  ;;  %1163 = vst.msk [vmem:[%s3762_s29 + $0x78] sm:$0xf] %vm1132_vm6, %v2899_v47  ;;  %v2900_v3 = vpack.c.bf16 %v4874_v53, %v4874_v53 }
 0x2bf   : > { %3222 = vpow2.f32 %v1632_v52  ;;  %v1294_v6 = vand.u32 2147483647, %v4869_v41  ;;  %v1577_v2 = vsub.f32 0.0, %v4846_v50  ;;  %v1328_v8 = vsub.f32 0.0, %v1296_v38 }
 0x2c0   : > { %v4888_v34 = vadd.f32 %v1469_v33, %v5491_v42  ;;  %3224 = vlog2.f32 %v1418_v35  ;;  %1161 = vst.msk [vmem:[%s3762_s29 + $0x70] sm:$0xf] %vm1132_vm6, %v2897_v46  ;;  %v1297_v52 = vand.u32 2147483647, %v4874_v53  ;;  %v3270_v33 = vld [vmem:[%s5339_s4] ss:$0 sm:$0xff]  ;;  %v4909_v23 = vmul.f32 %v1867_v25, %v1867_v25 }
 0x2c1   : > { %v3215_v18 = vpop.eup %3214  ;;  %v4903_v35 = vadd.f32 %v3270_v33, %v4220_v63  ;;  %1164 = vst.msk [vmem:[%s3762_s29 + $0x7c] sm:$0xf] %vm1132_vm6, %v2900_v3  ;;  %v1390_v50 = vmul.f32 1.442695, %v1328_v8  ;;  %v1326_v46 = vsub.f32 0.0, %v1294_v6  ;;  %vm1675_vm15 = vcmp.eq.f32.partialorder %v4840_v12, 1.0 }
 0x2c2   : > { %v1926_v47 = vsub.f32 1.0, %v3215_v18  ;;  %v2054_v42 = vmul.f32 %v3215_v18, %v3215_v18  ;;  %v4907_v61 = vsub.f32 %v4684_v4, %v4888_v34  ;;  %5492 = vst [vmem:[#allocation14_spill] sm:$0xff] %v4909_v23  ;;  %v1329_v4 = vsub.f32 0.0, %v1297_v52 }
 0x2c3   : > { %v2898_v51 = vpack.c.bf16 %v4903_v35, %v4903_v35  ;;  %3226 = vpow2.f32 %v1390_v50  ;;  %v1386_v8 = vmul.f32 1.442695, %v1326_v46  ;;  %vm1676_vm0 = vcmp.eq.f32.partialorder %v4733_v13, 1.0 }
 0x2c4   : > { %v3217_v63 = vpop.eup %3216  ;;  %v1958_v33 = vmul.f32 %v1926_v47, %v1926_v47  ;;  %v2086_v18 = vmul.f32 %v2054_v42, %v1574_v43  ;;  %v1628_v40 = vmul.f32 1.442695, %v4907_v61  ;;  %v4925_v42 = vld [vmem:[%s3452_s19 + $0xe0] sm:$0xff]  ;;  %v5494_v52 = vmax.f32 %v4716_v57, 0.0 }
 0x2c5   : > { %v3219_v25 = vpop.eup %3218  ;;  %v1479_v30 = vmul.f32 0.6931472, %v3217_v63  ;;  %1162 = vst.msk [vmem:[%s3762_s29 + $0x74] sm:$0xf] %vm1132_vm6, %v2898_v51  ;;  %5493 = vst [vmem:[#allocation11_spill] sm:$0xff] %v4925_v42  ;;  %vm1677_vm2 = vcmp.eq.f32.partialorder %v4805_v54, 1.0  ;;  %v2192_v23 = vsub.f32 %v4865_v27, %v4959_v45 }
 0x2c6   : > { %v1990_v6 = vmul.f32 %v1958_v33, %v4809_v26  ;;  %v2118_v47 = vmul.f32 %v2086_v18, %v4673_v37  ;;  %3228 = vpow2.f32 %v1628_v40  ;;  %v1421_v43 = vadd.f32 1.0, %v3219_v25 }
 0x2c7   : > { %v4929_v38 = vadd.f32 %v1479_v30, %v5494_v52  ;;  %3230 = vpow2.f32 %v1386_v8  ;;  %v1295_v46 = vand.u32 2147483647, %v4903_v35  ;;  %v3221_v51 = vpop.eup %3220  ;;  %v5496_v37 = vsub.f32 %v3471_v17, %v4636_v39 }
 0x2c8   : > { %v2022_v63 = vmul.f32 %v1990_v6, %v4636_v39  ;;  %3232 = vlog2.f32 %v1421_v43  ;;  %v1392_v40 = vmul.f32 1.442695, %v1329_v4  ;;  %v1419_v18 = vadd.f32 1.0, %v3221_v51 }
 0x2c9   : > { %5495 = vst [vmem:[#allocation19_spill] sm:$0xff] %v4929_v38  ;;  %v4937_v26 = vmul.f32 %v2118_v47, %v5496_v37  ;;  %v3223_v33 = vpop.eup %3222  ;;  %v4941_v30 = vsub.f32 %v4716_v57, %v4929_v38  ;;  %vm1678_vm3 = vcmp.eq.f32.partialorder %v4925_v42, 1.0  ;;  %v1327_v47 = vsub.f32 0.0, %v1295_v46  ;;  %v4947_v37 = vld [vmem:[%s3452_s19 + $0xe8] sm:$0xff]  ;;  %v5096_v38 = vld [vmem:[%s3553_s22 + $0xd8] sm:$0xff] }
 0x2ca   : > { %v3225_v25 = vpop.eup %3224  ;;  %v2298_v8 = vsel %vm2258_vm5, %v2022_v63, 0.0  ;;  %v1929_v6 = vsub.f32 1.0, %v3223_v33  ;;  %v2057_v52 = vmul.f32 %v3223_v33, %v3223_v33  ;;  %5498 = vst [vmem:[#allocation8_spill] sm:$0xff] %v4947_v37  ;;  %3234 = vlog2.f32 %v1419_v18 }
 0x2cb   : > { %5497 = vst [vmem:[#allocation20_spill] sm:$0xff] %v4937_v26  ;;  %v4950_v4 = vadd.f32 %v2298_v8, %v4825_v28  ;;  %v1638_v57 = vmul.f32 1.442695, %v4941_v30  ;;  %v1475_v43 = vmul.f32 0.6931472, %v3225_v25  ;;  %3236 = vpow2.f32 %v1392_v40 }
 0x2cc   : > { %v1961_v51 = vmul.f32 %v1929_v6, %v1929_v6  ;;  %v2089_v50 = vmul.f32 %v2057_v52, %v1577_v2  ;;  %v1388_v3 = vmul.f32 1.442695, %v1327_v47  ;;  %v5499_v33 = vmax.f32 %v4751_v11, 0.0  ;;  %v4967_v2 = vld [vmem:[%s3452_s19 + $0xf8] sm:$0xff]  ;;  %s361_s19 = scalar_lea.vmem %s5343_s8, %s5547_s28 }
 0x2cd   : > { %3238 = vpow2.f32 %v1638_v57  ;;  %vm1679_vm4 = vcmp.eq.f32.partialorder %v4947_v37, 1.0  ;;  %5502 = vst [vmem:[#allocation6_spill] sm:$0xff] %v4967_v2  ;;  %vm1680_vm6 = vcmp.eq.f32.partialorder %v4959_v45, 1.0  ;;  %v4970_v40 = vpop.eup %3226  ;;  %vm1681_vm7 = vcmp.eq.f32.partialorder %v4967_v2, 1.0 }
 0x2ce   : > { %v4956_v46 = vadd.f32 %v1475_v43, %v5499_v33  ;;  %v1993_v28 = vmul.f32 %v1961_v51, %v4856_v56  ;;  %v4964_v25 = vmul.f32 %v2089_v50, %v4702_v49  ;;  %3240 = vpow2.f32 %v1388_v3 }
 0x2cf   : > { %v2860_v49 = vsel %vm1675_vm15, 1.0, %v5461_v59  ;;  %v2861_v50 = vsel %vm1676_vm0, 1.0, %v5461_v59  ;;  %v2863_v6 = vsel %vm1678_vm3, 1.0, %v5461_v59  ;;  %v2864_v43 = vsel %vm1679_vm4, 1.0, %v5461_v59 }
 0x2d0   : > { %5501 = vst [vmem:[#allocation23_spill] sm:$0xff] %v4964_v25  ;;  %v4974_v18 = vsub.f32 %v4751_v11, %v4956_v46  ;;  %v3229_v56 = vpop.eup %3228  ;;  %v4982_v3 = vmul.f32 %v1993_v28, %v4698_v48  ;;  %v2862_v11 = vsel %vm1677_vm2, 1.0, %v5461_v59  ;;  %v2865_v33 = vsel %vm1680_vm6, 1.0, %v5461_v59 }
 0x2d1   : > { %v3231_v52 = vpop.eup %3230  ;;  %v1927_v47 = vsub.f32 1.0, %v3229_v56  ;;  %v2055_v12 = vmul.f32 %v3229_v56, %v3229_v56  ;;  %v2866_v28 = vsel %vm1681_vm7, 1.0, %v5461_v59  ;;  %v5003_v63 = vmul.f32 %v4829_v29, %v3471_v17 }
 0x2d2   : > { %v1634_v57 = vmul.f32 1.442695, %v4974_v18  ;;  %v3233_v51 = vpop.eup %3232  ;;  %v1422_v13 = vadd.f32 1.0, %v3231_v52  ;;  %v5503_v56 = vsub.f32 0.0, %v4888_v34  ;;  %v5008_v1 = vmul.f32 %v2860_v49, %v3471_v17 }
 0x2d3   : > { %v1959_v8 = vmul.f32 %v1927_v47, %v1927_v47  ;;  %v1481_v26 = vmul.f32 0.6931472, %v3233_v51  ;;  %v5011_v52 = vmul.f32 %v2861_v50, %v3471_v17  ;;  %v5014_v44 = vmul.f32 %v2862_v11, %v3471_v17 }
 0x2d4   : > { %v2087_v36 = vmul.f32 %v2055_v12, %v5503_v56  ;;  %3242 = vpow2.f32 %v1634_v57  ;;  %v3235_v59 = vpop.eup %3234  ;;  %v5504_v34 = vmax.f32 %v4775_v16, 0.0  ;;  %v5023_v57 = vmul.f32 %v2863_v6, %v3471_v17 }
 0x2d5   : > { %3244 = vlog2.f32 %v1422_v13  ;;  %v1991_v29 = vmul.f32 %v1959_v8, %v4907_v61  ;;  %v5025_v49 = vpop.eup %3236  ;;  %v1477_v51 = vmul.f32 0.6931472, %v3235_v59  ;;  %v5028_v50 = vmul.f32 %v2864_v43, %v3471_v17  ;;  %v5508_v61 = vld [vmem:[#allocation22_spill] sm:$0xff] }
 0x2d6   : > { %v2119_v47 = vmul.f32 %v2087_v36, %v4743_v62  ;;  %v5020_v12 = vadd.f32 %v1481_v26, %v5504_v34  ;;  %5506 = vst [vmem:[#allocation26_spill] sm:$0xff] %v5023_v57  ;;  %v5031_v11 = vmul.f32 %v2865_v33, %v3471_v17  ;;  %v2439_v8 = vadd.f32 %v5508_v61, %v4546_v21 }
 0x2d7   : > { %5507 = vst [vmem:[#allocation27_spill] sm:$0xff] %v5028_v50  ;;  %v5035_v62 = vpop.eup %3238  ;;  %v2023_v36 = vmul.f32 %v1991_v29, %v4730_v55  ;;  %v5509_v26 = vsub.f32 %v3471_v17, %v4730_v55  ;;  %v2442_v43 = vsel %vm2258_vm5, %v4636_v39, 0.0  ;;  %v5511_v21 = vmax.f32 %v4788_v9, 0.0 }
 0x2d8   : > { %5505 = vst [vmem:[#allocation12_spill] sm:$0xff] %v5020_v12  ;;  %v5045_v13 = vsub.f32 %v4775_v16, %v5020_v12  ;;  %v3241_v33 = vpop.eup %3240  ;;  %v5055_v29 = vmul.f32 %v2866_v28, %v3471_v17  ;;  %v2444_v39 = vsel %vm2258_vm5, %v4730_v55, 0.0  ;;  %v2446_v61 = vsel %vm2258_vm5, %v4591_v22, 0.0  ;;  %v5102_v22 = vld [vmem:[%s3553_s22 + $0xe8] sm:$0xff] }
 0x2d9   : > { %v5041_v6 = vmul.f32 %v2119_v47, %v5509_v26  ;;  %v5052_v59 = vadd.f32 %v1477_v51, %v5511_v21  ;;  %v2441_v47 = vadd.f32 %v4501_v32, %v2439_v8  ;;  %v5059_v34 = vsel %vm2258_vm5, %v2023_v36, 0.0  ;;  %v5089_v8 = vld [vmem:[%s3553_s22 + $0xd0] sm:$0xff] }
 0x2da   : > { %v1640_v16 = vmul.f32 1.442695, %v5045_v13  ;;  %v1423_v28 = vadd.f32 1.0, %v3241_v33  ;;  %v2448_v32 = vsel %vm2258_vm5, %v4698_v48, 0.0  ;;  %v2450_v36 = vsel %vm2258_vm5, %v5003_v63, 0.0 }
 0x2db   : > { %5510 = vst [vmem:[#allocation24_spill] sm:$0xff] %v5041_v6  ;;  %v5068_v51 = vsub.f32 %v4788_v9, %v5052_v59  ;;  %v2443_v26 = vadd.f32 %v2442_v43, %v2441_v47  ;;  %v2452_v55 = vsel %vm2258_vm5, %v5008_v1, 0.0  ;;  %v2454_v43 = vsel %vm2258_vm5, %v5011_v52, 0.0 }
 0x2dc   : > { %3246 = vpow2.f32 %v1640_v16  ;;  %v2456_v33 = vsel %vm2258_vm5, %v5014_v44, 0.0  ;;  %v2458_v16 = vsel %vm2258_vm5, %v5023_v57, 0.0  ;;  %v5086_v56 = vsel %vm2258_vm5, %v5028_v50, 0.0 }
 0x2dd   : > { %v1636_v21 = vmul.f32 1.442695, %v5068_v51  ;;  %v2445_v9 = vadd.f32 %v2444_v39, %v2443_v26  ;;  %v2190_v39 = vsub.f32 %v4869_v41, %v4925_v42  ;;  %v2191_v26 = vsub.f32 %v4903_v35, %v4947_v37 }
 0x2de   : > { %v3243_v47 = vpop.eup %3242  ;;  %v2193_v31 = vsub.f32 %v4874_v53, %v4967_v2  ;;  %v5512_v54 = vsub.f32 0.0, %v4956_v46  ;;  %v2252_v50 = vmul.f32 %v4800_v14, %v5089_v8  ;;  %v2224_v57 = vand.u32 2147483647, %v2192_v23 }
 0x2df   : > { %v3245_v6 = vpop.eup %3244  ;;  %v1930_v19 = vsub.f32 1.0, %v3243_v47  ;;  %v2058_v25 = vmul.f32 %v3243_v47, %v3243_v47  ;;  %3248 = vpow2.f32 %v1636_v21  ;;  %v2447_v12 = vadd.f32 %v2446_v61, %v2445_v9  ;;  %v5113_v21 = vld [vmem:[%s3553_s22 + $0xf0] sm:$0xff]  ;;  %v5116_v9 = vld [vmem:[%s3553_s22 + $0xf8] sm:$0xff] }
 0x2e0   : > { %v2222_v10 = vand.u32 2147483647, %v2190_v39  ;;  %v2223_v37 = vand.u32 2147483647, %v2191_v26  ;;  %v2225_v45 = vand.u32 2147483647, %v2193_v31  ;;  %v2253_v2 = vmul.f32 %v4881_v20, %v5096_v38 }
 0x2e1   : > { %v1962_v42 = vmul.f32 %v1930_v19, %v1930_v19  ;;  %v5110_v47 = vmul.f32 %v2058_v25, %v5512_v54  ;;  %v2449_v61 = vadd.f32 %v2448_v32, %v2447_v12  ;;  %v2462_v54 = vsel %vm2258_vm5, %v5031_v11, 0.0 }
 0x2e2   : > { %v2254_v39 = vmul.f32 %v2222_v10, %v5099_v7  ;;  %v2255_v46 = vmul.f32 %v2223_v37, %v5102_v22  ;;  %v2519_v25 = vadd.f32 %v4631_v5, %v4760_v15  ;;  %v2464_v12 = vsel %vm2258_vm5, %v5055_v29, 0.0 }
 0x2e3   : > { %v2451_v19 = vadd.f32 %v2450_v36, %v2449_v61  ;;  %v2256_v14 = vmul.f32 %v2224_v57, %v5113_v21  ;;  %v2257_v23 = vmul.f32 %v2225_v45, %v5116_v9  ;;  %v2522_v31 = vsel %vm2258_vm5, %v4812_v0, 0.0 }
 0x2e4   : > { %v1994_v10 = vmul.f32 %v1962_v42, %v4974_v18  ;;  %v2521_v32 = vadd.f32 %v4710_v58, %v2519_v25  ;;  %v2524_v37 = vsel %vm2258_vm5, %v4877_v24, 0.0  ;;  %v2526_v5 = vsel %vm2258_vm5, %v2252_v50, 0.0 }
 0x2e5   : > { %v2453_v20 = vadd.f32 %v2452_v55, %v2451_v19  ;;  %v2528_v15 = vsel %vm2258_vm5, %v2253_v2, 0.0  ;;  %v2530_v57 = vsel %vm2258_vm5, %v2254_v39, 0.0  ;;  %v2532_v45 = vsel %vm2258_vm5, %v2255_v46, 0.0 }
 0x2e6   : > { %v5138_v36 = vpop.eup %3246  ;;  %v2523_v0 = vadd.f32 %v2522_v31, %v2521_v32  ;;  %v2534_v42 = vsel %vm2258_vm5, %v2256_v14, 0.0  ;;  %v2536_v18 = vsel %vm2258_vm5, %v2257_v23, 0.0  ;;  %v1424_v58 = vadd.f32 1.0, %v4970_v40 }
 0x2e7   : > { %v2455_v26 = vadd.f32 %v2454_v43, %v2453_v20  ;;  %v1425_v24 = vadd.f32 1.0, %v5025_v49  ;;  %v1483_v55 = vmul.f32 0.6931472, %v3245_v6  ;;  %3250 = vlog2.f32 %v1423_v28 }
 0x2e8   : > { %v2525_v19 = vadd.f32 %v2524_v37, %v2523_v0  ;;  %v1932_v2 = vsub.f32 1.0, %v5035_v62  ;;  %v1933_v39 = vsub.f32 1.0, %v5138_v36  ;;  %v1264_v43 = vmax.f32 %v4865_v27, 0.0 }
 0x2e9   : > { %v3249_v61 = vpop.eup %3248  ;;  %v2457_v50 = vadd.f32 %v2456_v33, %v2455_v26  ;;  %3252 = vlog2.f32 %v1424_v58  ;;  %v5513_v25 = vmax.f32 %v4869_v41, 0.0  ;;  %v2026_v26 = vmul.f32 %v1994_v10, %v5003_v63 }
 0x2ea   : > { %v1931_v46 = vsub.f32 1.0, %v3249_v61  ;;  %v2527_v23 = vadd.f32 %v2526_v5, %v2525_v19  ;;  %3254 = vlog2.f32 %v1425_v24  ;;  %v1964_v49 = vmul.f32 %v1932_v2, %v1932_v2 }
 0x2eb   : > { %v5153_v14 = vadd.f32 %v1483_v55, %v5513_v25  ;;  %v2459_v40 = vadd.f32 %v2458_v16, %v2457_v50  ;;  %v2059_v28 = vmul.f32 %v3249_v61, %v3249_v61  ;;  %v1965_v31 = vmul.f32 %v1933_v39, %v1933_v39 }
 0x2ec   : > { %v1963_v6 = vmul.f32 %v1931_v46, %v1931_v46  ;;  %v2529_v32 = vadd.f32 %v2528_v15, %v2527_v23  ;;  %v1996_v37 = vmul.f32 %v1964_v49, %v4941_v30  ;;  %v2301_v58 = vadd.f32 %v5059_v34, %v4950_v4 }
 0x2ed   : > { %v5157_v33 = vsub.f32 %v4869_v41, %v5153_v14  ;;  %v2461_v20 = vadd.f32 %v5086_v56, %v2459_v40  ;;  %v1997_v5 = vmul.f32 %v1965_v31, %v5045_v13  ;;  %v2302_v56 = vsel %vm2258_vm5, %v4850_v60, 0.0 }
 0x2ee   : > { %v1995_v0 = vmul.f32 %v1963_v6, %v5068_v51  ;;  %v2531_v41 = vadd.f32 %v2530_v57, %v2529_v32  ;;  %v2028_v55 = vmul.f32 %v1996_v37, %v5011_v52  ;;  %v2303_v51 = vadd.f32 %v2302_v56, %v2301_v58  ;;  %v5516_v37 = vld [vmem:[#allocation26_spill] sm:$0xff]  ;;  %v5519_v56 = vld [vmem:[#allocation11_spill] sm:$0xff] }
 0x2ef   : > { %v1642_v16 = vmul.f32 1.442695, %v5157_v33  ;;  %v2463_v24 = vadd.f32 %v2462_v54, %v2461_v20  ;;  %v2029_v10 = vmul.f32 %v1997_v5, %v5014_v44  ;;  %v2304_v13 = vsel %vm2258_vm5, %v4982_v3, 0.0 }
 0x2f0   : > { %v2027_v30 = vmul.f32 %v1995_v0, %v5008_v1  ;;  %v2533_v61 = vadd.f32 %v2532_v45, %v2531_v41  ;;  %v2306_v4 = vsel %vm2258_vm5, %v2026_v26, 0.0  ;;  %v5514_v54 = vsub.f32 0.0, %v5052_v59  ;;  %v5517_v0 = vld [vmem:[#allocation27_spill] sm:$0xff] }
 0x2f1   : > { %3256 = vpow2.f32 %v1642_v16  ;;  %v2465_v15 = vadd.f32 %v2464_v12, %v2463_v24  ;;  %v3251_v34 = vpop.eup %3250  ;;  %v1265_v60 = vmax.f32 %v4874_v53, 0.0  ;;  %v2305_v50 = vadd.f32 %v2304_v13, %v2303_v51  ;;  %v5518_v24 = vld [vmem:[#allocation9_spill] sm:$0xff]  ;;  %v5520_v13 = vld [vmem:[#allocation8_spill] sm:$0xff] }
 0x2f2   : > { %v5177_v57 = vmul.f32 %v2059_v28, %v5514_v54  ;;  %v2308_v19 = vsel %vm2258_vm5, %v2027_v30, 0.0  ;;  %v2535_v2 = vadd.f32 %v2534_v42, %v2533_v61  ;;  %v1485_v39 = vmul.f32 0.6931472, %v3251_v34  ;;  %v5521_v54 = vld [vmem:[#allocation16_spill] sm:$0xff] }
 0x2f3   : > { %2466 = vadd.xlane.f32.xlu1 %v2465_v15  ;;  %v2310_v12 = vsel %vm2258_vm5, %v2028_v55, 0.0  ;;  %v2312_v45 = vsel %vm2258_vm5, %v2029_v10, 0.0  ;;  %v3253_v3 = vpop.eup %3252  ;;  %v2307_v46 = vadd.f32 %v2306_v4, %v2305_v50  ;;  %v1582_v25 = vsub.f32 0.0, %v5153_v14 }
 0x2f4   : > { %v1801_v59 = vsub.f32 %v3471_v17, %v4698_v48  ;;  %v1802_v40 = vsub.f32 %v3471_v17, %v5003_v63  ;;  %v3255_v23 = vpop.eup %3254  ;;  %v2537_v49 = vadd.f32 %v2536_v18, %v2535_v2  ;;  %v1487_v6 = vmul.f32 0.6931472, %v3253_v3 }
 0x2f5   : > { %v5515_v42 = vmax.f32 %v4903_v35, 0.0  ;;  %v1803_v31 = vsub.f32 %v3471_v17, %v5008_v1  ;;  %v1489_v20 = vmul.f32 0.6931472, %v3255_v23  ;;  %v2309_v32 = vadd.f32 %v2308_v19, %v2307_v46  ;;  %v5522_v19 = vld [vmem:[#allocation6_spill] sm:$0xff] }
 0x2f6   : > { %v1804_v14 = vsub.f32 %v3471_v17, %v5011_v52  ;;  %v1805_v48 = vsub.f32 %v3471_v17, %v5014_v44  ;;  %v5198_v63 = vadd.f32 %v1487_v6, %v1264_v43  ;;  %v1806_v26 = vsub.f32 %v3471_v17, %v5516_v37 }
 0x2f7   : > { %v5190_v28 = vadd.f32 %v1485_v39, %v5515_v42  ;;  %2538 = vadd.xlane.f32.xlu1 %v2537_v49  ;;  %v1807_v1 = vsub.f32 %v3471_v17, %v5517_v0  ;;  %v5208_v16 = vadd.f32 %v1489_v20, %v1265_v60  ;;  %v2311_v5 = vadd.f32 %v2310_v12, %v2309_v32  ;;  %v5523_v42 = vld [vmem:[#allocation3_spill] sm:$0xff] }
 0x2f8   : > { %v1837_v41 = vsub.f32 1.0, %v5518_v24  ;;  %v5214_v43 = vsub.f32 %v4865_v27, %v5198_v63  ;;  %v1808_v55 = vsub.f32 %v3471_v17, %v5031_v11  ;;  %v1838_v30 = vsub.f32 1.0, %v5519_v56 }
 0x2f9   : > { %v5202_v18 = vsub.f32 %v4903_v35, %v5190_v28  ;;  %v1583_v58 = vsub.f32 0.0, %v5190_v28  ;;  %v5222_v51 = vsub.f32 %v4874_v53, %v5208_v16  ;;  %v2313_v15 = vadd.f32 %v2312_v45, %v2311_v5 }
 0x2fa   : > { %v1809_v61 = vsub.f32 %v3471_v17, %v5055_v29  ;;  %v1839_v4 = vsub.f32 1.0, %v5520_v13  ;;  %v1646_v27 = vmul.f32 1.442695, %v5214_v43  ;;  %v1840_v60 = vsub.f32 1.0, %v5521_v54  ;;  %v5525_v13 = vld [vmem:[#allocation14_spill] sm:$0xff] }
 0x2fb   : > { %v1644_v35 = vmul.f32 1.442695, %v5202_v18  ;;  %v3257_v10 = vpop.eup %3256  ;;  %v1648_v50 = vmul.f32 1.442695, %v5222_v51  ;;  %v1841_v2 = vsub.f32 1.0, %v5522_v19  ;;  %v1869_v39 = vmul.f32 %v1837_v41, %v1837_v41  ;;  %v5531_v19 = vld [vmem:[#allocation12_spill] sm:$0xff] }
 0x2fc   : > { %v1934_v34 = vsub.f32 1.0, %v3257_v10  ;;  %v1870_v12 = vmul.f32 %v1838_v30, %v1838_v30  ;;  %v1584_v45 = vsub.f32 0.0, %v5198_v63  ;;  %v1871_v3 = vmul.f32 %v1839_v4, %v1839_v4  ;;  %v5526_v4 = vld [vmem:[#allocation13_spill] sm:$0xff] }
 0x2fd   : > { %3258 = vpow2.f32 %v1644_v35  ;;  %v1585_v46 = vsub.f32 0.0, %v5208_v16  ;;  %v1872_v23 = vmul.f32 %v1840_v60, %v1840_v60  ;;  %v1873_v49 = vmul.f32 %v1841_v2, %v1841_v2  ;;  %v5524_v16 = vld [vmem:[#allocation21_spill] sm:$0xff]  ;;  %v5529_v60 = vld [vmem:[#allocation19_spill] sm:$0xff] }
 0x2fe   : > { %3260 = vpow2.f32 %v1646_v27  ;;  %v1966_v53 = vmul.f32 %v1934_v34, %v1934_v34  ;;  %v1900_v20 = vmul.f32 %v5523_v42, %v5523_v42  ;;  %v1901_v32 = vmul.f32 %v1869_v39, %v1869_v39  ;;  %v5528_v34 = vld [vmem:[#allocation18_spill] sm:$0xff]  ;;  %v5533_v39 = vld [vmem:[#allocation23_spill] sm:$0xff] }
 0x2ff   : > { %3262 = vpow2.f32 %v1648_v50  ;;  %v1902_v5 = vmul.f32 %v1870_v12, %v1870_v12  ;;  %v1903_v24 = vmul.f32 %v1871_v3, %v1871_v3  ;;  %v2060_v41 = vmul.f32 %v5035_v62, %v5035_v62 }
 0x300   : > { %v1998_v6 = vmul.f32 %v1966_v53, %v5157_v33  ;;  %v2061_v63 = vmul.f32 %v5138_v36, %v5138_v36  ;;  %v2062_v35 = vmul.f32 %v3257_v10, %v3257_v10  ;;  %v2122_v30 = vmul.f32 %v5110_v47, %v5524_v16 }
 0x301   : > { %v2123_v33 = vmul.f32 %v5177_v57, %v5525_v13  ;;  %v5527_v27 = vsub.f32 %v3471_v17, %v5526_v4  ;;  %v5530_v50 = vsub.f32 0.0, %v5529_v60  ;;  %v5532_v2 = vsub.f32 0.0, %v5531_v19  ;;  %v5535_v57 = vld [vmem:[#allocation25_spill] sm:$0xff]  ;;  %v5537_v19 = vld [vmem:[#allocation20_spill] sm:$0xff] }
 0x302   : > { %v2030_v56 = vmul.f32 %v1998_v6, %v5516_v37  ;;  %v2094_v10 = vmul.f32 %v2062_v35, %v1582_v25  ;;  %v2153_v12 = vmul.f32 %v5533_v39, %v1801_v59  ;;  %v2154_v47 = vmul.f32 %v2122_v30, %v1802_v40  ;;  %v5534_v6 = vld [vmem:[#allocation7_spill] sm:$0xff]  ;;  %v5542_v17 = vld [vmem:[#allocation5_spill] sm:$0xff] }
 0x303   : > { %v2152_v54 = vmul.f32 %v5528_v34, %v5527_v27  ;;  %v2092_v62 = vmul.f32 %v2060_v41, %v5530_v50  ;;  %v2093_v36 = vmul.f32 %v2061_v63, %v5532_v2  ;;  %v2155_v3 = vmul.f32 %v2123_v33, %v1803_v31  ;;  %v5536_v41 = vld [vmem:[#allocation15_spill] sm:$0xff]  ;;  %v5538_v63 = vld [vmem:[#allocation24_spill] sm:$0xff] }
 0x304   : > { %v2314_v53 = vsel %vm2258_vm5, %v2030_v56, 0.0  ;;  %v2367_v42 = vadd.f32 %v5535_v57, %v5534_v6  ;;  %v2126_v27 = vmul.f32 %v2094_v10, %v1902_v5  ;;  %v1904_v60 = vmul.f32 %v1872_v23, %v1872_v23 }
 0x305   : > { %v2315_v16 = vadd.f32 %v2314_v53, %v2313_v15  ;;  %v2124_v13 = vmul.f32 %v2092_v62, %v1900_v20  ;;  %v2125_v4 = vmul.f32 %v2093_v36, %v1901_v32  ;;  %v2370_v25 = vsel %vm2258_vm5, %v5537_v19, 0.0 }
 0x306   : > { %v2369_v50 = vadd.f32 %v5536_v41, %v2367_v42  ;;  %v2372_v59 = vsel %vm2258_vm5, %v5538_v63, 0.0  ;;  %v1905_v23 = vmul.f32 %v1873_v49, %v1873_v49  ;;  %v2158_v32 = vmul.f32 %v2126_v27, %v1806_v26  ;;  %v5540_v41 = vld [vmem:[#allocation4_spill] sm:$0xff]  ;;  %v5541_v63 = vld [vmem:[#allocation17_spill] sm:$0xff] }
 0x307   : > { %v3259_v34 = vpop.eup %3258  ;;  %v2156_v31 = vmul.f32 %v2124_v13, %v1804_v14  ;;  %v2157_v15 = vmul.f32 %v2125_v4, %v1805_v48  ;;  %v2374_v56 = vsel %vm2258_vm5, %v2152_v54, 0.0  ;;  %v2376_v49 = vsel %vm2258_vm5, %v2153_v12, 0.0  ;;  %v3271_v12 = vld [vmem:[%s3553_s22 + $0xb8] sm:$0xff] }
 0x308   : > { %v1935_v35 = vsub.f32 1.0, %v3259_v34  ;;  %v2063_v40 = vmul.f32 %v3259_v34, %v3259_v34  ;;  %v3261_v20 = vpop.eup %3260  ;;  %v2371_v5 = vadd.f32 %v2370_v25, %v2369_v50  ;;  %v2378_v6 = vsel %vm2258_vm5, %v2154_v47, 0.0 }
 0x309   : > { %v3263_v30 = vpop.eup %3262  ;;  %v1936_v33 = vsub.f32 1.0, %v3261_v20  ;;  %v2064_v2 = vmul.f32 %v3261_v20, %v3261_v20  ;;  %v2592_v13 = vsel %vm2258_vm5, %v3271_v12, 0.0  ;;  %v2380_v4 = vsel %vm2258_vm5, %v2155_v3, 0.0 }
 0x30a   : > { %v1967_v62 = vmul.f32 %v1935_v35, %v1935_v35  ;;  %v2095_v52 = vmul.f32 %v2063_v40, %v1583_v58  ;;  %v1937_v14 = vsub.f32 1.0, %v3263_v30  ;;  %v2065_v44 = vmul.f32 %v3263_v30, %v3263_v30 }
 0x30b   : > { %v2373_v48 = vadd.f32 %v2372_v59, %v2371_v5  ;;  %v1968_v36 = vmul.f32 %v1936_v33, %v1936_v33  ;;  %v2096_v26 = vmul.f32 %v2064_v2, %v1584_v45  ;;  %v2386_v40 = vsel %vm2258_vm5, %v2158_v32, 0.0 }
 0x30c   : > { %v1999_v37 = vmul.f32 %v1967_v62, %v5202_v18  ;;  %v2127_v10 = vmul.f32 %v2095_v52, %v1903_v24  ;;  %v1969_v39 = vmul.f32 %v1937_v14, %v1937_v14  ;;  %v2097_v54 = vmul.f32 %v2065_v44, %v1585_v46 }
 0x30d   : > { %v2375_v53 = vadd.f32 %v2374_v56, %v2373_v48  ;;  %v2000_v57 = vmul.f32 %v1968_v36, %v5214_v43  ;;  %v2128_v58 = vmul.f32 %v2096_v26, %v1904_v60  ;;  %v5539_v60 = vld [vmem:[#allocation10_spill] sm:$0xff]  ;;  %v2598_v5 = vsel %vm2258_vm5, %v5089_v8, 0.0 }
 0x30e   : > { %v2031_v28 = vmul.f32 %v1999_v37, %v5517_v0  ;;  %v2159_v42 = vmul.f32 %v2127_v10, %v1807_v1  ;;  %v2001_v18 = vmul.f32 %v1969_v39, %v5222_v51  ;;  %v2129_v45 = vmul.f32 %v2097_v54, %v1905_v23 }
 0x30f   : > { %v2377_v24 = vadd.f32 %v2376_v49, %v2375_v53  ;;  %v2032_v46 = vmul.f32 %v2000_v57, %v5031_v11  ;;  %v2160_v43 = vmul.f32 %v2128_v58, %v1808_v55  ;;  %v2591_v50 = vadd.f32 %v5540_v41, %v5539_v60 }
 0x310   : > { %v2316_v47 = vsel %vm2258_vm5, %v2031_v28, 0.0  ;;  %v2033_v0 = vmul.f32 %v2001_v18, %v5055_v29  ;;  %v2161_v27 = vmul.f32 %v2129_v45, %v1809_v61  ;;  %v2382_v55 = vsel %vm2258_vm5, %v2156_v31, 0.0 }
 0x311   : > { %v2317_v1 = vadd.f32 %v2316_v47, %v2315_v16  ;;  %v2379_v51 = vadd.f32 %v2378_v6, %v2377_v24  ;;  %v2318_v34 = vsel %vm2258_vm5, %v2032_v46, 0.0  ;;  %v2593_v3 = vadd.f32 %v2592_v13, %v2591_v50 }
 0x312   : > { %v2320_v11 = vsel %vm2258_vm5, %v2033_v0, 0.0  ;;  %v2594_v16 = vsel %vm2258_vm5, %v5541_v63, 0.0  ;;  %v2596_v29 = vsel %vm2258_vm5, %v5542_v17, 0.0  ;;  %v2384_v61 = vsel %vm2258_vm5, %v2157_v15, 0.0 }
 0x313   : > { %v2319_v19 = vadd.f32 %v2318_v34, %v2317_v1  ;;  %v2381_v25 = vadd.f32 %v2380_v4, %v2379_v51  ;;  %v2595_v20 = vadd.f32 %v2594_v16, %v2593_v3  ;;  %v2388_v31 = vsel %vm2258_vm5, %v2159_v42, 0.0 }
 0x314   : > { %v2600_v33 = vsel %vm2258_vm5, %v5096_v38, 0.0  ;;  %v2602_v15 = vsel %vm2258_vm5, %v5099_v7, 0.0  ;;  %v2390_v32 = vsel %vm2258_vm5, %v2160_v43, 0.0  ;;  %v2604_v44 = vsel %vm2258_vm5, %v5102_v22, 0.0 }
 0x315   : > { %v2321_v59 = vadd.f32 %v2320_v11, %v2319_v19  ;;  %v2383_v35 = vadd.f32 %v2382_v55, %v2381_v25  ;;  %v2597_v56 = vadd.f32 %v2596_v29, %v2595_v20  ;;  %v2392_v8 = vsel %vm2258_vm5, %v2161_v27, 0.0 }
 0x316   : > { %v2606_v36 = vsel %vm2258_vm5, %v5113_v21, 0.0  ;;  %v2608_v37 = vsel %vm2258_vm5, %v5116_v9, 0.0 }
 0x317   : > { %2322 = vadd.xlane.f32.xlu0 %v2321_v59  ;;  %v2385_v23 = vadd.f32 %v2384_v61, %v2383_v35  ;;  %v2599_v62 = vadd.f32 %v2598_v5, %v2597_v56  ;;  %v5543_v59 = vld [vmem:[#allocation2_spill] sm:$0xff] }
 0x318   : > { %vm2622_vm5 = vcmp.eq.s32.totalorder %v5543_v59, 1  ;;  %vm2626_vm8 = vcmp.eq.s32.totalorder %v5543_v59, 2  ;;  %vm2630_vm9 = vcmp.eq.s32.totalorder %v5543_v59, 3  ;;  %vm2634_vm10 = vcmp.eq.s32.totalorder %v5543_v59, 4 }
 0x319   : > { %v2387_v30 = vadd.f32 %v2386_v40, %v2385_v23  ;;  %v2601_v52 = vadd.f32 %v2600_v33, %v2599_v62 }
 0x31b   : > { %v2389_v2 = vadd.f32 %v2388_v31, %v2387_v30  ;;  %v2603_v48 = vadd.f32 %v2602_v15, %v2601_v52 }
 0x31d   : > { %v2391_v14 = vadd.f32 %v2390_v32, %v2389_v2  ;;  %v2605_v38 = vadd.f32 %v2604_v44, %v2603_v48 }
 0x31f   : > { %v2393_v49 = vadd.f32 %v2392_v8, %v2391_v14  ;;  %v2607_v7 = vadd.f32 %v2606_v36, %v2605_v38 }
 0x321   : > { %2394 = vadd.xlane.f32.xlu0 %v2393_v49  ;;  %v2609_v26 = vadd.f32 %v2608_v37, %v2607_v7 }
 0x325   : > { %2610 = vadd.xlane.f32.xlu0 %v2609_v26 }
 0x380   : > { %v2467_v10 = vpop.xlane.xlu1 %2466 }
 0x381   : > { %v2468_v22 = vrot.slane %v2467_v10, 4 }
 0x383   : > { %v2469_v58 = vadd.f32 %v2468_v22, %v2467_v10 }
 0x384   : > { %v2539_v39 = vpop.xlane.xlu1 %2538 }
 0x385   : > { %v2540_v6 = vrot.slane %v2539_v39, 4  ;;  %v2470_v13 = vrot.slane %v2469_v58, 2 }
 0x387   : > { %v2541_v42 = vadd.f32 %v2540_v6, %v2539_v39  ;;  %v2471_v47 = vadd.f32 %v2470_v13, %v2469_v58 }
 0x389   : > { %v2542_v45 = vrot.slane %v2541_v42, 2  ;;  %v2472_v34 = vrot.slane %v2471_v47, 1 }
 0x38b   : > { %v2543_v43 = vadd.f32 %v2542_v45, %v2541_v42  ;;  %v2473_v11 = vadd.f32 %v2472_v34, %v2471_v47 }
 0x38d   : > { %v2544_v41 = vrot.slane %v2543_v43, 1 }
 0x38f   : > { %v2545_v55 = vadd.f32 %v2544_v41, %v2543_v43 }
 0x3a4   : > { %v2323_v54 = vpop.xlane.xlu0 %2322 }
 0x3a5   : > { %v2324_v53 = vrot.slane %v2323_v54, 4 }
 0x3a7   : > { %v2325_v57 = vadd.f32 %v2324_v53, %v2323_v54 }
 0x3a9   : > { %v2326_v28 = vrot.slane %v2325_v57, 2 }
 0x3ab   : > { %v2327_v12 = vadd.f32 %v2326_v28, %v2325_v57 }
 0x3ad   : > { %v2328_v21 = vrot.slane %v2327_v12, 1 }
 0x3ae   : > { %v2395_v18 = vpop.xlane.xlu0 %2394 }
 0x3af   : > { %v2396_v24 = vrot.slane %v2395_v18, 4  ;;  %v2329_v9 = vadd.f32 %v2328_v21, %v2327_v12 }
 0x3b1   : > { %v2397_v46 = vadd.f32 %v2396_v24, %v2395_v18  ;;  %3027 = vpush %v2329_v9 }
 0x3b2   : > { %v2611_v0 = vpop.xlane.xlu0 %2610 }
 0x3b3   : > { %v2398_v4 = vrot.slane %v2397_v46, 2  ;;  %v2612_v1 = vrot.slane %v2611_v0, 4 }
 0x3b5   : > { %v2399_v27 = vadd.f32 %v2398_v4, %v2397_v46  ;;  %v2613_v51 = vadd.f32 %v2612_v1, %v2611_v0 }
 0x3b7   : > { %v2400_v60 = vrot.slane %v2399_v27, 1  ;;  %v2614_v50 = vrot.slane %v2613_v51, 2 }
 0x3b9   : > { %v2401_v19 = vadd.f32 %v2400_v60, %v2399_v27  ;;  %v2615_v25 = vadd.f32 %v2614_v50, %v2613_v51 }
 0x3bb   : > { %3029 = vpush %v2401_v19  ;;  %v2616_v3 = vrot.slane %v2615_v25, 1 }
 0x3bc   : > { %3031 = vpush %v2473_v11 }
 0x3bd   : > { %3033 = vpush %v2545_v55  ;;  %v2617_v63 = vadd.f32 %v2616_v3, %v2615_v25 }
 0x3bf   : > { %3035 = vpush %v2617_v63 }
 0x3e2   : > { %s3028_s11 = spop %3027 }
 0x3e3   : > { %v2619_v16 = vstv %s3028_s11 }
 0x3e4   : > { %v2620_v17 = vsel %vm1231_vm1, %v2619_v16, 0.0  ;;  %vm2638_vm1 = vcmask 57344  }
 0x3ec   : > { %s3030_s12 = spop %3029 }
 0x3ed   : > { %v2623_v35 = vstv %s3030_s12  ;;  %s3032_s13 = spop %3031 }
 0x3ee   : > { %v2624_v29 = vsel %vm2622_vm5, %v2623_v35, 0.0  ;;  %v2627_v61 = vstv %s3032_s13  ;;  %s3034_s15 = spop %3033 }
 0x3ef   : > { %v2625_v40 = vadd.f32 %v2624_v29, %v2620_v17  ;;  %v2631_v20 = vstv %s3034_s15  ;;  %v2628_v23 = vsel %vm2626_vm8, %v2627_v61, 0.0 }
 0x3f0   : > { %s3036_s16 = spop %3035  ;;  %v2632_v31 = vsel %vm2630_vm9, %v2631_v20, 0.0 }
 0x3f1   : > { %v2629_v5 = vadd.f32 %v2628_v23, %v2625_v40  ;;  %v2635_v56 = vstv %s3036_s16 }
 0x3f2   : > { %v2636_v33 = vsel %vm2634_vm10, %v2635_v56, 0.0 }
 0x3f3   : > { %v2633_v30 = vadd.f32 %v2632_v31, %v2629_v5 }
 0x3f5   : > { %v2637_v62 = vadd.f32 %v2636_v33, %v2633_v30 }
 0x3f7   : > { %2639 = vst.msk [vmem:[%s361_s19] sm:$0x1] %vm2638_vm1, %v2637_v62 }
 0x3f8 PF: > { %s19_s27 = sadd.s32 1, %s3278_s27  }
 0x3f9   : > { %p16_p5 = scmp.ge.s32.totalorder %s19_s27, 4  }
 0x3fb   :  { %18 = sbr.rel (!%p16_p5) target bundleno = 1 (0x1), region = 96 }

</bundles_post_ra>
